<compile_context>
chip_gen: v7x
topology: tpu7x:2x2x1
jax: 0.10.0
libtpu: 0.0.40
codegen_flags: <defaults>
</compile_context>

<pallas_src>
import math
import functools

import jax
import jax.numpy as jnp
from jax.experimental import pallas as pl
from jax.experimental.pallas import tpu as pltpu

LN_EPS = 1e-5  # nn.LayerNorm default


@functools.lru_cache(maxsize=None)
def _vmem_limit_bytes():
    # v7x has only 64 MiB VMEM per TensorCore; cap scoped VMEM at <= 32 MiB
    # (harmless extra headroom on v5e/v6e's 128 MiB).
    try:
        cap = int(pltpu.get_tpu_info().vmem_capacity_bytes)
    except Exception:
        cap = 64 * 1024 * 1024
    return int(min(cap // 2, 32 * 1024 * 1024))


def _cparams(semantics):
    return pltpu.CompilerParams(dimension_semantics=semantics,
                                vmem_limit_bytes=_vmem_limit_bytes())


def _pick_tile(n, prefs=(512, 256, 128, 64, 32, 16, 8)):
    """Largest preferred tile that divides n (falls back to full extent)."""
    for t in prefs:
        if t <= n and n % t == 0:
            return t
    return n


# --------------------------- in-kernel helpers --------------------------------

def _layernorm(x, g, b):
    mu = jnp.mean(x, axis=-1, keepdims=True)
    var = jnp.mean((x - mu) ** 2, axis=-1, keepdims=True)
    return (x - mu) * jax.lax.rsqrt(var + LN_EPS) * g + b


def _bdot(x, w_ref, b_ref):
    """bf16 x bf16 -> f32 matmul with f32 bias add (MXU-native)."""
    return jnp.dot(x.astype(jnp.bfloat16), w_ref[...],
                   preferred_element_type=jnp.float32) + b_ref[...]


def _sdpa(q_all, k_all, v_all, num_heads, causal):
    """Multi-head scaled-dot-product attention on whole (small) sequences.

    q_all: (Sq, E) f32 (1/sqrt(Dh) already folded into Wq at init),
    k_all/v_all: (Sk, E) f32.  Returns concatenated heads: (Sq, E) f32.
    """
    # TODO(synk): for long sequences, tile the KV axis flash-style (running
    # max/sum scratch, 'arbitrary' grid axis) instead of whole-seq scores.
    Sq, E = q_all.shape
    Dh = E // num_heads
    outs = []
    for h in range(num_heads):
        sl = slice(h * Dh, (h + 1) * Dh)
        q = q_all[:, sl].astype(jnp.bfloat16)
        k = k_all[:, sl].astype(jnp.bfloat16)
        v = v_all[:, sl].astype(jnp.bfloat16)
        # scores: contract over Dh (no explicit transpose needed)
        s = jax.lax.dot_general(q, k, (((1,), (1,)), ((), ())),
                                preferred_element_type=jnp.float32)
        if causal:
            qi = jax.lax.broadcasted_iota(jnp.int32, s.shape, 0)
            kj = jax.lax.broadcasted_iota(jnp.int32, s.shape, 1)
            s = jnp.where(kj <= qi, s, -1e30)        # finite mask: no NaN risk
        s = s - jnp.max(s, axis=-1, keepdims=True)
        p = jnp.exp(s)
        p = p / jnp.sum(p, axis=-1, keepdims=True)   # exact softmax
        outs.append(jnp.dot(p.astype(jnp.bfloat16), v,
                            preferred_element_type=jnp.float32))
    return jnp.concatenate(outs, axis=-1)            # (Sq, E)


# ----------------------- fused encoder layer kernel ---------------------------

def _enc_layer_kernel(x_ref, wqkv_ref, bqkv_ref, wo_ref, bo_ref,
                      n1g_ref, n1b_ref,
                      w1_ref, b1_ref, w2_ref, b2_ref,
                      n2g_ref, n2b_ref, nfg_ref, nfb_ref, o_ref,
                      *, num_heads, apply_final_ln):
    x = x_ref[0]                                        # (S, E) f32
    E = x.shape[-1]

    # --- causal self-attention (reference passes src_mask = subsequent mask) ---
    qkv = _bdot(x, wqkv_ref, bqkv_ref)                  # one (S,E)@(E,3E) matmul
    ctx = _sdpa(qkv[:, :E], qkv[:, E:2 * E], qkv[:, 2 * E:],
                num_heads, causal=True)
    attn = _bdot(ctx, wo_ref, bo_ref)                   # one (S,E)@(E,E) matmul
    y = _layernorm(x + attn, n1g_ref[...], n1b_ref[...])

    # --- FFN ---
    # TODO(synk): for large hidden dims on v7x, K-tile the hidden axis with an
    # f32 VMEM accumulator instead of full (E,Hd)+(Hd,E) residency.
    h = jnp.maximum(_bdot(y, w1_ref, b1_ref), 0.0)
    f = _bdot(h, w2_ref, b2_ref)
    z = _layernorm(y + f, n2g_ref[...], n2b_ref[...])

    if apply_final_ln:                                   # final encoder norm fused
        z = _layernorm(z, nfg_ref[...], nfb_ref[...])
    o_ref[0] = z


def encoder_layer(x, lp, final_ln, *, num_heads, apply_final_ln):
    B, S, E = x.shape
    sa, ff = lp["self_attn"], lp["ffn"]
    Hd = ff["w1"].shape[1]
    vec = lambda a: a.reshape(1, -1)
    # Grid-invariant blocks (constant index_map) stay VMEM-resident across steps.
    # TODO(synk): for very large models add pipeline_mode=pl.Buffered(1) on the
    # weight blocks to drop the second (unused) pipeline buffer on v7x.
    const = lambda shape: pl.BlockSpec(shape, lambda b: (0,) * len(shape))
    kernel = functools.partial(_enc_layer_kernel, num_heads=num_heads,
                               apply_final_ln=apply_final_ln)
    return pl.pallas_call(
        kernel,
        out_shape=jax.ShapeDtypeStruct((B, S, E), jnp.float32),
        grid=(B,),
        in_specs=[
            pl.BlockSpec((1, S, E), lambda b: (b, 0, 0)),        # x
            const((E, 3 * E)), const((1, 3 * E)),                # wqkv, bqkv
            const((E, E)), const((1, E)),                        # wo, bo
            const((1, E)), const((1, E)),                        # norm1 g, b
            const((E, Hd)), const((1, Hd)),                      # w1, b1
            const((Hd, E)), const((1, E)),                       # w2, b2
            const((1, E)), const((1, E)),                        # norm2 g, b
            const((1, E)), const((1, E)),                        # final enc norm
        ],
        out_specs=pl.BlockSpec((1, S, E), lambda b: (b, 0, 0)),
        compiler_params=_cparams(("parallel",)),
    )(x, sa["wqkv"], vec(sa["bqkv"]), sa["wo"], vec(sa["bo"]),
      vec(lp["norm1_g"]), vec(lp["norm1_b"]),
      ff["w1"], vec(ff["b1"]), ff["w2"], vec(ff["b2"]),
      vec(lp["norm2_g"]), vec(lp["norm2_b"]),
      vec(final_ln[0]), vec(final_ln[1]))


# ----------------------- fused decoder layer kernel ---------------------------

def _dec_layer_kernel(y_ref, mem_ref,
                      s_wqkv_ref, s_bqkv_ref, s_wo_ref, s_bo_ref,
                      n1g_ref, n1b_ref,
                      c_wq_ref, c_bq_ref, c_wkv_ref, c_bkv_ref, c_wo_ref, c_bo_ref,
                      n2g_ref, n2b_ref,
                      w1_ref, b1_ref, w2_ref, b2_ref,
                      n3g_ref, n3b_ref, o_ref, *, num_heads):
    y = y_ref[0]                                        # (T, E) f32
    mem = mem_ref[0]                                    # (S, E) f32
    E = y.shape[-1]

    # --- causal self-attention (tgt_mask) ---
    qkv = _bdot(y, s_wqkv_ref, s_bqkv_ref)
    ctx = _sdpa(qkv[:, :E], qkv[:, E:2 * E], qkv[:, 2 * E:],
                num_heads, causal=True)
    attn = _bdot(ctx, s_wo_ref, s_bo_ref)
    y1 = _layernorm(y + attn, n1g_ref[...], n1b_ref[...])

    # --- cross-attention over encoder memory (no mask) ---
    q = _bdot(y1, c_wq_ref, c_bq_ref)                   # (T, E)
    kv = _bdot(mem, c_wkv_ref, c_bkv_ref)               # (S, 2E)
    ctx2 = _sdpa(q, kv[:, :E], kv[:, E:], num_heads, causal=False)
    attn2 = _bdot(ctx2, c_wo_ref, c_bo_ref)
    y2 = _layernorm(y1 + attn2, n2g_ref[...], n2b_ref[...])

    # --- FFN ---
    h = jnp.maximum(_bdot(y2, w1_ref, b1_ref), 0.0)
    f = _bdot(h, w2_ref, b2_ref)
    o_ref[0] = _layernorm(y2 + f, n3g_ref[...], n3b_ref[...])


def decoder_layer(y, mem, lp, *, num_heads):
    B, T, E = y.shape
    S = mem.shape[1]
    sa, ca, ff = lp["self_attn"], lp["cross_attn"], lp["ffn"]
    Hd = ff["w1"].shape[1]
    vec = lambda a: a.reshape(1, -1)
    const = lambda shape: pl.BlockSpec(shape, lambda b: (0,) * len(shape))
    kernel = functools.partial(_dec_layer_kernel, num_heads=num_heads)
    return pl.pallas_call(
        kernel,
        out_shape=jax.ShapeDtypeStruct((B, T, E), jnp.float32),
        grid=(B,),
        in_specs=[
            pl.BlockSpec((1, T, E), lambda b: (b, 0, 0)),        # y
            pl.BlockSpec((1, S, E), lambda b: (b, 0, 0)),        # mem
            const((E, 3 * E)), const((1, 3 * E)),                # self wqkv, bqkv
            const((E, E)), const((1, E)),                        # self wo, bo
            const((1, E)), const((1, E)),                        # norm1
            const((E, E)), const((1, E)),                        # cross wq, bq
            const((E, 2 * E)), const((1, 2 * E)),                # cross wkv, bkv
            const((E, E)), const((1, E)),                        # cross wo, bo
            const((1, E)), const((1, E)),                        # norm2
            const((E, Hd)), const((1, Hd)),                      # w1, b1
            const((Hd, E)), const((1, E)),                       # w2, b2
            const((1, E)), const((1, E)),                        # norm3
        ],
        out_specs=pl.BlockSpec((1, T, E), lambda b: (b, 0, 0)),
        compiler_params=_cparams(("parallel",)),
    )(y, mem,
      sa["wqkv"], vec(sa["bqkv"]), sa["wo"], vec(sa["bo"]),
      vec(lp["norm1_g"]), vec(lp["norm1_b"]),
      ca["wq"], vec(ca["bq"]), ca["wkv"], vec(ca["bkv"]), ca["wo"], vec(ca["bo"]),
      vec(lp["norm2_g"]), vec(lp["norm2_b"]),
      ff["w1"], vec(ff["b1"]), ff["w2"], vec(ff["b2"]),
      vec(lp["norm3_g"]), vec(lp["norm3_b"]))


# -------------- final LayerNorm fused into tiled vocab projection -------------

def _ln_proj_kernel(x_ref, g_ref, bt_ref, w_ref, b_ref, o_ref):
    xn = _layernorm(x_ref[...], g_ref[...], bt_ref[...])
    o_ref[...] = jnp.dot(xn.astype(jnp.bfloat16), w_ref[...],
                         preferred_element_type=jnp.float32) + b_ref[...]


def ln_linear(x2d, gamma, beta, w, b):
    """LayerNorm(x) @ W + b, tiled over (rows, vocab); rows stay resident while
    the weight streams over lane-dense N tiles (weight-streaming friendly)."""
    M, E = x2d.shape
    N = w.shape[1]
    tm = _pick_tile(M)
    tn = _pick_tile(N, prefs=(1024, 512, 256, 128))
    return pl.pallas_call(
        _ln_proj_kernel,
        out_shape=jax.ShapeDtypeStruct((M, N), jnp.float32),
        grid=(M // tm, N // tn),          # N innermost: x block stays resident
        in_specs=[
            pl.BlockSpec((tm, E), lambda i, j: (i, 0)),
            pl.BlockSpec((1, E), lambda i, j: (0, 0)),
            pl.BlockSpec((1, E), lambda i, j: (0, 0)),
            pl.BlockSpec((E, tn), lambda i, j: (0, j)),
            pl.BlockSpec((1, tn), lambda i, j: (0, j)),
        ],
        out_specs=pl.BlockSpec((tm, tn), lambda i, j: (i, j)),
        compiler_params=_cparams(("parallel", "parallel")),
    )(x2d, gamma.reshape(1, E), beta.reshape(1, E), w, b.reshape(1, N))


# ------------------------------ model pieces ----------------------------------

def make_pe(max_len, d_model):
    position = jnp.arange(max_len, dtype=jnp.float32)[:, None]
    div_term = jnp.exp(jnp.arange(0, d_model, 2, dtype=jnp.float32)
                       * -(math.log(10000.0) / d_model))
    pe = jnp.zeros((max_len, 1, d_model), jnp.float32)
    pe = pe.at[:, 0, 0::2].set(jnp.sin(position * div_term))
    pe = pe.at[:, 0, 1::2].set(jnp.cos(position * div_term))
    return pe


def transformer_forward(params, src_ids, tgt_ids, *, num_heads):
    E = params["embed"].shape[1]
    B, S = src_ids.shape
    T = tgt_ids.shape[1]
    pe = params["pe"]

    # Embedding gather (XLA glue) + sqrt(E) scale + positional encoding.
    # NOTE: the reference adds pe[:x.size(0)]; with batch_first inputs that is
    # pe[:B] broadcast over the *sequence* axis — reproduced here on purpose.
    src = jnp.take(params["embed"], src_ids, axis=0) * math.sqrt(E) + pe[:B]
    tgt = jnp.take(params["embed"], tgt_ids, axis=0) * math.sqrt(E) + pe[:B]
    # TODO(synk): nn.Dropout layers are identity at inference; no RNG dropout.

    # ---- encoder: one fused pallas_call per layer; the final encoder
    #      LayerNorm is folded into the last layer's kernel ----
    x = src
    n_enc = len(params["enc_layers"])
    for li, lp in enumerate(params["enc_layers"]):
        x = encoder_layer(x, lp, (params["enc_norm_g"], params["enc_norm_b"]),
                          num_heads=num_heads,
                          apply_final_ln=(li == n_enc - 1))
    mem = x

    # ---- decoder: one fused pallas_call per layer ----
    y = tgt
    for lp in params["dec_layers"]:
        y = decoder_layer(y, mem, lp, num_heads=num_heads)

    # final decoder LayerNorm fused into the tiled vocab projection
    logits = ln_linear(y.reshape(B * T, E),
                       params["dec_norm_g"], params["dec_norm_b"],
                       params["dec_w"], params["dec_b"]).reshape(B, T, -1)
    return logits


# ------------------------------ parameter init --------------------------------

class KeyGen:
    def __init__(self, seed):
        self._key = jax.random.PRNGKey(seed)

    def __call__(self):
        self._key, sub = jax.random.split(self._key)
        return sub


def init_params(seed, vocab, E, num_heads, num_layers, hidden, max_len=64):
    assert E % num_heads == 0
    kg = KeyGen(seed)
    Dh = E // num_heads
    scale = 1.0 / math.sqrt(Dh)          # folded into Q weights (no runtime mul)
    bf16 = jnp.bfloat16

    def w(shape, s=0.02):
        return s * jax.random.normal(kg(), shape, jnp.float32)

    zeros = lambda shape: jnp.zeros(shape, jnp.float32)
    ones = lambda shape: jnp.ones(shape, jnp.float32)

    def self_attn():
        # Q/K/V packed into a single lane-dense (E, 3E) bf16 weight.
        wqkv = jnp.concatenate([w((E, E)) * scale, w((E, E)), w((E, E))], axis=1)
        return dict(wqkv=wqkv.astype(bf16), bqkv=zeros((3 * E,)),
                    wo=w((E, E)).astype(bf16), bo=zeros((E,)))

    def cross_attn():
        wkv = jnp.concatenate([w((E, E)), w((E, E))], axis=1)
        return dict(wq=(w((E, E)) * scale).astype(bf16), bq=zeros((E,)),
                    wkv=wkv.astype(bf16), bkv=zeros((2 * E,)),
                    wo=w((E, E)).astype(bf16), bo=zeros((E,)))

    def ffn():
        return dict(w1=w((E, hidden)).astype(bf16), b1=zeros((hidden,)),
                    w2=w((hidden, E)).astype(bf16), b2=zeros((E,)))

    def enc_layer():
        return dict(self_attn=self_attn(), ffn=ffn(),
                    norm1_g=ones((E,)), norm1_b=zeros((E,)),
                    norm2_g=ones((E,)), norm2_b=zeros((E,)))

    def dec_layer():
        return dict(self_attn=self_attn(), cross_attn=cross_attn(), ffn=ffn(),
                    norm1_g=ones((E,)), norm1_b=zeros((E,)),
                    norm2_g=ones((E,)), norm2_b=zeros((E,)),
                    norm3_g=ones((E,)), norm3_b=zeros((E,)))

    return dict(
        embed=w((vocab, E), s=1.0),
        pe=make_pe(max_len, E),
        enc_layers=[enc_layer() for _ in range(num_layers)],
        dec_layers=[dec_layer() for _ in range(num_layers)],
        enc_norm_g=ones((E,)), enc_norm_b=zeros((E,)),
        dec_norm_g=ones((E,)), dec_norm_b=zeros((E,)),
        dec_w=w((E, vocab)).astype(bf16), dec_b=zeros((vocab,)),
    )


# ------------------------------ demo -------------------------------------------

if __name__ == "__main__":
    # 128-aligned model dims keep every kernel block lane-dense.
    vocab_size, embed_size, num_heads, num_layers, hidden_dim = 128, 128, 4, 2, 256
    B, S, T = 2, 16, 8

    key = jax.random.PRNGKey(0)
    k_src, k_tgt = jax.random.split(key)
    src = jax.random.randint(k_src, (B, S), 0, vocab_size, dtype=jnp.int32)
    tgt = jax.random.randint(k_tgt, (B, T), 0, vocab_size, dtype=jnp.int32)

    params = init_params(seed=0, vocab=vocab_size, E=embed_size,
                         num_heads=num_heads, num_layers=num_layers,
                         hidden=hidden_dim)

    fwd = jax.jit(functools.partial(transformer_forward, num_heads=num_heads))
    out = fwd(params, src, tgt)
    jax.block_until_ready(out)
    assert out.shape == (B, T, vocab_size)
    assert bool(jnp.all(jnp.isfinite(out)))
    print("KERNEL_OK")
</pallas_src>

<mosaic_0001>
module attributes {stable_mosaic.version = 11 : i64} {
  func.func @_enc_layer_kernel(%arg0: i32, %arg1: memref<1x16x128xf32, #tpu.memory_space<vmem>>, %arg2: memref<128x384xbf16, #tpu.memory_space<vmem>>, %arg3: memref<1x384xf32, #tpu.memory_space<vmem>>, %arg4: memref<128x128xbf16, #tpu.memory_space<vmem>>, %arg5: memref<1x128xf32, #tpu.memory_space<vmem>>, %arg6: memref<1x128xf32, #tpu.memory_space<vmem>>, %arg7: memref<1x128xf32, #tpu.memory_space<vmem>>, %arg8: memref<128x256xbf16, #tpu.memory_space<vmem>>, %arg9: memref<1x256xf32, #tpu.memory_space<vmem>>, %arg10: memref<256x128xbf16, #tpu.memory_space<vmem>>, %arg11: memref<1x128xf32, #tpu.memory_space<vmem>>, %arg12: memref<1x128xf32, #tpu.memory_space<vmem>>, %arg13: memref<1x128xf32, #tpu.memory_space<vmem>>, %arg14: memref<1x128xf32, #tpu.memory_space<vmem>>, %arg15: memref<1x128xf32, #tpu.memory_space<vmem>>, %arg16: memref<1x16x128xf32, #tpu.memory_space<vmem>>) attributes {dimension_semantics = [#tpu.dimension_semantics<parallel>], iteration_bounds = array<i64: 2>, scalar_prefetch = 0 : i64, scratch_operands = 0 : i64, tpu.core_type = #tpu.core_type<tc>, window_params = [{transform_indices = @transform_0, window_bounds = array<i64: 1, 16, 128>}, {pipeline_mode = #tpu.pipeline_mode<synchronous>, transform_indices = @transform_1, window_bounds = array<i64: 128, 384>}, {pipeline_mode = #tpu.pipeline_mode<synchronous>, transform_indices = @transform_2, window_bounds = array<i64: 1, 384>}, {pipeline_mode = #tpu.pipeline_mode<synchronous>, transform_indices = @transform_3, window_bounds = array<i64: 128, 128>}, {pipeline_mode = #tpu.pipeline_mode<synchronous>, transform_indices = @transform_4, window_bounds = array<i64: 1, 128>}, {pipeline_mode = #tpu.pipeline_mode<synchronous>, transform_indices = @transform_5, window_bounds = array<i64: 1, 128>}, {pipeline_mode = #tpu.pipeline_mode<synchronous>, transform_indices = @transform_6, window_bounds = array<i64: 1, 128>}, {pipeline_mode = #tpu.pipeline_mode<synchronous>, transform_indices = @transform_7, window_bounds = array<i64: 128, 256>}, {pipeline_mode = #tpu.pipeline_mode<synchronous>, transform_indices = @transform_8, window_bounds = array<i64: 1, 256>}, {pipeline_mode = #tpu.pipeline_mode<synchronous>, transform_indices = @transform_9, window_bounds = array<i64: 256, 128>}, {pipeline_mode = #tpu.pipeline_mode<synchronous>, transform_indices = @transform_10, window_bounds = array<i64: 1, 128>}, {pipeline_mode = #tpu.pipeline_mode<synchronous>, transform_indices = @transform_11, window_bounds = array<i64: 1, 128>}, {pipeline_mode = #tpu.pipeline_mode<synchronous>, transform_indices = @transform_12, window_bounds = array<i64: 1, 128>}, {pipeline_mode = #tpu.pipeline_mode<synchronous>, transform_indices = @transform_13, window_bounds = array<i64: 1, 128>}, {pipeline_mode = #tpu.pipeline_mode<synchronous>, transform_indices = @transform_14, window_bounds = array<i64: 1, 128>}, {transform_indices = @transform_15, window_bounds = array<i64: 1, 16, 128>}]} {
    %c0 = arith.constant 0 : index
    %c0_0 = arith.constant 0 : index
    %c0_1 = arith.constant 0 : index
    %0 = vector.load %arg1[%c0, %c0_0, %c0_1] : memref<1x16x128xf32, #tpu.memory_space<vmem>>, vector<1x16x128xf32>
    %1 = vector.shape_cast %0 : vector<1x16x128xf32> to vector<16x128xf32>
    %2 = arith.truncf %1 : vector<16x128xf32> to vector<16x128xbf16>
    %c0_2 = arith.constant 0 : index
    %c0_3 = arith.constant 0 : index
    %3 = vector.load %arg2[%c0_2, %c0_3] : memref<128x384xbf16, #tpu.memory_space<vmem>>, vector<128x384xbf16>
    %cst = arith.constant dense<0.000000e+00> : vector<16x384xf32>
    %4 = tpu.matmul %2, %3, %cst {dimension_numbers = #tpu.dot_dimension_numbers<[1], [0], [0], [1], [0, 0, 1, 1], [], []>} : vector<16x128xbf16>, vector<128x384xbf16>, vector<16x384xf32> -> vector<16x384xf32>
    %c0_4 = arith.constant 0 : index
    %c0_5 = arith.constant 0 : index
    %5 = vector.load %arg3[%c0_4, %c0_5] : memref<1x384xf32, #tpu.memory_space<vmem>>, vector<1x384xf32>
    %6 = vector.broadcast %5 : vector<1x384xf32> to vector<16x384xf32>
    %7 = arith.addf %4, %6 : vector<16x384xf32>
    %8 = vector.extract_strided_slice %7 {offsets = [0, 0], sizes = [16, 128], strides = [1, 1]} : vector<16x384xf32> to vector<16x128xf32>
    %9 = vector.extract_strided_slice %7 {offsets = [0, 128], sizes = [16, 128], strides = [1, 1]} : vector<16x384xf32> to vector<16x128xf32>
    %10 = vector.extract_strided_slice %7 {offsets = [0, 256], sizes = [16, 128], strides = [1, 1]} : vector<16x384xf32> to vector<16x128xf32>
    %11 = vector.extract_strided_slice %8 {offsets = [0, 0], sizes = [16, 32], strides = [1, 1]} : vector<16x128xf32> to vector<16x32xf32>
    %12 = arith.truncf %11 : vector<16x32xf32> to vector<16x32xbf16>
    %13 = vector.extract_strided_slice %9 {offsets = [0, 0], sizes = [16, 32], strides = [1, 1]} : vector<16x128xf32> to vector<16x32xf32>
    %14 = arith.truncf %13 : vector<16x32xf32> to vector<16x32xbf16>
    %15 = vector.extract_strided_slice %10 {offsets = [0, 0], sizes = [16, 32], strides = [1, 1]} : vector<16x128xf32> to vector<16x32xf32>
    %16 = arith.truncf %15 : vector<16x32xf32> to vector<16x32xbf16>
    %cst_6 = arith.constant dense<0.000000e+00> : vector<16x16xf32>
    %17 = tpu.matmul %12, %14, %cst_6 {dimension_numbers = #tpu.dot_dimension_numbers<[1], [1], [0], [0], [0, 0, 1, 0], [], []>} : vector<16x32xbf16>, vector<16x32xbf16>, vector<16x16xf32> -> vector<16x16xf32>
    %18 = tpu.iota {dimensions = array<i32: 0>} : vector<16x16xi32>
    %19 = tpu.iota {dimensions = array<i32: 1>} : vector<16x16xi32>
    %20 = arith.cmpi sle, %19, %18 : vector<16x16xi32>
    %cst_7 = arith.constant -1.000000e+30 : f32
    %21 = vector.broadcast %cst_7 : f32 to vector<16x16xf32>
    %22 = arith.select %20, %17, %21 : vector<16x16xi1>, vector<16x16xf32>
    %cst_8 = arith.constant dense<0xFF800000> : vector<16xf32>
    %23 = vector.multi_reduction <maximumf>, %22, %cst_8 [1] : vector<16x16xf32> to vector<16xf32>
    %24 = vector.shape_cast %23 : vector<16xf32> to vector<16x1xf32>
    %25 = vector.broadcast %24 : vector<16x1xf32> to vector<16x16xf32>
    %26 = arith.subf %22, %25 : vector<16x16xf32>
    %27 = math.exp %26 : vector<16x16xf32>
    %cst_9 = arith.constant dense<0.000000e+00> : vector<16xf32>
    %28 = vector.multi_reduction <add>, %27, %cst_9 [1] : vector<16x16xf32> to vector<16xf32>
    %29 = vector.shape_cast %28 : vector<16xf32> to vector<16x1xf32>
    %30 = vector.broadcast %29 : vector<16x1xf32> to vector<16x16xf32>
    %31 = arith.divf %27, %30 : vector<16x16xf32>
    %32 = arith.truncf %31 : vector<16x16xf32> to vector<16x16xbf16>
    %cst_10 = arith.constant dense<0.000000e+00> : vector<16x32xf32>
    %33 = tpu.matmul %32, %16, %cst_10 {dimension_numbers = #tpu.dot_dimension_numbers<[1], [0], [0], [1], [0, 0, 1, 1], [], []>} : vector<16x16xbf16>, vector<16x32xbf16>, vector<16x32xf32> -> vector<16x32xf32>
    %34 = vector.extract_strided_slice %8 {offsets = [0, 32], sizes = [16, 32], strides = [1, 1]} : vector<16x128xf32> to vector<16x32xf32>
    %35 = arith.truncf %34 : vector<16x32xf32> to vector<16x32xbf16>
    %36 = vector.extract_strided_slice %9 {offsets = [0, 32], sizes = [16, 32], strides = [1, 1]} : vector<16x128xf32> to vector<16x32xf32>
    %37 = arith.truncf %36 : vector<16x32xf32> to vector<16x32xbf16>
    %38 = vector.extract_strided_slice %10 {offsets = [0, 32], sizes = [16, 32], strides = [1, 1]} : vector<16x128xf32> to vector<16x32xf32>
    %39 = arith.truncf %38 : vector<16x32xf32> to vector<16x32xbf16>
    %cst_11 = arith.constant dense<0.000000e+00> : vector<16x16xf32>
    %40 = tpu.matmul %35, %37, %cst_11 {dimension_numbers = #tpu.dot_dimension_numbers<[1], [1], [0], [0], [0, 0, 1, 0], [], []>} : vector<16x32xbf16>, vector<16x32xbf16>, vector<16x16xf32> -> vector<16x16xf32>
    %41 = tpu.iota {dimensions = array<i32: 0>} : vector<16x16xi32>
    %42 = tpu.iota {dimensions = array<i32: 1>} : vector<16x16xi32>
    %43 = arith.cmpi sle, %42, %41 : vector<16x16xi32>
    %cst_12 = arith.constant -1.000000e+30 : f32
    %44 = vector.broadcast %cst_12 : f32 to vector<16x16xf32>
    %45 = arith.select %43, %40, %44 : vector<16x16xi1>, vector<16x16xf32>
    %cst_13 = arith.constant dense<0xFF800000> : vector<16xf32>
    %46 = vector.multi_reduction <maximumf>, %45, %cst_13 [1] : vector<16x16xf32> to vector<16xf32>
    %47 = vector.shape_cast %46 : vector<16xf32> to vector<16x1xf32>
    %48 = vector.broadcast %47 : vector<16x1xf32> to vector<16x16xf32>
    %49 = arith.subf %45, %48 : vector<16x16xf32>
    %50 = math.exp %49 : vector<16x16xf32>
    %cst_14 = arith.constant dense<0.000000e+00> : vector<16xf32>
    %51 = vector.multi_reduction <add>, %50, %cst_14 [1] : vector<16x16xf32> to vector<16xf32>
    %52 = vector.shape_cast %51 : vector<16xf32> to vector<16x1xf32>
    %53 = vector.broadcast %52 : vector<16x1xf32> to vector<16x16xf32>
    %54 = arith.divf %50, %53 : vector<16x16xf32>
    %55 = arith.truncf %54 : vector<16x16xf32> to vector<16x16xbf16>
    %cst_15 = arith.constant dense<0.000000e+00> : vector<16x32xf32>
    %56 = tpu.matmul %55, %39, %cst_15 {dimension_numbers = #tpu.dot_dimension_numbers<[1], [0], [0], [1], [0, 0, 1, 1], [], []>} : vector<16x16xbf16>, vector<16x32xbf16>, vector<16x32xf32> -> vector<16x32xf32>
    %57 = vector.extract_strided_slice %8 {offsets = [0, 64], sizes = [16, 32], strides = [1, 1]} : vector<16x128xf32> to vector<16x32xf32>
    %58 = arith.truncf %57 : vector<16x32xf32> to vector<16x32xbf16>
    %59 = vector.extract_strided_slice %9 {offsets = [0, 64], sizes = [16, 32], strides = [1, 1]} : vector<16x128xf32> to vector<16x32xf32>
    %60 = arith.truncf %59 : vector<16x32xf32> to vector<16x32xbf16>
    %61 = vector.extract_strided_slice %10 {offsets = [0, 64], sizes = [16, 32], strides = [1, 1]} : vector<16x128xf32> to vector<16x32xf32>
    %62 = arith.truncf %61 : vector<16x32xf32> to vector<16x32xbf16>
    %cst_16 = arith.constant dense<0.000000e+00> : vector<16x16xf32>
    %63 = tpu.matmul %58, %60, %cst_16 {dimension_numbers = #tpu.dot_dimension_numbers<[1], [1], [0], [0], [0, 0, 1, 0], [], []>} : vector<16x32xbf16>, vector<16x32xbf16>, vector<16x16xf32> -> vector<16x16xf32>
    %64 = tpu.iota {dimensions = array<i32: 0>} : vector<16x16xi32>
    %65 = tpu.iota {dimensions = array<i32: 1>} : vector<16x16xi32>
    %66 = arith.cmpi sle, %65, %64 : vector<16x16xi32>
    %cst_17 = arith.constant -1.000000e+30 : f32
    %67 = vector.broadcast %cst_17 : f32 to vector<16x16xf32>
    %68 = arith.select %66, %63, %67 : vector<16x16xi1>, vector<16x16xf32>
    %cst_18 = arith.constant dense<0xFF800000> : vector<16xf32>
    %69 = vector.multi_reduction <maximumf>, %68, %cst_18 [1] : vector<16x16xf32> to vector<16xf32>
    %70 = vector.shape_cast %69 : vector<16xf32> to vector<16x1xf32>
    %71 = vector.broadcast %70 : vector<16x1xf32> to vector<16x16xf32>
    %72 = arith.subf %68, %71 : vector<16x16xf32>
    %73 = math.exp %72 : vector<16x16xf32>
    %cst_19 = arith.constant dense<0.000000e+00> : vector<16xf32>
    %74 = vector.multi_reduction <add>, %73, %cst_19 [1] : vector<16x16xf32> to vector<16xf32>
    %75 = vector.shape_cast %74 : vector<16xf32> to vector<16x1xf32>
    %76 = vector.broadcast %75 : vector<16x1xf32> to vector<16x16xf32>
    %77 = arith.divf %73, %76 : vector<16x16xf32>
    %78 = arith.truncf %77 : vector<16x16xf32> to vector<16x16xbf16>
    %cst_20 = arith.constant dense<0.000000e+00> : vector<16x32xf32>
    %79 = tpu.matmul %78, %62, %cst_20 {dimension_numbers = #tpu.dot_dimension_numbers<[1], [0], [0], [1], [0, 0, 1, 1], [], []>} : vector<16x16xbf16>, vector<16x32xbf16>, vector<16x32xf32> -> vector<16x32xf32>
    %80 = vector.extract_strided_slice %8 {offsets = [0, 96], sizes = [16, 32], strides = [1, 1]} : vector<16x128xf32> to vector<16x32xf32>
    %81 = arith.truncf %80 : vector<16x32xf32> to vector<16x32xbf16>
    %82 = vector.extract_strided_slice %9 {offsets = [0, 96], sizes = [16, 32], strides = [1, 1]} : vector<16x128xf32> to vector<16x32xf32>
    %83 = arith.truncf %82 : vector<16x32xf32> to vector<16x32xbf16>
    %84 = vector.extract_strided_slice %10 {offsets = [0, 96], sizes = [16, 32], strides = [1, 1]} : vector<16x128xf32> to vector<16x32xf32>
    %85 = arith.truncf %84 : vector<16x32xf32> to vector<16x32xbf16>
    %cst_21 = arith.constant dense<0.000000e+00> : vector<16x16xf32>
    %86 = tpu.matmul %81, %83, %cst_21 {dimension_numbers = #tpu.dot_dimension_numbers<[1], [1], [0], [0], [0, 0, 1, 0], [], []>} : vector<16x32xbf16>, vector<16x32xbf16>, vector<16x16xf32> -> vector<16x16xf32>
    %87 = tpu.iota {dimensions = array<i32: 0>} : vector<16x16xi32>
    %88 = tpu.iota {dimensions = array<i32: 1>} : vector<16x16xi32>
    %89 = arith.cmpi sle, %88, %87 : vector<16x16xi32>
    %cst_22 = arith.constant -1.000000e+30 : f32
    %90 = vector.broadcast %cst_22 : f32 to vector<16x16xf32>
    %91 = arith.select %89, %86, %90 : vector<16x16xi1>, vector<16x16xf32>
    %cst_23 = arith.constant dense<0xFF800000> : vector<16xf32>
    %92 = vector.multi_reduction <maximumf>, %91, %cst_23 [1] : vector<16x16xf32> to vector<16xf32>
    %93 = vector.shape_cast %92 : vector<16xf32> to vector<16x1xf32>
    %94 = vector.broadcast %93 : vector<16x1xf32> to vector<16x16xf32>
    %95 = arith.subf %91, %94 : vector<16x16xf32>
    %96 = math.exp %95 : vector<16x16xf32>
    %cst_24 = arith.constant dense<0.000000e+00> : vector<16xf32>
    %97 = vector.multi_reduction <add>, %96, %cst_24 [1] : vector<16x16xf32> to vector<16xf32>
    %98 = vector.shape_cast %97 : vector<16xf32> to vector<16x1xf32>
    %99 = vector.broadcast %98 : vector<16x1xf32> to vector<16x16xf32>
    %100 = arith.divf %96, %99 : vector<16x16xf32>
    %101 = arith.truncf %100 : vector<16x16xf32> to vector<16x16xbf16>
    %cst_25 = arith.constant dense<0.000000e+00> : vector<16x32xf32>
    %102 = tpu.matmul %101, %85, %cst_25 {dimension_numbers = #tpu.dot_dimension_numbers<[1], [0], [0], [1], [0, 0, 1, 1], [], []>} : vector<16x16xbf16>, vector<16x32xbf16>, vector<16x32xf32> -> vector<16x32xf32>
    %103 = tpu.concatenate %33, %56, %79, %102 in 1 : vector<16x32xf32>, vector<16x32xf32>, vector<16x32xf32>, vector<16x32xf32> -> vector<16x128xf32>
    %104 = arith.truncf %103 : vector<16x128xf32> to vector<16x128xbf16>
    %c0_26 = arith.constant 0 : index
    %c0_27 = arith.constant 0 : index
    %105 = vector.load %arg4[%c0_26, %c0_27] : memref<128x128xbf16, #tpu.memory_space<vmem>>, vector<128x128xbf16>
    %cst_28 = arith.constant dense<0.000000e+00> : vector<16x128xf32>
    %106 = tpu.matmul %104, %105, %cst_28 {dimension_numbers = #tpu.dot_dimension_numbers<[1], [0], [0], [1], [0, 0, 1, 1], [], []>} : vector<16x128xbf16>, vector<128x128xbf16>, vector<16x128xf32> -> vector<16x128xf32>
    %c0_29 = arith.constant 0 : index
    %c0_30 = arith.constant 0 : index
    %107 = vector.load %arg5[%c0_29, %c0_30] : memref<1x128xf32, #tpu.memory_space<vmem>>, vector<1x128xf32>
    %108 = vector.broadcast %107 : vector<1x128xf32> to vector<16x128xf32>
    %109 = arith.addf %106, %108 : vector<16x128xf32>
    %110 = arith.addf %1, %109 : vector<16x128xf32>
    %c0_31 = arith.constant 0 : index
    %c0_32 = arith.constant 0 : index
    %111 = vector.load %arg6[%c0_31, %c0_32] : memref<1x128xf32, #tpu.memory_space<vmem>>, vector<1x128xf32>
    %c0_33 = arith.constant 0 : index
    %c0_34 = arith.constant 0 : index
    %112 = vector.load %arg7[%c0_33, %c0_34] : memref<1x128xf32, #tpu.memory_space<vmem>>, vector<1x128xf32>
    %cst_35 = arith.constant dense<0.000000e+00> : vector<16xf32>
    %113 = vector.multi_reduction <add>, %110, %cst_35 [1] : vector<16x128xf32> to vector<16xf32>
    %114 = vector.shape_cast %113 : vector<16xf32> to vector<16x1xf32>
    %cst_36 = arith.constant 1.280000e+02 : f32
    %115 = vector.broadcast %cst_36 : f32 to vector<16x1xf32>
    %116 = arith.divf %114, %115 : vector<16x1xf32>
    %117 = vector.broadcast %116 : vector<16x1xf32> to vector<16x128xf32>
    %118 = arith.subf %110, %117 : vector<16x128xf32>
    %119 = arith.mulf %118, %118 : vector<16x128xf32>
    %cst_37 = arith.constant dense<0.000000e+00> : vector<16xf32>
    %120 = vector.multi_reduction <add>, %119, %cst_37 [1] : vector<16x128xf32> to vector<16xf32>
    %121 = vector.shape_cast %120 : vector<16xf32> to vector<16x1xf32>
    %cst_38 = arith.constant 1.280000e+02 : f32
    %122 = vector.broadcast %cst_38 : f32 to vector<16x1xf32>
    %123 = arith.divf %121, %122 : vector<16x1xf32>
    %124 = vector.broadcast %116 : vector<16x1xf32> to vector<16x128xf32>
    %125 = arith.subf %110, %124 : vector<16x128xf32>
    %cst_39 = arith.constant 9.99999974E-6 : f32
    %126 = vector.broadcast %cst_39 : f32 to vector<16x1xf32>
    %127 = arith.addf %123, %126 : vector<16x1xf32>
    %128 = math.rsqrt %127 : vector<16x1xf32>
    %129 = vector.broadcast %128 : vector<16x1xf32> to vector<16x128xf32>
    %130 = arith.mulf %125, %129 : vector<16x128xf32>
    %131 = vector.broadcast %111 : vector<1x128xf32> to vector<16x128xf32>
    %132 = arith.mulf %130, %131 : vector<16x128xf32>
    %133 = vector.broadcast %112 : vector<1x128xf32> to vector<16x128xf32>
    %134 = arith.addf %132, %133 : vector<16x128xf32>
    %135 = arith.truncf %134 : vector<16x128xf32> to vector<16x128xbf16>
    %c0_40 = arith.constant 0 : index
    %c0_41 = arith.constant 0 : index
    %136 = vector.load %arg8[%c0_40, %c0_41] : memref<128x256xbf16, #tpu.memory_space<vmem>>, vector<128x256xbf16>
    %cst_42 = arith.constant dense<0.000000e+00> : vector<16x256xf32>
    %137 = tpu.matmul %135, %136, %cst_42 {dimension_numbers = #tpu.dot_dimension_numbers<[1], [0], [0], [1], [0, 0, 1, 1], [], []>} : vector<16x128xbf16>, vector<128x256xbf16>, vector<16x256xf32> -> vector<16x256xf32>
    %c0_43 = arith.constant 0 : index
    %c0_44 = arith.constant 0 : index
    %138 = vector.load %arg9[%c0_43, %c0_44] : memref<1x256xf32, #tpu.memory_space<vmem>>, vector<1x256xf32>
    %139 = vector.broadcast %138 : vector<1x256xf32> to vector<16x256xf32>
    %140 = arith.addf %137, %139 : vector<16x256xf32>
    %cst_45 = arith.constant 0.000000e+00 : f32
    %141 = vector.broadcast %cst_45 : f32 to vector<16x256xf32>
    %142 = arith.maximumf %140, %141 : vector<16x256xf32>
    %143 = arith.truncf %142 : vector<16x256xf32> to vector<16x256xbf16>
    %c0_46 = arith.constant 0 : index
    %c0_47 = arith.constant 0 : index
    %144 = vector.load %arg10[%c0_46, %c0_47] : memref<256x128xbf16, #tpu.memory_space<vmem>>, vector<256x128xbf16>
    %cst_48 = arith.constant dense<0.000000e+00> : vector<16x128xf32>
    %145 = tpu.matmul %143, %144, %cst_48 {dimension_numbers = #tpu.dot_dimension_numbers<[1], [0], [0], [1], [0, 0, 1, 1], [], []>} : vector<16x256xbf16>, vector<256x128xbf16>, vector<16x128xf32> -> vector<16x128xf32>
    %c0_49 = arith.constant 0 : index
    %c0_50 = arith.constant 0 : index
    %146 = vector.load %arg11[%c0_49, %c0_50] : memref<1x128xf32, #tpu.memory_space<vmem>>, vector<1x128xf32>
    %147 = vector.broadcast %146 : vector<1x128xf32> to vector<16x128xf32>
    %148 = arith.addf %145, %147 : vector<16x128xf32>
    %149 = arith.addf %134, %148 : vector<16x128xf32>
    %c0_51 = arith.constant 0 : index
    %c0_52 = arith.constant 0 : index
    %150 = vector.load %arg12[%c0_51, %c0_52] : memref<1x128xf32, #tpu.memory_space<vmem>>, vector<1x128xf32>
    %c0_53 = arith.constant 0 : index
    %c0_54 = arith.constant 0 : index
    %151 = vector.load %arg13[%c0_53, %c0_54] : memref<1x128xf32, #tpu.memory_space<vmem>>, vector<1x128xf32>
    %cst_55 = arith.constant dense<0.000000e+00> : vector<16xf32>
    %152 = vector.multi_reduction <add>, %149, %cst_55 [1] : vector<16x128xf32> to vector<16xf32>
    %153 = vector.shape_cast %152 : vector<16xf32> to vector<16x1xf32>
    %cst_56 = arith.constant 1.280000e+02 : f32
    %154 = vector.broadcast %cst_56 : f32 to vector<16x1xf32>
    %155 = arith.divf %153, %154 : vector<16x1xf32>
    %156 = vector.broadcast %155 : vector<16x1xf32> to vector<16x128xf32>
    %157 = arith.subf %149, %156 : vector<16x128xf32>
    %158 = arith.mulf %157, %157 : vector<16x128xf32>
    %cst_57 = arith.constant dense<0.000000e+00> : vector<16xf32>
    %159 = vector.multi_reduction <add>, %158, %cst_57 [1] : vector<16x128xf32> to vector<16xf32>
    %160 = vector.shape_cast %159 : vector<16xf32> to vector<16x1xf32>
    %cst_58 = arith.constant 1.280000e+02 : f32
    %161 = vector.broadcast %cst_58 : f32 to vector<16x1xf32>
    %162 = arith.divf %160, %161 : vector<16x1xf32>
    %163 = vector.broadcast %155 : vector<16x1xf32> to vector<16x128xf32>
    %164 = arith.subf %149, %163 : vector<16x128xf32>
    %cst_59 = arith.constant 9.99999974E-6 : f32
    %165 = vector.broadcast %cst_59 : f32 to vector<16x1xf32>
    %166 = arith.addf %162, %165 : vector<16x1xf32>
    %167 = math.rsqrt %166 : vector<16x1xf32>
    %168 = vector.broadcast %167 : vector<16x1xf32> to vector<16x128xf32>
    %169 = arith.mulf %164, %168 : vector<16x128xf32>
    %170 = vector.broadcast %150 : vector<1x128xf32> to vector<16x128xf32>
    %171 = arith.mulf %169, %170 : vector<16x128xf32>
    %172 = vector.broadcast %151 : vector<1x128xf32> to vector<16x128xf32>
    %173 = arith.addf %171, %172 : vector<16x128xf32>
    %c0_60 = arith.constant 0 : index
    %c0_61 = arith.constant 0 : index
    %c0_62 = arith.constant 0 : index
    %174 = vector.load %arg16[%c0_60, %c0_61, %c0_62] : memref<1x16x128xf32, #tpu.memory_space<vmem>>, vector<1x16x128xf32>
    %175 = vector.shape_cast %174 : vector<1x16x128xf32> to vector<16x128xf32>
    %176 = vector.shape_cast %173 : vector<16x128xf32> to vector<1x16x128xf32>
    tpu.vector_store %arg16[%c0_60, %c0_61, %c0_62], %176 {strides = array<i32>} : memref<1x16x128xf32, #tpu.memory_space<vmem>>, vector<1x16x128xf32>,
    return
  }
  func.func @transform_0(%arg0: i32) -> (i32, i32, i32) {
    %c0_i32 = arith.constant 0 : i32
    %c0_i32_0 = arith.constant 0 : i32
    %c0_i32_1 = arith.constant 0 : i32
    return %arg0, %c0_i32, %c0_i32_0 : i32, i32, i32
  }
  func.func @transform_1(%arg0: i32) -> (i32, i32) {
    %c0_i32 = arith.constant 0 : i32
    %c0_i32_0 = arith.constant 0 : i32
    %c0_i32_1 = arith.constant 0 : i32
    return %c0_i32, %c0_i32_0 : i32, i32
  }
  func.func @transform_2(%arg0: i32) -> (i32, i32) {
    %c0_i32 = arith.constant 0 : i32
    %c0_i32_0 = arith.constant 0 : i32
    %c0_i32_1 = arith.constant 0 : i32
    return %c0_i32, %c0_i32_0 : i32, i32
  }
  func.func @transform_3(%arg0: i32) -> (i32, i32) {
    %c0_i32 = arith.constant 0 : i32
    %c0_i32_0 = arith.constant 0 : i32
    %c0_i32_1 = arith.constant 0 : i32
    return %c0_i32, %c0_i32_0 : i32, i32
  }
  func.func @transform_4(%arg0: i32) -> (i32, i32) {
    %c0_i32 = arith.constant 0 : i32
    %c0_i32_0 = arith.constant 0 : i32
    %c0_i32_1 = arith.constant 0 : i32
    return %c0_i32, %c0_i32_0 : i32, i32
  }
  func.func @transform_5(%arg0: i32) -> (i32, i32) {
    %c0_i32 = arith.constant 0 : i32
    %c0_i32_0 = arith.constant 0 : i32
    %c0_i32_1 = arith.constant 0 : i32
    return %c0_i32, %c0_i32_0 : i32, i32
  }
  func.func @transform_6(%arg0: i32) -> (i32, i32) {
    %c0_i32 = arith.constant 0 : i32
    %c0_i32_0 = arith.constant 0 : i32
    %c0_i32_1 = arith.constant 0 : i32
    return %c0_i32, %c0_i32_0 : i32, i32
  }
  func.func @transform_7(%arg0: i32) -> (i32, i32) {
    %c0_i32 = arith.constant 0 : i32
    %c0_i32_0 = arith.constant 0 : i32
    %c0_i32_1 = arith.constant 0 : i32
    return %c0_i32, %c0_i32_0 : i32, i32
  }
  func.func @transform_8(%arg0: i32) -> (i32, i32) {
    %c0_i32 = arith.constant 0 : i32
    %c0_i32_0 = arith.constant 0 : i32
    %c0_i32_1 = arith.constant 0 : i32
    return %c0_i32, %c0_i32_0 : i32, i32
  }
  func.func @transform_9(%arg0: i32) -> (i32, i32) {
    %c0_i32 = arith.constant 0 : i32
    %c0_i32_0 = arith.constant 0 : i32
    %c0_i32_1 = arith.constant 0 : i32
    return %c0_i32, %c0_i32_0 : i32, i32
  }
  func.func @transform_10(%arg0: i32) -> (i32, i32) {
    %c0_i32 = arith.constant 0 : i32
    %c0_i32_0 = arith.constant 0 : i32
    %c0_i32_1 = arith.constant 0 : i32
    return %c0_i32, %c0_i32_0 : i32, i32
  }
  func.func @transform_11(%arg0: i32) -> (i32, i32) {
    %c0_i32 = arith.constant 0 : i32
    %c0_i32_0 = arith.constant 0 : i32
    %c0_i32_1 = arith.constant 0 : i32
    return %c0_i32, %c0_i32_0 : i32, i32
  }
  func.func @transform_12(%arg0: i32) -> (i32, i32) {
    %c0_i32 = arith.constant 0 : i32
    %c0_i32_0 = arith.constant 0 : i32
    %c0_i32_1 = arith.constant 0 : i32
    return %c0_i32, %c0_i32_0 : i32, i32
  }
  func.func @transform_13(%arg0: i32) -> (i32, i32) {
    %c0_i32 = arith.constant 0 : i32
    %c0_i32_0 = arith.constant 0 : i32
    %c0_i32_1 = arith.constant 0 : i32
    return %c0_i32, %c0_i32_0 : i32, i32
  }
  func.func @transform_14(%arg0: i32) -> (i32, i32) {
    %c0_i32 = arith.constant 0 : i32
    %c0_i32_0 = arith.constant 0 : i32
    %c0_i32_1 = arith.constant 0 : i32
    return %c0_i32, %c0_i32_0 : i32, i32
  }
  func.func @transform_15(%arg0: i32) -> (i32, i32, i32) {
    %c0_i32 = arith.constant 0 : i32
    %c0_i32_0 = arith.constant 0 : i32
    %c0_i32_1 = arith.constant 0 : i32
    return %arg0, %c0_i32, %c0_i32_0 : i32, i32, i32
  }
}

module attributes {stable_mosaic.version = 11 : i64} {
  func.func @_enc_layer_kernel(%arg0: i32, %arg1: memref<1x16x128xf32, #tpu.memory_space<vmem>>, %arg2: memref<128x384xbf16, #tpu.memory_space<vmem>>, %arg3: memref<1x384xf32, #tpu.memory_space<vmem>>, %arg4: memref<128x128xbf16, #tpu.memory_space<vmem>>, %arg5: memref<1x128xf32, #tpu.memory_space<vmem>>, %arg6: memref<1x128xf32, #tpu.memory_space<vmem>>, %arg7: memref<1x128xf32, #tpu.memory_space<vmem>>, %arg8: memref<128x256xbf16, #tpu.memory_space<vmem>>, %arg9: memref<1x256xf32, #tpu.memory_space<vmem>>, %arg10: memref<256x128xbf16, #tpu.memory_space<vmem>>, %arg11: memref<1x128xf32, #tpu.memory_space<vmem>>, %arg12: memref<1x128xf32, #tpu.memory_space<vmem>>, %arg13: memref<1x128xf32, #tpu.memory_space<vmem>>, %arg14: memref<1x128xf32, #tpu.memory_space<vmem>>, %arg15: memref<1x128xf32, #tpu.memory_space<vmem>>, %arg16: memref<1x16x128xf32, #tpu.memory_space<vmem>>) attributes {dimension_semantics = [#tpu.dimension_semantics<parallel>], iteration_bounds = array<i64: 2>, scalar_prefetch = 0 : i64, scratch_operands = 0 : i64, tpu.core_type = #tpu.core_type<tc>, window_params = [{transform_indices = @transform_0, window_bounds = array<i64: 1, 16, 128>}, {pipeline_mode = #tpu.pipeline_mode<synchronous>, transform_indices = @transform_1, window_bounds = array<i64: 128, 384>}, {pipeline_mode = #tpu.pipeline_mode<synchronous>, transform_indices = @transform_2, window_bounds = array<i64: 1, 384>}, {pipeline_mode = #tpu.pipeline_mode<synchronous>, transform_indices = @transform_3, window_bounds = array<i64: 128, 128>}, {pipeline_mode = #tpu.pipeline_mode<synchronous>, transform_indices = @transform_4, window_bounds = array<i64: 1, 128>}, {pipeline_mode = #tpu.pipeline_mode<synchronous>, transform_indices = @transform_5, window_bounds = array<i64: 1, 128>}, {pipeline_mode = #tpu.pipeline_mode<synchronous>, transform_indices = @transform_6, window_bounds = array<i64: 1, 128>}, {pipeline_mode = #tpu.pipeline_mode<synchronous>, transform_indices = @transform_7, window_bounds = array<i64: 128, 256>}, {pipeline_mode = #tpu.pipeline_mode<synchronous>, transform_indices = @transform_8, window_bounds = array<i64: 1, 256>}, {pipeline_mode = #tpu.pipeline_mode<synchronous>, transform_indices = @transform_9, window_bounds = array<i64: 256, 128>}, {pipeline_mode = #tpu.pipeline_mode<synchronous>, transform_indices = @transform_10, window_bounds = array<i64: 1, 128>}, {pipeline_mode = #tpu.pipeline_mode<synchronous>, transform_indices = @transform_11, window_bounds = array<i64: 1, 128>}, {pipeline_mode = #tpu.pipeline_mode<synchronous>, transform_indices = @transform_12, window_bounds = array<i64: 1, 128>}, {pipeline_mode = #tpu.pipeline_mode<synchronous>, transform_indices = @transform_13, window_bounds = array<i64: 1, 128>}, {pipeline_mode = #tpu.pipeline_mode<synchronous>, transform_indices = @transform_14, window_bounds = array<i64: 1, 128>}, {transform_indices = @transform_15, window_bounds = array<i64: 1, 16, 128>}]} {
    %c0 = arith.constant 0 : index
    %c0_0 = arith.constant 0 : index
    %c0_1 = arith.constant 0 : index
    %0 = vector.load %arg1[%c0, %c0_0, %c0_1] : memref<1x16x128xf32, #tpu.memory_space<vmem>>, vector<1x16x128xf32>
    %1 = vector.shape_cast %0 : vector<1x16x128xf32> to vector<16x128xf32>
    %2 = arith.truncf %1 : vector<16x128xf32> to vector<16x128xbf16>
    %c0_2 = arith.constant 0 : index
    %c0_3 = arith.constant 0 : index
    %3 = vector.load %arg2[%c0_2, %c0_3] : memref<128x384xbf16, #tpu.memory_space<vmem>>, vector<128x384xbf16>
    %cst = arith.constant dense<0.000000e+00> : vector<16x384xf32>
    %4 = tpu.matmul %2, %3, %cst {dimension_numbers = #tpu.dot_dimension_numbers<[1], [0], [0], [1], [0, 0, 1, 1], [], []>} : vector<16x128xbf16>, vector<128x384xbf16>, vector<16x384xf32> -> vector<16x384xf32>
    %c0_4 = arith.constant 0 : index
    %c0_5 = arith.constant 0 : index
    %5 = vector.load %arg3[%c0_4, %c0_5] : memref<1x384xf32, #tpu.memory_space<vmem>>, vector<1x384xf32>
    %6 = vector.broadcast %5 : vector<1x384xf32> to vector<16x384xf32>
    %7 = arith.addf %4, %6 : vector<16x384xf32>
    %8 = vector.extract_strided_slice %7 {offsets = [0, 0], sizes = [16, 128], strides = [1, 1]} : vector<16x384xf32> to vector<16x128xf32>
    %9 = vector.extract_strided_slice %7 {offsets = [0, 128], sizes = [16, 128], strides = [1, 1]} : vector<16x384xf32> to vector<16x128xf32>
    %10 = vector.extract_strided_slice %7 {offsets = [0, 256], sizes = [16, 128], strides = [1, 1]} : vector<16x384xf32> to vector<16x128xf32>
    %11 = vector.extract_strided_slice %8 {offsets = [0, 0], sizes = [16, 32], strides = [1, 1]} : vector<16x128xf32> to vector<16x32xf32>
    %12 = arith.truncf %11 : vector<16x32xf32> to vector<16x32xbf16>
    %13 = vector.extract_strided_slice %9 {offsets = [0, 0], sizes = [16, 32], strides = [1, 1]} : vector<16x128xf32> to vector<16x32xf32>
    %14 = arith.truncf %13 : vector<16x32xf32> to vector<16x32xbf16>
    %15 = vector.extract_strided_slice %10 {offsets = [0, 0], sizes = [16, 32], strides = [1, 1]} : vector<16x128xf32> to vector<16x32xf32>
    %16 = arith.truncf %15 : vector<16x32xf32> to vector<16x32xbf16>
    %cst_6 = arith.constant dense<0.000000e+00> : vector<16x16xf32>
    %17 = tpu.matmul %12, %14, %cst_6 {dimension_numbers = #tpu.dot_dimension_numbers<[1], [1], [0], [0], [0, 0, 1, 0], [], []>} : vector<16x32xbf16>, vector<16x32xbf16>, vector<16x16xf32> -> vector<16x16xf32>
    %18 = tpu.iota {dimensions = array<i32: 0>} : vector<16x16xi32>
    %19 = tpu.iota {dimensions = array<i32: 1>} : vector<16x16xi32>
    %20 = arith.cmpi sle, %19, %18 : vector<16x16xi32>
    %cst_7 = arith.constant -1.000000e+30 : f32
    %21 = vector.broadcast %cst_7 : f32 to vector<16x16xf32>
    %22 = arith.select %20, %17, %21 : vector<16x16xi1>, vector<16x16xf32>
    %cst_8 = arith.constant dense<0xFF800000> : vector<16xf32>
    %23 = vector.multi_reduction <maximumf>, %22, %cst_8 [1] : vector<16x16xf32> to vector<16xf32>
    %24 = vector.shape_cast %23 : vector<16xf32> to vector<16x1xf32>
    %25 = vector.broadcast %24 : vector<16x1xf32> to vector<16x16xf32>
    %26 = arith.subf %22, %25 : vector<16x16xf32>
    %27 = math.exp %26 : vector<16x16xf32>
    %cst_9 = arith.constant dense<0.000000e+00> : vector<16xf32>
    %28 = vector.multi_reduction <add>, %27, %cst_9 [1] : vector<16x16xf32> to vector<16xf32>
    %29 = vector.shape_cast %28 : vector<16xf32> to vector<16x1xf32>
    %30 = vector.broadcast %29 : vector<16x1xf32> to vector<16x16xf32>
    %31 = arith.divf %27, %30 : vector<16x16xf32>
    %32 = arith.truncf %31 : vector<16x16xf32> to vector<16x16xbf16>
    %cst_10 = arith.constant dense<0.000000e+00> : vector<16x32xf32>
    %33 = tpu.matmul %32, %16, %cst_10 {dimension_numbers = #tpu.dot_dimension_numbers<[1], [0], [0], [1], [0, 0, 1, 1], [], []>} : vector<16x16xbf16>, vector<16x32xbf16>, vector<16x32xf32> -> vector<16x32xf32>
    %34 = vector.extract_strided_slice %8 {offsets = [0, 32], sizes = [16, 32], strides = [1, 1]} : vector<16x128xf32> to vector<16x32xf32>
    %35 = arith.truncf %34 : vector<16x32xf32> to vector<16x32xbf16>
    %36 = vector.extract_strided_slice %9 {offsets = [0, 32], sizes = [16, 32], strides = [1, 1]} : vector<16x128xf32> to vector<16x32xf32>
    %37 = arith.truncf %36 : vector<16x32xf32> to vector<16x32xbf16>
    %38 = vector.extract_strided_slice %10 {offsets = [0, 32], sizes = [16, 32], strides = [1, 1]} : vector<16x128xf32> to vector<16x32xf32>
    %39 = arith.truncf %38 : vector<16x32xf32> to vector<16x32xbf16>
    %cst_11 = arith.constant dense<0.000000e+00> : vector<16x16xf32>
    %40 = tpu.matmul %35, %37, %cst_11 {dimension_numbers = #tpu.dot_dimension_numbers<[1], [1], [0], [0], [0, 0, 1, 0], [], []>} : vector<16x32xbf16>, vector<16x32xbf16>, vector<16x16xf32> -> vector<16x16xf32>
    %41 = tpu.iota {dimensions = array<i32: 0>} : vector<16x16xi32>
    %42 = tpu.iota {dimensions = array<i32: 1>} : vector<16x16xi32>
    %43 = arith.cmpi sle, %42, %41 : vector<16x16xi32>
    %cst_12 = arith.constant -1.000000e+30 : f32
    %44 = vector.broadcast %cst_12 : f32 to vector<16x16xf32>
    %45 = arith.select %43, %40, %44 : vector<16x16xi1>, vector<16x16xf32>
    %cst_13 = arith.constant dense<0xFF800000> : vector<16xf32>
    %46 = vector.multi_reduction <maximumf>, %45, %cst_13 [1] : vector<16x16xf32> to vector<16xf32>
    %47 = vector.shape_cast %46 : vector<16xf32> to vector<16x1xf32>
    %48 = vector.broadcast %47 : vector<16x1xf32> to vector<16x16xf32>
    %49 = arith.subf %45, %48 : vector<16x16xf32>
    %50 = math.exp %49 : vector<16x16xf32>
    %cst_14 = arith.constant dense<0.000000e+00> : vector<16xf32>
    %51 = vector.multi_reduction <add>, %50, %cst_14 [1] : vector<16x16xf32> to vector<16xf32>
    %52 = vector.shape_cast %51 : vector<16xf32> to vector<16x1xf32>
    %53 = vector.broadcast %52 : vector<16x1xf32> to vector<16x16xf32>
    %54 = arith.divf %50, %53 : vector<16x16xf32>
    %55 = arith.truncf %54 : vector<16x16xf32> to vector<16x16xbf16>
    %cst_15 = arith.constant dense<0.000000e+00> : vector<16x32xf32>
    %56 = tpu.matmul %55, %39, %cst_15 {dimension_numbers = #tpu.dot_dimension_numbers<[1], [0], [0], [1], [0, 0, 1, 1], [], []>} : vector<16x16xbf16>, vector<16x32xbf16>, vector<16x32xf32> -> vector<16x32xf32>
    %57 = vector.extract_strided_slice %8 {offsets = [0, 64], sizes = [16, 32], strides = [1, 1]} : vector<16x128xf32> to vector<16x32xf32>
    %58 = arith.truncf %57 : vector<16x32xf32> to vector<16x32xbf16>
    %59 = vector.extract_strided_slice %9 {offsets = [0, 64], sizes = [16, 32], strides = [1, 1]} : vector<16x128xf32> to vector<16x32xf32>
    %60 = arith.truncf %59 : vector<16x32xf32> to vector<16x32xbf16>
    %61 = vector.extract_strided_slice %10 {offsets = [0, 64], sizes = [16, 32], strides = [1, 1]} : vector<16x128xf32> to vector<16x32xf32>
    %62 = arith.truncf %61 : vector<16x32xf32> to vector<16x32xbf16>
    %cst_16 = arith.constant dense<0.000000e+00> : vector<16x16xf32>
    %63 = tpu.matmul %58, %60, %cst_16 {dimension_numbers = #tpu.dot_dimension_numbers<[1], [1], [0], [0], [0, 0, 1, 0], [], []>} : vector<16x32xbf16>, vector<16x32xbf16>, vector<16x16xf32> -> vector<16x16xf32>
    %64 = tpu.iota {dimensions = array<i32: 0>} : vector<16x16xi32>
    %65 = tpu.iota {dimensions = array<i32: 1>} : vector<16x16xi32>
    %66 = arith.cmpi sle, %65, %64 : vector<16x16xi32>
    %cst_17 = arith.constant -1.000000e+30 : f32
    %67 = vector.broadcast %cst_17 : f32 to vector<16x16xf32>
    %68 = arith.select %66, %63, %67 : vector<16x16xi1>, vector<16x16xf32>
    %cst_18 = arith.constant dense<0xFF800000> : vector<16xf32>
    %69 = vector.multi_reduction <maximumf>, %68, %cst_18 [1] : vector<16x16xf32> to vector<16xf32>
    %70 = vector.shape_cast %69 : vector<16xf32> to vector<16x1xf32>
    %71 = vector.broadcast %70 : vector<16x1xf32> to vector<16x16xf32>
    %72 = arith.subf %68, %71 : vector<16x16xf32>
    %73 = math.exp %72 : vector<16x16xf32>
    %cst_19 = arith.constant dense<0.000000e+00> : vector<16xf32>
    %74 = vector.multi_reduction <add>, %73, %cst_19 [1] : vector<16x16xf32> to vector<16xf32>
    %75 = vector.shape_cast %74 : vector<16xf32> to vector<16x1xf32>
    %76 = vector.broadcast %75 : vector<16x1xf32> to vector<16x16xf32>
    %77 = arith.divf %73, %76 : vector<16x16xf32>
    %78 = arith.truncf %77 : vector<16x16xf32> to vector<16x16xbf16>
    %cst_20 = arith.constant dense<0.000000e+00> : vector<16x32xf32>
    %79 = tpu.matmul %78, %62, %cst_20 {dimension_numbers = #tpu.dot_dimension_numbers<[1], [0], [0], [1], [0, 0, 1, 1], [], []>} : vector<16x16xbf16>, vector<16x32xbf16>, vector<16x32xf32> -> vector<16x32xf32>
    %80 = vector.extract_strided_slice %8 {offsets = [0, 96], sizes = [16, 32], strides = [1, 1]} : vector<16x128xf32> to vector<16x32xf32>
    %81 = arith.truncf %80 : vector<16x32xf32> to vector<16x32xbf16>
    %82 = vector.extract_strided_slice %9 {offsets = [0, 96], sizes = [16, 32], strides = [1, 1]} : vector<16x128xf32> to vector<16x32xf32>
    %83 = arith.truncf %82 : vector<16x32xf32> to vector<16x32xbf16>
    %84 = vector.extract_strided_slice %10 {offsets = [0, 96], sizes = [16, 32], strides = [1, 1]} : vector<16x128xf32> to vector<16x32xf32>
    %85 = arith.truncf %84 : vector<16x32xf32> to vector<16x32xbf16>
    %cst_21 = arith.constant dense<0.000000e+00> : vector<16x16xf32>
    %86 = tpu.matmul %81, %83, %cst_21 {dimension_numbers = #tpu.dot_dimension_numbers<[1], [1], [0], [0], [0, 0, 1, 0], [], []>} : vector<16x32xbf16>, vector<16x32xbf16>, vector<16x16xf32> -> vector<16x16xf32>
    %87 = tpu.iota {dimensions = array<i32: 0>} : vector<16x16xi32>
    %88 = tpu.iota {dimensions = array<i32: 1>} : vector<16x16xi32>
    %89 = arith.cmpi sle, %88, %87 : vector<16x16xi32>
    %cst_22 = arith.constant -1.000000e+30 : f32
    %90 = vector.broadcast %cst_22 : f32 to vector<16x16xf32>
    %91 = arith.select %89, %86, %90 : vector<16x16xi1>, vector<16x16xf32>
    %cst_23 = arith.constant dense<0xFF800000> : vector<16xf32>
    %92 = vector.multi_reduction <maximumf>, %91, %cst_23 [1] : vector<16x16xf32> to vector<16xf32>
    %93 = vector.shape_cast %92 : vector<16xf32> to vector<16x1xf32>
    %94 = vector.broadcast %93 : vector<16x1xf32> to vector<16x16xf32>
    %95 = arith.subf %91, %94 : vector<16x16xf32>
    %96 = math.exp %95 : vector<16x16xf32>
    %cst_24 = arith.constant dense<0.000000e+00> : vector<16xf32>
    %97 = vector.multi_reduction <add>, %96, %cst_24 [1] : vector<16x16xf32> to vector<16xf32>
    %98 = vector.shape_cast %97 : vector<16xf32> to vector<16x1xf32>
    %99 = vector.broadcast %98 : vector<16x1xf32> to vector<16x16xf32>
    %100 = arith.divf %96, %99 : vector<16x16xf32>
    %101 = arith.truncf %100 : vector<16x16xf32> to vector<16x16xbf16>
    %cst_25 = arith.constant dense<0.000000e+00> : vector<16x32xf32>
    %102 = tpu.matmul %101, %85, %cst_25 {dimension_numbers = #tpu.dot_dimension_numbers<[1], [0], [0], [1], [0, 0, 1, 1], [], []>} : vector<16x16xbf16>, vector<16x32xbf16>, vector<16x32xf32> -> vector<16x32xf32>
    %103 = tpu.concatenate %33, %56, %79, %102 in 1 : vector<16x32xf32>, vector<16x32xf32>, vector<16x32xf32>, vector<16x32xf32> -> vector<16x128xf32>
    %104 = arith.truncf %103 : vector<16x128xf32> to vector<16x128xbf16>
    %c0_26 = arith.constant 0 : index
    %c0_27 = arith.constant 0 : index
    %105 = vector.load %arg4[%c0_26, %c0_27] : memref<128x128xbf16, #tpu.memory_space<vmem>>, vector<128x128xbf16>
    %cst_28 = arith.constant dense<0.000000e+00> : vector<16x128xf32>
    %106 = tpu.matmul %104, %105, %cst_28 {dimension_numbers = #tpu.dot_dimension_numbers<[1], [0], [0], [1], [0, 0, 1, 1], [], []>} : vector<16x128xbf16>, vector<128x128xbf16>, vector<16x128xf32> -> vector<16x128xf32>
    %c0_29 = arith.constant 0 : index
    %c0_30 = arith.constant 0 : index
    %107 = vector.load %arg5[%c0_29, %c0_30] : memref<1x128xf32, #tpu.memory_space<vmem>>, vector<1x128xf32>
    %108 = vector.broadcast %107 : vector<1x128xf32> to vector<16x128xf32>
    %109 = arith.addf %106, %108 : vector<16x128xf32>
    %110 = arith.addf %1, %109 : vector<16x128xf32>
    %c0_31 = arith.constant 0 : index
    %c0_32 = arith.constant 0 : index
    %111 = vector.load %arg6[%c0_31, %c0_32] : memref<1x128xf32, #tpu.memory_space<vmem>>, vector<1x128xf32>
    %c0_33 = arith.constant 0 : index
    %c0_34 = arith.constant 0 : index
    %112 = vector.load %arg7[%c0_33, %c0_34] : memref<1x128xf32, #tpu.memory_space<vmem>>, vector<1x128xf32>
    %cst_35 = arith.constant dense<0.000000e+00> : vector<16xf32>
    %113 = vector.multi_reduction <add>, %110, %cst_35 [1] : vector<16x128xf32> to vector<16xf32>
    %114 = vector.shape_cast %113 : vector<16xf32> to vector<16x1xf32>
    %cst_36 = arith.constant 1.280000e+02 : f32
    %115 = vector.broadcast %cst_36 : f32 to vector<16x1xf32>
    %116 = arith.divf %114, %115 : vector<16x1xf32>
    %117 = vector.broadcast %116 : vector<16x1xf32> to vector<16x128xf32>
    %118 = arith.subf %110, %117 : vector<16x128xf32>
    %119 = arith.mulf %118, %118 : vector<16x128xf32>
    %cst_37 = arith.constant dense<0.000000e+00> : vector<16xf32>
    %120 = vector.multi_reduction <add>, %119, %cst_37 [1] : vector<16x128xf32> to vector<16xf32>
    %121 = vector.shape_cast %120 : vector<16xf32> to vector<16x1xf32>
    %cst_38 = arith.constant 1.280000e+02 : f32
    %122 = vector.broadcast %cst_38 : f32 to vector<16x1xf32>
    %123 = arith.divf %121, %122 : vector<16x1xf32>
    %124 = vector.broadcast %116 : vector<16x1xf32> to vector<16x128xf32>
    %125 = arith.subf %110, %124 : vector<16x128xf32>
    %cst_39 = arith.constant 9.99999974E-6 : f32
    %126 = vector.broadcast %cst_39 : f32 to vector<16x1xf32>
    %127 = arith.addf %123, %126 : vector<16x1xf32>
    %128 = math.rsqrt %127 : vector<16x1xf32>
    %129 = vector.broadcast %128 : vector<16x1xf32> to vector<16x128xf32>
    %130 = arith.mulf %125, %129 : vector<16x128xf32>
    %131 = vector.broadcast %111 : vector<1x128xf32> to vector<16x128xf32>
    %132 = arith.mulf %130, %131 : vector<16x128xf32>
    %133 = vector.broadcast %112 : vector<1x128xf32> to vector<16x128xf32>
    %134 = arith.addf %132, %133 : vector<16x128xf32>
    %135 = arith.truncf %134 : vector<16x128xf32> to vector<16x128xbf16>
    %c0_40 = arith.constant 0 : index
    %c0_41 = arith.constant 0 : index
    %136 = vector.load %arg8[%c0_40, %c0_41] : memref<128x256xbf16, #tpu.memory_space<vmem>>, vector<128x256xbf16>
    %cst_42 = arith.constant dense<0.000000e+00> : vector<16x256xf32>
    %137 = tpu.matmul %135, %136, %cst_42 {dimension_numbers = #tpu.dot_dimension_numbers<[1], [0], [0], [1], [0, 0, 1, 1], [], []>} : vector<16x128xbf16>, vector<128x256xbf16>, vector<16x256xf32> -> vector<16x256xf32>
    %c0_43 = arith.constant 0 : index
    %c0_44 = arith.constant 0 : index
    %138 = vector.load %arg9[%c0_43, %c0_44] : memref<1x256xf32, #tpu.memory_space<vmem>>, vector<1x256xf32>
    %139 = vector.broadcast %138 : vector<1x256xf32> to vector<16x256xf32>
    %140 = arith.addf %137, %139 : vector<16x256xf32>
    %cst_45 = arith.constant 0.000000e+00 : f32
    %141 = vector.broadcast %cst_45 : f32 to vector<16x256xf32>
    %142 = arith.maximumf %140, %141 : vector<16x256xf32>
    %143 = arith.truncf %142 : vector<16x256xf32> to vector<16x256xbf16>
    %c0_46 = arith.constant 0 : index
    %c0_47 = arith.constant 0 : index
    %144 = vector.load %arg10[%c0_46, %c0_47] : memref<256x128xbf16, #tpu.memory_space<vmem>>, vector<256x128xbf16>
    %cst_48 = arith.constant dense<0.000000e+00> : vector<16x128xf32>
    %145 = tpu.matmul %143, %144, %cst_48 {dimension_numbers = #tpu.dot_dimension_numbers<[1], [0], [0], [1], [0, 0, 1, 1], [], []>} : vector<16x256xbf16>, vector<256x128xbf16>, vector<16x128xf32> -> vector<16x128xf32>
    %c0_49 = arith.constant 0 : index
    %c0_50 = arith.constant 0 : index
    %146 = vector.load %arg11[%c0_49, %c0_50] : memref<1x128xf32, #tpu.memory_space<vmem>>, vector<1x128xf32>
    %147 = vector.broadcast %146 : vector<1x128xf32> to vector<16x128xf32>
    %148 = arith.addf %145, %147 : vector<16x128xf32>
    %149 = arith.addf %134, %148 : vector<16x128xf32>
    %c0_51 = arith.constant 0 : index
    %c0_52 = arith.constant 0 : index
    %150 = vector.load %arg12[%c0_51, %c0_52] : memref<1x128xf32, #tpu.memory_space<vmem>>, vector<1x128xf32>
    %c0_53 = arith.constant 0 : index
    %c0_54 = arith.constant 0 : index
    %151 = vector.load %arg13[%c0_53, %c0_54] : memref<1x128xf32, #tpu.memory_space<vmem>>, vector<1x128xf32>
    %cst_55 = arith.constant dense<0.000000e+00> : vector<16xf32>
    %152 = vector.multi_reduction <add>, %149, %cst_55 [1] : vector<16x128xf32> to vector<16xf32>
    %153 = vector.shape_cast %152 : vector<16xf32> to vector<16x1xf32>
    %cst_56 = arith.constant 1.280000e+02 : f32
    %154 = vector.broadcast %cst_56 : f32 to vector<16x1xf32>
    %155 = arith.divf %153, %154 : vector<16x1xf32>
    %156 = vector.broadcast %155 : vector<16x1xf32> to vector<16x128xf32>
    %157 = arith.subf %149, %156 : vector<16x128xf32>
    %158 = arith.mulf %157, %157 : vector<16x128xf32>
    %cst_57 = arith.constant dense<0.000000e+00> : vector<16xf32>
    %159 = vector.multi_reduction <add>, %158, %cst_57 [1] : vector<16x128xf32> to vector<16xf32>
    %160 = vector.shape_cast %159 : vector<16xf32> to vector<16x1xf32>
    %cst_58 = arith.constant 1.280000e+02 : f32
    %161 = vector.broadcast %cst_58 : f32 to vector<16x1xf32>
    %162 = arith.divf %160, %161 : vector<16x1xf32>
    %163 = vector.broadcast %155 : vector<16x1xf32> to vector<16x128xf32>
    %164 = arith.subf %149, %163 : vector<16x128xf32>
    %cst_59 = arith.constant 9.99999974E-6 : f32
    %165 = vector.broadcast %cst_59 : f32 to vector<16x1xf32>
    %166 = arith.addf %162, %165 : vector<16x1xf32>
    %167 = math.rsqrt %166 : vector<16x1xf32>
    %168 = vector.broadcast %167 : vector<16x1xf32> to vector<16x128xf32>
    %169 = arith.mulf %164, %168 : vector<16x128xf32>
    %170 = vector.broadcast %150 : vector<1x128xf32> to vector<16x128xf32>
    %171 = arith.mulf %169, %170 : vector<16x128xf32>
    %172 = vector.broadcast %151 : vector<1x128xf32> to vector<16x128xf32>
    %173 = arith.addf %171, %172 : vector<16x128xf32>
    %c0_60 = arith.constant 0 : index
    %c0_61 = arith.constant 0 : index
    %174 = vector.load %arg14[%c0_60, %c0_61] : memref<1x128xf32, #tpu.memory_space<vmem>>, vector<1x128xf32>
    %c0_62 = arith.constant 0 : index
    %c0_63 = arith.constant 0 : index
    %175 = vector.load %arg15[%c0_62, %c0_63] : memref<1x128xf32, #tpu.memory_space<vmem>>, vector<1x128xf32>
    %cst_64 = arith.constant dense<0.000000e+00> : vector<16xf32>
    %176 = vector.multi_reduction <add>, %173, %cst_64 [1] : vector<16x128xf32> to vector<16xf32>
    %177 = vector.shape_cast %176 : vector<16xf32> to vector<16x1xf32>
    %cst_65 = arith.constant 1.280000e+02 : f32
    %178 = vector.broadcast %cst_65 : f32 to vector<16x1xf32>
    %179 = arith.divf %177, %178 : vector<16x1xf32>
    %180 = vector.broadcast %179 : vector<16x1xf32> to vector<16x128xf32>
    %181 = arith.subf %173, %180 : vector<16x128xf32>
    %182 = arith.mulf %181, %181 : vector<16x128xf32>
    %cst_66 = arith.constant dense<0.000000e+00> : vector<16xf32>
    %183 = vector.multi_reduction <add>, %182, %cst_66 [1] : vector<16x128xf32> to vector<16xf32>
    %184 = vector.shape_cast %183 : vector<16xf32> to vector<16x1xf32>
    %cst_67 = arith.constant 1.280000e+02 : f32
    %185 = vector.broadcast %cst_67 : f32 to vector<16x1xf32>
    %186 = arith.divf %184, %185 : vector<16x1xf32>
    %187 = vector.broadcast %179 : vector<16x1xf32> to vector<16x128xf32>
    %188 = arith.subf %173, %187 : vector<16x128xf32>
    %cst_68 = arith.constant 9.99999974E-6 : f32
    %189 = vector.broadcast %cst_68 : f32 to vector<16x1xf32>
    %190 = arith.addf %186, %189 : vector<16x1xf32>
    %191 = math.rsqrt %190 : vector<16x1xf32>
    %192 = vector.broadcast %191 : vector<16x1xf32> to vector<16x128xf32>
    %193 = arith.mulf %188, %192 : vector<16x128xf32>
    %194 = vector.broadcast %174 : vector<1x128xf32> to vector<16x128xf32>
    %195 = arith.mulf %193, %194 : vector<16x128xf32>
    %196 = vector.broadcast %175 : vector<1x128xf32> to vector<16x128xf32>
    %197 = arith.addf %195, %196 : vector<16x128xf32>
    %c0_69 = arith.constant 0 : index
    %c0_70 = arith.constant 0 : index
    %c0_71 = arith.constant 0 : index
    %198 = vector.load %arg16[%c0_69, %c0_70, %c0_71] : memref<1x16x128xf32, #tpu.memory_space<vmem>>, vector<1x16x128xf32>
    %199 = vector.shape_cast %198 : vector<1x16x128xf32> to vector<16x128xf32>
    %200 = vector.shape_cast %197 : vector<16x128xf32> to vector<1x16x128xf32>
    tpu.vector_store %arg16[%c0_69, %c0_70, %c0_71], %200 {strides = array<i32>} : memref<1x16x128xf32, #tpu.memory_space<vmem>>, vector<1x16x128xf32>,
    return
  }
  func.func @transform_0(%arg0: i32) -> (i32, i32, i32) {
    %c0_i32 = arith.constant 0 : i32
    %c0_i32_0 = arith.constant 0 : i32
    %c0_i32_1 = arith.constant 0 : i32
    return %arg0, %c0_i32, %c0_i32_0 : i32, i32, i32
  }
  func.func @transform_1(%arg0: i32) -> (i32, i32) {
    %c0_i32 = arith.constant 0 : i32
    %c0_i32_0 = arith.constant 0 : i32
    %c0_i32_1 = arith.constant 0 : i32
    return %c0_i32, %c0_i32_0 : i32, i32
  }
  func.func @transform_2(%arg0: i32) -> (i32, i32) {
    %c0_i32 = arith.constant 0 : i32
    %c0_i32_0 = arith.constant 0 : i32
    %c0_i32_1 = arith.constant 0 : i32
    return %c0_i32, %c0_i32_0 : i32, i32
  }
  func.func @transform_3(%arg0: i32) -> (i32, i32) {
    %c0_i32 = arith.constant 0 : i32
    %c0_i32_0 = arith.constant 0 : i32
    %c0_i32_1 = arith.constant 0 : i32
    return %c0_i32, %c0_i32_0 : i32, i32
  }
  func.func @transform_4(%arg0: i32) -> (i32, i32) {
    %c0_i32 = arith.constant 0 : i32
    %c0_i32_0 = arith.constant 0 : i32
    %c0_i32_1 = arith.constant 0 : i32
    return %c0_i32, %c0_i32_0 : i32, i32
  }
  func.func @transform_5(%arg0: i32) -> (i32, i32) {
    %c0_i32 = arith.constant 0 : i32
    %c0_i32_0 = arith.constant 0 : i32
    %c0_i32_1 = arith.constant 0 : i32
    return %c0_i32, %c0_i32_0 : i32, i32
  }
  func.func @transform_6(%arg0: i32) -> (i32, i32) {
    %c0_i32 = arith.constant 0 : i32
    %c0_i32_0 = arith.constant 0 : i32
    %c0_i32_1 = arith.constant 0 : i32
    return %c0_i32, %c0_i32_0 : i32, i32
  }
  func.func @transform_7(%arg0: i32) -> (i32, i32) {
    %c0_i32 = arith.constant 0 : i32
    %c0_i32_0 = arith.constant 0 : i32
    %c0_i32_1 = arith.constant 0 : i32
    return %c0_i32, %c0_i32_0 : i32, i32
  }
  func.func @transform_8(%arg0: i32) -> (i32, i32) {
    %c0_i32 = arith.constant 0 : i32
    %c0_i32_0 = arith.constant 0 : i32
    %c0_i32_1 = arith.constant 0 : i32
    return %c0_i32, %c0_i32_0 : i32, i32
  }
  func.func @transform_9(%arg0: i32) -> (i32, i32) {
    %c0_i32 = arith.constant 0 : i32
    %c0_i32_0 = arith.constant 0 : i32
    %c0_i32_1 = arith.constant 0 : i32
    return %c0_i32, %c0_i32_0 : i32, i32
  }
  func.func @transform_10(%arg0: i32) -> (i32, i32) {
    %c0_i32 = arith.constant 0 : i32
    %c0_i32_0 = arith.constant 0 : i32
    %c0_i32_1 = arith.constant 0 : i32
    return %c0_i32, %c0_i32_0 : i32, i32
  }
  func.func @transform_11(%arg0: i32) -> (i32, i32) {
    %c0_i32 = arith.constant 0 : i32
    %c0_i32_0 = arith.constant 0 : i32
    %c0_i32_1 = arith.constant 0 : i32
    return %c0_i32, %c0_i32_0 : i32, i32
  }
  func.func @transform_12(%arg0: i32) -> (i32, i32) {
    %c0_i32 = arith.constant 0 : i32
    %c0_i32_0 = arith.constant 0 : i32
    %c0_i32_1 = arith.constant 0 : i32
    return %c0_i32, %c0_i32_0 : i32, i32
  }
  func.func @transform_13(%arg0: i32) -> (i32, i32) {
    %c0_i32 = arith.constant 0 : i32
    %c0_i32_0 = arith.constant 0 : i32
    %c0_i32_1 = arith.constant 0 : i32
    return %c0_i32, %c0_i32_0 : i32, i32
  }
  func.func @transform_14(%arg0: i32) -> (i32, i32) {
    %c0_i32 = arith.constant 0 : i32
    %c0_i32_0 = arith.constant 0 : i32
    %c0_i32_1 = arith.constant 0 : i32
    return %c0_i32, %c0_i32_0 : i32, i32
  }
  func.func @transform_15(%arg0: i32) -> (i32, i32, i32) {
    %c0_i32 = arith.constant 0 : i32
    %c0_i32_0 = arith.constant 0 : i32
    %c0_i32_1 = arith.constant 0 : i32
    return %arg0, %c0_i32, %c0_i32_0 : i32, i32, i32
  }
}

module attributes {stable_mosaic.version = 11 : i64} {
  func.func @_ln_proj_kernel(%arg0: i32, %arg1: i32, %arg2: memref<16x128xf32, #tpu.memory_space<vmem>>, %arg3: memref<1x128xf32, #tpu.memory_space<vmem>>, %arg4: memref<1x128xf32, #tpu.memory_space<vmem>>, %arg5: memref<128x128xbf16, #tpu.memory_space<vmem>>, %arg6: memref<1x128xf32, #tpu.memory_space<vmem>>, %arg7: memref<16x128xf32, #tpu.memory_space<vmem>>) attributes {dimension_semantics = [#tpu.dimension_semantics<parallel>, #tpu.dimension_semantics<parallel>], iteration_bounds = array<i64: 1, 1>, scalar_prefetch = 0 : i64, scratch_operands = 0 : i64, tpu.core_type = #tpu.core_type<tc>, window_params = [{transform_indices = @transform_0, window_bounds = array<i64: 16, 128>}, {pipeline_mode = #tpu.pipeline_mode<synchronous>, transform_indices = @transform_1, window_bounds = array<i64: 1, 128>}, {pipeline_mode = #tpu.pipeline_mode<synchronous>, transform_indices = @transform_2, window_bounds = array<i64: 1, 128>}, {transform_indices = @transform_3, window_bounds = array<i64: 128, 128>}, {transform_indices = @transform_4, window_bounds = array<i64: 1, 128>}, {transform_indices = @transform_5, window_bounds = array<i64: 16, 128>}]} {
    %c0 = arith.constant 0 : index
    %c0_0 = arith.constant 0 : index
    %0 = vector.load %arg2[%c0, %c0_0] : memref<16x128xf32, #tpu.memory_space<vmem>>, vector<16x128xf32>
    %c0_1 = arith.constant 0 : index
    %c0_2 = arith.constant 0 : index
    %1 = vector.load %arg3[%c0_1, %c0_2] : memref<1x128xf32, #tpu.memory_space<vmem>>, vector<1x128xf32>
    %c0_3 = arith.constant 0 : index
    %c0_4 = arith.constant 0 : index
    %2 = vector.load %arg4[%c0_3, %c0_4] : memref<1x128xf32, #tpu.memory_space<vmem>>, vector<1x128xf32>
    %cst = arith.constant dense<0.000000e+00> : vector<16xf32>
    %3 = vector.multi_reduction <add>, %0, %cst [1] : vector<16x128xf32> to vector<16xf32>
    %4 = vector.shape_cast %3 : vector<16xf32> to vector<16x1xf32>
    %cst_5 = arith.constant 1.280000e+02 : f32
    %5 = vector.broadcast %cst_5 : f32 to vector<16x1xf32>
    %6 = arith.divf %4, %5 : vector<16x1xf32>
    %7 = vector.broadcast %6 : vector<16x1xf32> to vector<16x128xf32>
    %8 = arith.subf %0, %7 : vector<16x128xf32>
    %9 = arith.mulf %8, %8 : vector<16x128xf32>
    %cst_6 = arith.constant dense<0.000000e+00> : vector<16xf32>
    %10 = vector.multi_reduction <add>, %9, %cst_6 [1] : vector<16x128xf32> to vector<16xf32>
    %11 = vector.shape_cast %10 : vector<16xf32> to vector<16x1xf32>
    %cst_7 = arith.constant 1.280000e+02 : f32
    %12 = vector.broadcast %cst_7 : f32 to vector<16x1xf32>
    %13 = arith.divf %11, %12 : vector<16x1xf32>
    %14 = vector.broadcast %6 : vector<16x1xf32> to vector<16x128xf32>
    %15 = arith.subf %0, %14 : vector<16x128xf32>
    %cst_8 = arith.constant 9.99999974E-6 : f32
    %16 = vector.broadcast %cst_8 : f32 to vector<16x1xf32>
    %17 = arith.addf %13, %16 : vector<16x1xf32>
    %18 = math.rsqrt %17 : vector<16x1xf32>
    %19 = vector.broadcast %18 : vector<16x1xf32> to vector<16x128xf32>
    %20 = arith.mulf %15, %19 : vector<16x128xf32>
    %21 = vector.broadcast %1 : vector<1x128xf32> to vector<16x128xf32>
    %22 = arith.mulf %20, %21 : vector<16x128xf32>
    %23 = vector.broadcast %2 : vector<1x128xf32> to vector<16x128xf32>
    %24 = arith.addf %22, %23 : vector<16x128xf32>
    %25 = arith.truncf %24 : vector<16x128xf32> to vector<16x128xbf16>
    %c0_9 = arith.constant 0 : index
    %c0_10 = arith.constant 0 : index
    %26 = vector.load %arg5[%c0_9, %c0_10] : memref<128x128xbf16, #tpu.memory_space<vmem>>, vector<128x128xbf16>
    %cst_11 = arith.constant dense<0.000000e+00> : vector<16x128xf32>
    %27 = tpu.matmul %25, %26, %cst_11 {dimension_numbers = #tpu.dot_dimension_numbers<[1], [0], [0], [1], [0, 0, 1, 1], [], []>} : vector<16x128xbf16>, vector<128x128xbf16>, vector<16x128xf32> -> vector<16x128xf32>
    %c0_12 = arith.constant 0 : index
    %c0_13 = arith.constant 0 : index
    %28 = vector.load %arg6[%c0_12, %c0_13] : memref<1x128xf32, #tpu.memory_space<vmem>>, vector<1x128xf32>
    %29 = vector.broadcast %28 : vector<1x128xf32> to vector<16x128xf32>
    %30 = arith.addf %27, %29 : vector<16x128xf32>
    %c0_14 = arith.constant 0 : index
    %c0_15 = arith.constant 0 : index
    %31 = vector.load %arg7[%c0_14, %c0_15] : memref<16x128xf32, #tpu.memory_space<vmem>>, vector<16x128xf32>
    tpu.vector_store %arg7[%c0_14, %c0_15], %30 {strides = array<i32>} : memref<16x128xf32, #tpu.memory_space<vmem>>, vector<16x128xf32>,
    return
  }
  func.func @transform_0(%arg0: i32, %arg1: i32) -> (i32, i32) {
    %c0_i32 = arith.constant 0 : i32
    %c0_i32_0 = arith.constant 0 : i32
    return %arg0, %c0_i32 : i32, i32
  }
  func.func @transform_1(%arg0: i32, %arg1: i32) -> (i32, i32) {
    %c0_i32 = arith.constant 0 : i32
    %c0_i32_0 = arith.constant 0 : i32
    %c0_i32_1 = arith.constant 0 : i32
    return %c0_i32, %c0_i32_0 : i32, i32
  }
  func.func @transform_2(%arg0: i32, %arg1: i32) -> (i32, i32) {
    %c0_i32 = arith.constant 0 : i32
    %c0_i32_0 = arith.constant 0 : i32
    %c0_i32_1 = arith.constant 0 : i32
    return %c0_i32, %c0_i32_0 : i32, i32
  }
  func.func @transform_3(%arg0: i32, %arg1: i32) -> (i32, i32) {
    %c0_i32 = arith.constant 0 : i32
    %c0_i32_0 = arith.constant 0 : i32
    return %c0_i32, %arg1 : i32, i32
  }
  func.func @transform_4(%arg0: i32, %arg1: i32) -> (i32, i32) {
    %c0_i32 = arith.constant 0 : i32
    %c0_i32_0 = arith.constant 0 : i32
    return %c0_i32, %arg1 : i32, i32
  }
  func.func @transform_5(%arg0: i32, %arg1: i32) -> (i32, i32) {
    %c0_i32 = arith.constant 0 : i32
    return %arg0, %arg1 : i32, i32
  }
}

module attributes {stable_mosaic.version = 11 : i64} {
  func.func @_dec_layer_kernel(%arg0: i32, %arg1: memref<1x8x128xf32, #tpu.memory_space<vmem>>, %arg2: memref<1x16x128xf32, #tpu.memory_space<vmem>>, %arg3: memref<128x384xbf16, #tpu.memory_space<vmem>>, %arg4: memref<1x384xf32, #tpu.memory_space<vmem>>, %arg5: memref<128x128xbf16, #tpu.memory_space<vmem>>, %arg6: memref<1x128xf32, #tpu.memory_space<vmem>>, %arg7: memref<1x128xf32, #tpu.memory_space<vmem>>, %arg8: memref<1x128xf32, #tpu.memory_space<vmem>>, %arg9: memref<128x128xbf16, #tpu.memory_space<vmem>>, %arg10: memref<1x128xf32, #tpu.memory_space<vmem>>, %arg11: memref<128x256xbf16, #tpu.memory_space<vmem>>, %arg12: memref<1x256xf32, #tpu.memory_space<vmem>>, %arg13: memref<128x128xbf16, #tpu.memory_space<vmem>>, %arg14: memref<1x128xf32, #tpu.memory_space<vmem>>, %arg15: memref<1x128xf32, #tpu.memory_space<vmem>>, %arg16: memref<1x128xf32, #tpu.memory_space<vmem>>, %arg17: memref<128x256xbf16, #tpu.memory_space<vmem>>, %arg18: memref<1x256xf32, #tpu.memory_space<vmem>>, %arg19: memref<256x128xbf16, #tpu.memory_space<vmem>>, %arg20: memref<1x128xf32, #tpu.memory_space<vmem>>, %arg21: memref<1x128xf32, #tpu.memory_space<vmem>>, %arg22: memref<1x128xf32, #tpu.memory_space<vmem>>, %arg23: memref<1x8x128xf32, #tpu.memory_space<vmem>>) attributes {dimension_semantics = [#tpu.dimension_semantics<parallel>], iteration_bounds = array<i64: 2>, scalar_prefetch = 0 : i64, scratch_operands = 0 : i64, tpu.core_type = #tpu.core_type<tc>, window_params = [{transform_indices = @transform_0, window_bounds = array<i64: 1, 8, 128>}, {transform_indices = @transform_1, window_bounds = array<i64: 1, 16, 128>}, {pipeline_mode = #tpu.pipeline_mode<synchronous>, transform_indices = @transform_2, window_bounds = array<i64: 128, 384>}, {pipeline_mode = #tpu.pipeline_mode<synchronous>, transform_indices = @transform_3, window_bounds = array<i64: 1, 384>}, {pipeline_mode = #tpu.pipeline_mode<synchronous>, transform_indices = @transform_4, window_bounds = array<i64: 128, 128>}, {pipeline_mode = #tpu.pipeline_mode<synchronous>, transform_indices = @transform_5, window_bounds = array<i64: 1, 128>}, {pipeline_mode = #tpu.pipeline_mode<synchronous>, transform_indices = @transform_6, window_bounds = array<i64: 1, 128>}, {pipeline_mode = #tpu.pipeline_mode<synchronous>, transform_indices = @transform_7, window_bounds = array<i64: 1, 128>}, {pipeline_mode = #tpu.pipeline_mode<synchronous>, transform_indices = @transform_8, window_bounds = array<i64: 128, 128>}, {pipeline_mode = #tpu.pipeline_mode<synchronous>, transform_indices = @transform_9, window_bounds = array<i64: 1, 128>}, {pipeline_mode = #tpu.pipeline_mode<synchronous>, transform_indices = @transform_10, window_bounds = array<i64: 128, 256>}, {pipeline_mode = #tpu.pipeline_mode<synchronous>, transform_indices = @transform_11, window_bounds = array<i64: 1, 256>}, {pipeline_mode = #tpu.pipeline_mode<synchronous>, transform_indices = @transform_12, window_bounds = array<i64: 128, 128>}, {pipeline_mode = #tpu.pipeline_mode<synchronous>, transform_indices = @transform_13, window_bounds = array<i64: 1, 128>}, {pipeline_mode = #tpu.pipeline_mode<synchronous>, transform_indices = @transform_14, window_bounds = array<i64: 1, 128>}, {pipeline_mode = #tpu.pipeline_mode<synchronous>, transform_indices = @transform_15, window_bounds = array<i64: 1, 128>}, {pipeline_mode = #tpu.pipeline_mode<synchronous>, transform_indices = @transform_16, window_bounds = array<i64: 128, 256>}, {pipeline_mode = #tpu.pipeline_mode<synchronous>, transform_indices = @transform_17, window_bounds = array<i64: 1, 256>}, {pipeline_mode = #tpu.pipeline_mode<synchronous>, transform_indices = @transform_18, window_bounds = array<i64: 256, 128>}, {pipeline_mode = #tpu.pipeline_mode<synchronous>, transform_indices = @transform_19, window_bounds = array<i64: 1, 128>}, {pipeline_mode = #tpu.pipeline_mode<synchronous>, transform_indices = @transform_20, window_bounds = array<i64: 1, 128>}, {pipeline_mode = #tpu.pipeline_mode<synchronous>, transform_indices = @transform_21, window_bounds = array<i64: 1, 128>}, {transform_indices = @transform_22, window_bounds = array<i64: 1, 8, 128>}]} {
    %c0 = arith.constant 0 : index
    %c0_0 = arith.constant 0 : index
    %c0_1 = arith.constant 0 : index
    %0 = vector.load %arg1[%c0, %c0_0, %c0_1] : memref<1x8x128xf32, #tpu.memory_space<vmem>>, vector<1x8x128xf32>
    %1 = vector.shape_cast %0 : vector<1x8x128xf32> to vector<8x128xf32>
    %c0_2 = arith.constant 0 : index
    %c0_3 = arith.constant 0 : index
    %c0_4 = arith.constant 0 : index
    %2 = vector.load %arg2[%c0_2, %c0_3, %c0_4] : memref<1x16x128xf32, #tpu.memory_space<vmem>>, vector<1x16x128xf32>
    %3 = vector.shape_cast %2 : vector<1x16x128xf32> to vector<16x128xf32>
    %4 = arith.truncf %1 : vector<8x128xf32> to vector<8x128xbf16>
    %c0_5 = arith.constant 0 : index
    %c0_6 = arith.constant 0 : index
    %5 = vector.load %arg3[%c0_5, %c0_6] : memref<128x384xbf16, #tpu.memory_space<vmem>>, vector<128x384xbf16>
    %cst = arith.constant dense<0.000000e+00> : vector<8x384xf32>
    %6 = tpu.matmul %4, %5, %cst {dimension_numbers = #tpu.dot_dimension_numbers<[1], [0], [0], [1], [0, 0, 1, 1], [], []>} : vector<8x128xbf16>, vector<128x384xbf16>, vector<8x384xf32> -> vector<8x384xf32>
    %c0_7 = arith.constant 0 : index
    %c0_8 = arith.constant 0 : index
    %7 = vector.load %arg4[%c0_7, %c0_8] : memref<1x384xf32, #tpu.memory_space<vmem>>, vector<1x384xf32>
    %8 = vector.broadcast %7 : vector<1x384xf32> to vector<8x384xf32>
    %9 = arith.addf %6, %8 : vector<8x384xf32>
    %10 = vector.extract_strided_slice %9 {offsets = [0, 0], sizes = [8, 128], strides = [1, 1]} : vector<8x384xf32> to vector<8x128xf32>
    %11 = vector.extract_strided_slice %9 {offsets = [0, 128], sizes = [8, 128], strides = [1, 1]} : vector<8x384xf32> to vector<8x128xf32>
    %12 = vector.extract_strided_slice %9 {offsets = [0, 256], sizes = [8, 128], strides = [1, 1]} : vector<8x384xf32> to vector<8x128xf32>
    %13 = vector.extract_strided_slice %10 {offsets = [0, 0], sizes = [8, 32], strides = [1, 1]} : vector<8x128xf32> to vector<8x32xf32>
    %14 = arith.truncf %13 : vector<8x32xf32> to vector<8x32xbf16>
    %15 = vector.extract_strided_slice %11 {offsets = [0, 0], sizes = [8, 32], strides = [1, 1]} : vector<8x128xf32> to vector<8x32xf32>
    %16 = arith.truncf %15 : vector<8x32xf32> to vector<8x32xbf16>
    %17 = vector.extract_strided_slice %12 {offsets = [0, 0], sizes = [8, 32], strides = [1, 1]} : vector<8x128xf32> to vector<8x32xf32>
    %18 = arith.truncf %17 : vector<8x32xf32> to vector<8x32xbf16>
    %cst_9 = arith.constant dense<0.000000e+00> : vector<8x8xf32>
    %19 = tpu.matmul %14, %16, %cst_9 {dimension_numbers = #tpu.dot_dimension_numbers<[1], [1], [0], [0], [0, 0, 1, 0], [], []>} : vector<8x32xbf16>, vector<8x32xbf16>, vector<8x8xf32> -> vector<8x8xf32>
    %20 = tpu.iota {dimensions = array<i32: 0>} : vector<8x8xi32>
    %21 = tpu.iota {dimensions = array<i32: 1>} : vector<8x8xi32>
    %22 = arith.cmpi sle, %21, %20 : vector<8x8xi32>
    %cst_10 = arith.constant -1.000000e+30 : f32
    %23 = vector.broadcast %cst_10 : f32 to vector<8x8xf32>
    %24 = arith.select %22, %19, %23 : vector<8x8xi1>, vector<8x8xf32>
    %cst_11 = arith.constant dense<0xFF800000> : vector<8xf32>
    %25 = vector.multi_reduction <maximumf>, %24, %cst_11 [1] : vector<8x8xf32> to vector<8xf32>
    %26 = vector.shape_cast %25 : vector<8xf32> to vector<8x1xf32>
    %27 = vector.broadcast %26 : vector<8x1xf32> to vector<8x8xf32>
    %28 = arith.subf %24, %27 : vector<8x8xf32>
    %29 = math.exp %28 : vector<8x8xf32>
    %cst_12 = arith.constant dense<0.000000e+00> : vector<8xf32>
    %30 = vector.multi_reduction <add>, %29, %cst_12 [1] : vector<8x8xf32> to vector<8xf32>
    %31 = vector.shape_cast %30 : vector<8xf32> to vector<8x1xf32>
    %32 = vector.broadcast %31 : vector<8x1xf32> to vector<8x8xf32>
    %33 = arith.divf %29, %32 : vector<8x8xf32>
    %34 = arith.truncf %33 : vector<8x8xf32> to vector<8x8xbf16>
    %cst_13 = arith.constant dense<0.000000e+00> : vector<8x32xf32>
    %35 = tpu.matmul %34, %18, %cst_13 {dimension_numbers = #tpu.dot_dimension_numbers<[1], [0], [0], [1], [0, 0, 1, 1], [], []>} : vector<8x8xbf16>, vector<8x32xbf16>, vector<8x32xf32> -> vector<8x32xf32>
    %36 = vector.extract_strided_slice %10 {offsets = [0, 32], sizes = [8, 32], strides = [1, 1]} : vector<8x128xf32> to vector<8x32xf32>
    %37 = arith.truncf %36 : vector<8x32xf32> to vector<8x32xbf16>
    %38 = vector.extract_strided_slice %11 {offsets = [0, 32], sizes = [8, 32], strides = [1, 1]} : vector<8x128xf32> to vector<8x32xf32>
    %39 = arith.truncf %38 : vector<8x32xf32> to vector<8x32xbf16>
    %40 = vector.extract_strided_slice %12 {offsets = [0, 32], sizes = [8, 32], strides = [1, 1]} : vector<8x128xf32> to vector<8x32xf32>
    %41 = arith.truncf %40 : vector<8x32xf32> to vector<8x32xbf16>
    %cst_14 = arith.constant dense<0.000000e+00> : vector<8x8xf32>
    %42 = tpu.matmul %37, %39, %cst_14 {dimension_numbers = #tpu.dot_dimension_numbers<[1], [1], [0], [0], [0, 0, 1, 0], [], []>} : vector<8x32xbf16>, vector<8x32xbf16>, vector<8x8xf32> -> vector<8x8xf32>
    %43 = tpu.iota {dimensions = array<i32: 0>} : vector<8x8xi32>
    %44 = tpu.iota {dimensions = array<i32: 1>} : vector<8x8xi32>
    %45 = arith.cmpi sle, %44, %43 : vector<8x8xi32>
    %cst_15 = arith.constant -1.000000e+30 : f32
    %46 = vector.broadcast %cst_15 : f32 to vector<8x8xf32>
    %47 = arith.select %45, %42, %46 : vector<8x8xi1>, vector<8x8xf32>
    %cst_16 = arith.constant dense<0xFF800000> : vector<8xf32>
    %48 = vector.multi_reduction <maximumf>, %47, %cst_16 [1] : vector<8x8xf32> to vector<8xf32>
    %49 = vector.shape_cast %48 : vector<8xf32> to vector<8x1xf32>
    %50 = vector.broadcast %49 : vector<8x1xf32> to vector<8x8xf32>
    %51 = arith.subf %47, %50 : vector<8x8xf32>
    %52 = math.exp %51 : vector<8x8xf32>
    %cst_17 = arith.constant dense<0.000000e+00> : vector<8xf32>
    %53 = vector.multi_reduction <add>, %52, %cst_17 [1] : vector<8x8xf32> to vector<8xf32>
    %54 = vector.shape_cast %53 : vector<8xf32> to vector<8x1xf32>
    %55 = vector.broadcast %54 : vector<8x1xf32> to vector<8x8xf32>
    %56 = arith.divf %52, %55 : vector<8x8xf32>
    %57 = arith.truncf %56 : vector<8x8xf32> to vector<8x8xbf16>
    %cst_18 = arith.constant dense<0.000000e+00> : vector<8x32xf32>
    %58 = tpu.matmul %57, %41, %cst_18 {dimension_numbers = #tpu.dot_dimension_numbers<[1], [0], [0], [1], [0, 0, 1, 1], [], []>} : vector<8x8xbf16>, vector<8x32xbf16>, vector<8x32xf32> -> vector<8x32xf32>
    %59 = vector.extract_strided_slice %10 {offsets = [0, 64], sizes = [8, 32], strides = [1, 1]} : vector<8x128xf32> to vector<8x32xf32>
    %60 = arith.truncf %59 : vector<8x32xf32> to vector<8x32xbf16>
    %61 = vector.extract_strided_slice %11 {offsets = [0, 64], sizes = [8, 32], strides = [1, 1]} : vector<8x128xf32> to vector<8x32xf32>
    %62 = arith.truncf %61 : vector<8x32xf32> to vector<8x32xbf16>
    %63 = vector.extract_strided_slice %12 {offsets = [0, 64], sizes = [8, 32], strides = [1, 1]} : vector<8x128xf32> to vector<8x32xf32>
    %64 = arith.truncf %63 : vector<8x32xf32> to vector<8x32xbf16>
    %cst_19 = arith.constant dense<0.000000e+00> : vector<8x8xf32>
    %65 = tpu.matmul %60, %62, %cst_19 {dimension_numbers = #tpu.dot_dimension_numbers<[1], [1], [0], [0], [0, 0, 1, 0], [], []>} : vector<8x32xbf16>, vector<8x32xbf16>, vector<8x8xf32> -> vector<8x8xf32>
    %66 = tpu.iota {dimensions = array<i32: 0>} : vector<8x8xi32>
    %67 = tpu.iota {dimensions = array<i32: 1>} : vector<8x8xi32>
    %68 = arith.cmpi sle, %67, %66 : vector<8x8xi32>
    %cst_20 = arith.constant -1.000000e+30 : f32
    %69 = vector.broadcast %cst_20 : f32 to vector<8x8xf32>
    %70 = arith.select %68, %65, %69 : vector<8x8xi1>, vector<8x8xf32>
    %cst_21 = arith.constant dense<0xFF800000> : vector<8xf32>
    %71 = vector.multi_reduction <maximumf>, %70, %cst_21 [1] : vector<8x8xf32> to vector<8xf32>
    %72 = vector.shape_cast %71 : vector<8xf32> to vector<8x1xf32>
    %73 = vector.broadcast %72 : vector<8x1xf32> to vector<8x8xf32>
    %74 = arith.subf %70, %73 : vector<8x8xf32>
    %75 = math.exp %74 : vector<8x8xf32>
    %cst_22 = arith.constant dense<0.000000e+00> : vector<8xf32>
    %76 = vector.multi_reduction <add>, %75, %cst_22 [1] : vector<8x8xf32> to vector<8xf32>
    %77 = vector.shape_cast %76 : vector<8xf32> to vector<8x1xf32>
    %78 = vector.broadcast %77 : vector<8x1xf32> to vector<8x8xf32>
    %79 = arith.divf %75, %78 : vector<8x8xf32>
    %80 = arith.truncf %79 : vector<8x8xf32> to vector<8x8xbf16>
    %cst_23 = arith.constant dense<0.000000e+00> : vector<8x32xf32>
    %81 = tpu.matmul %80, %64, %cst_23 {dimension_numbers = #tpu.dot_dimension_numbers<[1], [0], [0], [1], [0, 0, 1, 1], [], []>} : vector<8x8xbf16>, vector<8x32xbf16>, vector<8x32xf32> -> vector<8x32xf32>
    %82 = vector.extract_strided_slice %10 {offsets = [0, 96], sizes = [8, 32], strides = [1, 1]} : vector<8x128xf32> to vector<8x32xf32>
    %83 = arith.truncf %82 : vector<8x32xf32> to vector<8x32xbf16>
    %84 = vector.extract_strided_slice %11 {offsets = [0, 96], sizes = [8, 32], strides = [1, 1]} : vector<8x128xf32> to vector<8x32xf32>
    %85 = arith.truncf %84 : vector<8x32xf32> to vector<8x32xbf16>
    %86 = vector.extract_strided_slice %12 {offsets = [0, 96], sizes = [8, 32], strides = [1, 1]} : vector<8x128xf32> to vector<8x32xf32>
    %87 = arith.truncf %86 : vector<8x32xf32> to vector<8x32xbf16>
    %cst_24 = arith.constant dense<0.000000e+00> : vector<8x8xf32>
    %88 = tpu.matmul %83, %85, %cst_24 {dimension_numbers = #tpu.dot_dimension_numbers<[1], [1], [0], [0], [0, 0, 1, 0], [], []>} : vector<8x32xbf16>, vector<8x32xbf16>, vector<8x8xf32> -> vector<8x8xf32>
    %89 = tpu.iota {dimensions = array<i32: 0>} : vector<8x8xi32>
    %90 = tpu.iota {dimensions = array<i32: 1>} : vector<8x8xi32>
    %91 = arith.cmpi sle, %90, %89 : vector<8x8xi32>
    %cst_25 = arith.constant -1.000000e+30 : f32
    %92 = vector.broadcast %cst_25 : f32 to vector<8x8xf32>
    %93 = arith.select %91, %88, %92 : vector<8x8xi1>, vector<8x8xf32>
    %cst_26 = arith.constant dense<0xFF800000> : vector<8xf32>
    %94 = vector.multi_reduction <maximumf>, %93, %cst_26 [1] : vector<8x8xf32> to vector<8xf32>
    %95 = vector.shape_cast %94 : vector<8xf32> to vector<8x1xf32>
    %96 = vector.broadcast %95 : vector<8x1xf32> to vector<8x8xf32>
    %97 = arith.subf %93, %96 : vector<8x8xf32>
    %98 = math.exp %97 : vector<8x8xf32>
    %cst_27 = arith.constant dense<0.000000e+00> : vector<8xf32>
    %99 = vector.multi_reduction <add>, %98, %cst_27 [1] : vector<8x8xf32> to vector<8xf32>
    %100 = vector.shape_cast %99 : vector<8xf32> to vector<8x1xf32>
    %101 = vector.broadcast %100 : vector<8x1xf32> to vector<8x8xf32>
    %102 = arith.divf %98, %101 : vector<8x8xf32>
    %103 = arith.truncf %102 : vector<8x8xf32> to vector<8x8xbf16>
    %cst_28 = arith.constant dense<0.000000e+00> : vector<8x32xf32>
    %104 = tpu.matmul %103, %87, %cst_28 {dimension_numbers = #tpu.dot_dimension_numbers<[1], [0], [0], [1], [0, 0, 1, 1], [], []>} : vector<8x8xbf16>, vector<8x32xbf16>, vector<8x32xf32> -> vector<8x32xf32>
    %105 = tpu.concatenate %35, %58, %81, %104 in 1 : vector<8x32xf32>, vector<8x32xf32>, vector<8x32xf32>, vector<8x32xf32> -> vector<8x128xf32>
    %106 = arith.truncf %105 : vector<8x128xf32> to vector<8x128xbf16>
    %c0_29 = arith.constant 0 : index
    %c0_30 = arith.constant 0 : index
    %107 = vector.load %arg5[%c0_29, %c0_30] : memref<128x128xbf16, #tpu.memory_space<vmem>>, vector<128x128xbf16>
    %cst_31 = arith.constant dense<0.000000e+00> : vector<8x128xf32>
    %108 = tpu.matmul %106, %107, %cst_31 {dimension_numbers = #tpu.dot_dimension_numbers<[1], [0], [0], [1], [0, 0, 1, 1], [], []>} : vector<8x128xbf16>, vector<128x128xbf16>, vector<8x128xf32> -> vector<8x128xf32>
    %c0_32 = arith.constant 0 : index
    %c0_33 = arith.constant 0 : index
    %109 = vector.load %arg6[%c0_32, %c0_33] : memref<1x128xf32, #tpu.memory_space<vmem>>, vector<1x128xf32>
    %110 = vector.broadcast %109 : vector<1x128xf32> to vector<8x128xf32>
    %111 = arith.addf %108, %110 : vector<8x128xf32>
    %112 = arith.addf %1, %111 : vector<8x128xf32>
    %c0_34 = arith.constant 0 : index
    %c0_35 = arith.constant 0 : index
    %113 = vector.load %arg7[%c0_34, %c0_35] : memref<1x128xf32, #tpu.memory_space<vmem>>, vector<1x128xf32>
    %c0_36 = arith.constant 0 : index
    %c0_37 = arith.constant 0 : index
    %114 = vector.load %arg8[%c0_36, %c0_37] : memref<1x128xf32, #tpu.memory_space<vmem>>, vector<1x128xf32>
    %cst_38 = arith.constant dense<0.000000e+00> : vector<8xf32>
    %115 = vector.multi_reduction <add>, %112, %cst_38 [1] : vector<8x128xf32> to vector<8xf32>
    %116 = vector.shape_cast %115 : vector<8xf32> to vector<8x1xf32>
    %cst_39 = arith.constant 1.280000e+02 : f32
    %117 = vector.broadcast %cst_39 : f32 to vector<8x1xf32>
    %118 = arith.divf %116, %117 : vector<8x1xf32>
    %119 = vector.broadcast %118 : vector<8x1xf32> to vector<8x128xf32>
    %120 = arith.subf %112, %119 : vector<8x128xf32>
    %121 = arith.mulf %120, %120 : vector<8x128xf32>
    %cst_40 = arith.constant dense<0.000000e+00> : vector<8xf32>
    %122 = vector.multi_reduction <add>, %121, %cst_40 [1] : vector<8x128xf32> to vector<8xf32>
    %123 = vector.shape_cast %122 : vector<8xf32> to vector<8x1xf32>
    %cst_41 = arith.constant 1.280000e+02 : f32
    %124 = vector.broadcast %cst_41 : f32 to vector<8x1xf32>
    %125 = arith.divf %123, %124 : vector<8x1xf32>
    %126 = vector.broadcast %118 : vector<8x1xf32> to vector<8x128xf32>
    %127 = arith.subf %112, %126 : vector<8x128xf32>
    %cst_42 = arith.constant 9.99999974E-6 : f32
    %128 = vector.broadcast %cst_42 : f32 to vector<8x1xf32>
    %129 = arith.addf %125, %128 : vector<8x1xf32>
    %130 = math.rsqrt %129 : vector<8x1xf32>
    %131 = vector.broadcast %130 : vector<8x1xf32> to vector<8x128xf32>
    %132 = arith.mulf %127, %131 : vector<8x128xf32>
    %133 = vector.broadcast %113 : vector<1x128xf32> to vector<8x128xf32>
    %134 = arith.mulf %132, %133 : vector<8x128xf32>
    %135 = vector.broadcast %114 : vector<1x128xf32> to vector<8x128xf32>
    %136 = arith.addf %134, %135 : vector<8x128xf32>
    %137 = arith.truncf %136 : vector<8x128xf32> to vector<8x128xbf16>
    %c0_43 = arith.constant 0 : index
    %c0_44 = arith.constant 0 : index
    %138 = vector.load %arg9[%c0_43, %c0_44] : memref<128x128xbf16, #tpu.memory_space<vmem>>, vector<128x128xbf16>
    %cst_45 = arith.constant dense<0.000000e+00> : vector<8x128xf32>
    %139 = tpu.matmul %137, %138, %cst_45 {dimension_numbers = #tpu.dot_dimension_numbers<[1], [0], [0], [1], [0, 0, 1, 1], [], []>} : vector<8x128xbf16>, vector<128x128xbf16>, vector<8x128xf32> -> vector<8x128xf32>
    %c0_46 = arith.constant 0 : index
    %c0_47 = arith.constant 0 : index
    %140 = vector.load %arg10[%c0_46, %c0_47] : memref<1x128xf32, #tpu.memory_space<vmem>>, vector<1x128xf32>
    %141 = vector.broadcast %140 : vector<1x128xf32> to vector<8x128xf32>
    %142 = arith.addf %139, %141 : vector<8x128xf32>
    %143 = arith.truncf %3 : vector<16x128xf32> to vector<16x128xbf16>
    %c0_48 = arith.constant 0 : index
    %c0_49 = arith.constant 0 : index
    %144 = vector.load %arg11[%c0_48, %c0_49] : memref<128x256xbf16, #tpu.memory_space<vmem>>, vector<128x256xbf16>
    %cst_50 = arith.constant dense<0.000000e+00> : vector<16x256xf32>
    %145 = tpu.matmul %143, %144, %cst_50 {dimension_numbers = #tpu.dot_dimension_numbers<[1], [0], [0], [1], [0, 0, 1, 1], [], []>} : vector<16x128xbf16>, vector<128x256xbf16>, vector<16x256xf32> -> vector<16x256xf32>
    %c0_51 = arith.constant 0 : index
    %c0_52 = arith.constant 0 : index
    %146 = vector.load %arg12[%c0_51, %c0_52] : memref<1x256xf32, #tpu.memory_space<vmem>>, vector<1x256xf32>
    %147 = vector.broadcast %146 : vector<1x256xf32> to vector<16x256xf32>
    %148 = arith.addf %145, %147 : vector<16x256xf32>
    %149 = vector.extract_strided_slice %148 {offsets = [0, 0], sizes = [16, 128], strides = [1, 1]} : vector<16x256xf32> to vector<16x128xf32>
    %150 = vector.extract_strided_slice %148 {offsets = [0, 128], sizes = [16, 128], strides = [1, 1]} : vector<16x256xf32> to vector<16x128xf32>
    %151 = vector.extract_strided_slice %142 {offsets = [0, 0], sizes = [8, 32], strides = [1, 1]} : vector<8x128xf32> to vector<8x32xf32>
    %152 = arith.truncf %151 : vector<8x32xf32> to vector<8x32xbf16>
    %153 = vector.extract_strided_slice %149 {offsets = [0, 0], sizes = [16, 32], strides = [1, 1]} : vector<16x128xf32> to vector<16x32xf32>
    %154 = arith.truncf %153 : vector<16x32xf32> to vector<16x32xbf16>
    %155 = vector.extract_strided_slice %150 {offsets = [0, 0], sizes = [16, 32], strides = [1, 1]} : vector<16x128xf32> to vector<16x32xf32>
    %156 = arith.truncf %155 : vector<16x32xf32> to vector<16x32xbf16>
    %cst_53 = arith.constant dense<0.000000e+00> : vector<8x16xf32>
    %157 = tpu.matmul %152, %154, %cst_53 {dimension_numbers = #tpu.dot_dimension_numbers<[1], [1], [0], [0], [0, 0, 1, 0], [], []>} : vector<8x32xbf16>, vector<16x32xbf16>, vector<8x16xf32> -> vector<8x16xf32>
    %cst_54 = arith.constant dense<0xFF800000> : vector<8xf32>
    %158 = vector.multi_reduction <maximumf>, %157, %cst_54 [1] : vector<8x16xf32> to vector<8xf32>
    %159 = vector.shape_cast %158 : vector<8xf32> to vector<8x1xf32>
    %160 = vector.broadcast %159 : vector<8x1xf32> to vector<8x16xf32>
    %161 = arith.subf %157, %160 : vector<8x16xf32>
    %162 = math.exp %161 : vector<8x16xf32>
    %cst_55 = arith.constant dense<0.000000e+00> : vector<8xf32>
    %163 = vector.multi_reduction <add>, %162, %cst_55 [1] : vector<8x16xf32> to vector<8xf32>
    %164 = vector.shape_cast %163 : vector<8xf32> to vector<8x1xf32>
    %165 = vector.broadcast %164 : vector<8x1xf32> to vector<8x16xf32>
    %166 = arith.divf %162, %165 : vector<8x16xf32>
    %167 = arith.truncf %166 : vector<8x16xf32> to vector<8x16xbf16>
    %cst_56 = arith.constant dense<0.000000e+00> : vector<8x32xf32>
    %168 = tpu.matmul %167, %156, %cst_56 {dimension_numbers = #tpu.dot_dimension_numbers<[1], [0], [0], [1], [0, 0, 1, 1], [], []>} : vector<8x16xbf16>, vector<16x32xbf16>, vector<8x32xf32> -> vector<8x32xf32>
    %169 = vector.extract_strided_slice %142 {offsets = [0, 32], sizes = [8, 32], strides = [1, 1]} : vector<8x128xf32> to vector<8x32xf32>
    %170 = arith.truncf %169 : vector<8x32xf32> to vector<8x32xbf16>
    %171 = vector.extract_strided_slice %149 {offsets = [0, 32], sizes = [16, 32], strides = [1, 1]} : vector<16x128xf32> to vector<16x32xf32>
    %172 = arith.truncf %171 : vector<16x32xf32> to vector<16x32xbf16>
    %173 = vector.extract_strided_slice %150 {offsets = [0, 32], sizes = [16, 32], strides = [1, 1]} : vector<16x128xf32> to vector<16x32xf32>
    %174 = arith.truncf %173 : vector<16x32xf32> to vector<16x32xbf16>
    %cst_57 = arith.constant dense<0.000000e+00> : vector<8x16xf32>
    %175 = tpu.matmul %170, %172, %cst_57 {dimension_numbers = #tpu.dot_dimension_numbers<[1], [1], [0], [0], [0, 0, 1, 0], [], []>} : vector<8x32xbf16>, vector<16x32xbf16>, vector<8x16xf32> -> vector<8x16xf32>
    %cst_58 = arith.constant dense<0xFF800000> : vector<8xf32>
    %176 = vector.multi_reduction <maximumf>, %175, %cst_58 [1] : vector<8x16xf32> to vector<8xf32>
    %177 = vector.shape_cast %176 : vector<8xf32> to vector<8x1xf32>
    %178 = vector.broadcast %177 : vector<8x1xf32> to vector<8x16xf32>
    %179 = arith.subf %175, %178 : vector<8x16xf32>
    %180 = math.exp %179 : vector<8x16xf32>
    %cst_59 = arith.constant dense<0.000000e+00> : vector<8xf32>
    %181 = vector.multi_reduction <add>, %180, %cst_59 [1] : vector<8x16xf32> to vector<8xf32>
    %182 = vector.shape_cast %181 : vector<8xf32> to vector<8x1xf32>
    %183 = vector.broadcast %182 : vector<8x1xf32> to vector<8x16xf32>
    %184 = arith.divf %180, %183 : vector<8x16xf32>
    %185 = arith.truncf %184 : vector<8x16xf32> to vector<8x16xbf16>
    %cst_60 = arith.constant dense<0.000000e+00> : vector<8x32xf32>
    %186 = tpu.matmul %185, %174, %cst_60 {dimension_numbers = #tpu.dot_dimension_numbers<[1], [0], [0], [1], [0, 0, 1, 1], [], []>} : vector<8x16xbf16>, vector<16x32xbf16>, vector<8x32xf32> -> vector<8x32xf32>
    %187 = vector.extract_strided_slice %142 {offsets = [0, 64], sizes = [8, 32], strides = [1, 1]} : vector<8x128xf32> to vector<8x32xf32>
    %188 = arith.truncf %187 : vector<8x32xf32> to vector<8x32xbf16>
    %189 = vector.extract_strided_slice %149 {offsets = [0, 64], sizes = [16, 32], strides = [1, 1]} : vector<16x128xf32> to vector<16x32xf32>
    %190 = arith.truncf %189 : vector<16x32xf32> to vector<16x32xbf16>
    %191 = vector.extract_strided_slice %150 {offsets = [0, 64], sizes = [16, 32], strides = [1, 1]} : vector<16x128xf32> to vector<16x32xf32>
    %192 = arith.truncf %191 : vector<16x32xf32> to vector<16x32xbf16>
    %cst_61 = arith.constant dense<0.000000e+00> : vector<8x16xf32>
    %193 = tpu.matmul %188, %190, %cst_61 {dimension_numbers = #tpu.dot_dimension_numbers<[1], [1], [0], [0], [0, 0, 1, 0], [], []>} : vector<8x32xbf16>, vector<16x32xbf16>, vector<8x16xf32> -> vector<8x16xf32>
    %cst_62 = arith.constant dense<0xFF800000> : vector<8xf32>
    %194 = vector.multi_reduction <maximumf>, %193, %cst_62 [1] : vector<8x16xf32> to vector<8xf32>
    %195 = vector.shape_cast %194 : vector<8xf32> to vector<8x1xf32>
    %196 = vector.broadcast %195 : vector<8x1xf32> to vector<8x16xf32>
    %197 = arith.subf %193, %196 : vector<8x16xf32>
    %198 = math.exp %197 : vector<8x16xf32>
    %cst_63 = arith.constant dense<0.000000e+00> : vector<8xf32>
    %199 = vector.multi_reduction <add>, %198, %cst_63 [1] : vector<8x16xf32> to vector<8xf32>
    %200 = vector.shape_cast %199 : vector<8xf32> to vector<8x1xf32>
    %201 = vector.broadcast %200 : vector<8x1xf32> to vector<8x16xf32>
    %202 = arith.divf %198, %201 : vector<8x16xf32>
    %203 = arith.truncf %202 : vector<8x16xf32> to vector<8x16xbf16>
    %cst_64 = arith.constant dense<0.000000e+00> : vector<8x32xf32>
    %204 = tpu.matmul %203, %192, %cst_64 {dimension_numbers = #tpu.dot_dimension_numbers<[1], [0], [0], [1], [0, 0, 1, 1], [], []>} : vector<8x16xbf16>, vector<16x32xbf16>, vector<8x32xf32> -> vector<8x32xf32>
    %205 = vector.extract_strided_slice %142 {offsets = [0, 96], sizes = [8, 32], strides = [1, 1]} : vector<8x128xf32> to vector<8x32xf32>
    %206 = arith.truncf %205 : vector<8x32xf32> to vector<8x32xbf16>
    %207 = vector.extract_strided_slice %149 {offsets = [0, 96], sizes = [16, 32], strides = [1, 1]} : vector<16x128xf32> to vector<16x32xf32>
    %208 = arith.truncf %207 : vector<16x32xf32> to vector<16x32xbf16>
    %209 = vector.extract_strided_slice %150 {offsets = [0, 96], sizes = [16, 32], strides = [1, 1]} : vector<16x128xf32> to vector<16x32xf32>
    %210 = arith.truncf %209 : vector<16x32xf32> to vector<16x32xbf16>
    %cst_65 = arith.constant dense<0.000000e+00> : vector<8x16xf32>
    %211 = tpu.matmul %206, %208, %cst_65 {dimension_numbers = #tpu.dot_dimension_numbers<[1], [1], [0], [0], [0, 0, 1, 0], [], []>} : vector<8x32xbf16>, vector<16x32xbf16>, vector<8x16xf32> -> vector<8x16xf32>
    %cst_66 = arith.constant dense<0xFF800000> : vector<8xf32>
    %212 = vector.multi_reduction <maximumf>, %211, %cst_66 [1] : vector<8x16xf32> to vector<8xf32>
    %213 = vector.shape_cast %212 : vector<8xf32> to vector<8x1xf32>
    %214 = vector.broadcast %213 : vector<8x1xf32> to vector<8x16xf32>
    %215 = arith.subf %211, %214 : vector<8x16xf32>
    %216 = math.exp %215 : vector<8x16xf32>
    %cst_67 = arith.constant dense<0.000000e+00> : vector<8xf32>
    %217 = vector.multi_reduction <add>, %216, %cst_67 [1] : vector<8x16xf32> to vector<8xf32>
    %218 = vector.shape_cast %217 : vector<8xf32> to vector<8x1xf32>
    %219 = vector.broadcast %218 : vector<8x1xf32> to vector<8x16xf32>
    %220 = arith.divf %216, %219 : vector<8x16xf32>
    %221 = arith.truncf %220 : vector<8x16xf32> to vector<8x16xbf16>
    %cst_68 = arith.constant dense<0.000000e+00> : vector<8x32xf32>
    %222 = tpu.matmul %221, %210, %cst_68 {dimension_numbers = #tpu.dot_dimension_numbers<[1], [0], [0], [1], [0, 0, 1, 1], [], []>} : vector<8x16xbf16>, vector<16x32xbf16>, vector<8x32xf32> -> vector<8x32xf32>
    %223 = tpu.concatenate %168, %186, %204, %222 in 1 : vector<8x32xf32>, vector<8x32xf32>, vector<8x32xf32>, vector<8x32xf32> -> vector<8x128xf32>
    %224 = arith.truncf %223 : vector<8x128xf32> to vector<8x128xbf16>
    %c0_69 = arith.constant 0 : index
    %c0_70 = arith.constant 0 : index
    %225 = vector.load %arg13[%c0_69, %c0_70] : memref<128x128xbf16, #tpu.memory_space<vmem>>, vector<128x128xbf16>
    %cst_71 = arith.constant dense<0.000000e+00> : vector<8x128xf32>
    %226 = tpu.matmul %224, %225, %cst_71 {dimension_numbers = #tpu.dot_dimension_numbers<[1], [0], [0], [1], [0, 0, 1, 1], [], []>} : vector<8x128xbf16>, vector<128x128xbf16>, vector<8x128xf32> -> vector<8x128xf32>
    %c0_72 = arith.constant 0 : index
    %c0_73 = arith.constant 0 : index
    %227 = vector.load %arg14[%c0_72, %c0_73] : memref<1x128xf32, #tpu.memory_space<vmem>>, vector<1x128xf32>
    %228 = vector.broadcast %227 : vector<1x128xf32> to vector<8x128xf32>
    %229 = arith.addf %226, %228 : vector<8x128xf32>
    %230 = arith.addf %136, %229 : vector<8x128xf32>
    %c0_74 = arith.constant 0 : index
    %c0_75 = arith.constant 0 : index
    %231 = vector.load %arg15[%c0_74, %c0_75] : memref<1x128xf32, #tpu.memory_space<vmem>>, vector<1x128xf32>
    %c0_76 = arith.constant 0 : index
    %c0_77 = arith.constant 0 : index
    %232 = vector.load %arg16[%c0_76, %c0_77] : memref<1x128xf32, #tpu.memory_space<vmem>>, vector<1x128xf32>
    %cst_78 = arith.constant dense<0.000000e+00> : vector<8xf32>
    %233 = vector.multi_reduction <add>, %230, %cst_78 [1] : vector<8x128xf32> to vector<8xf32>
    %234 = vector.shape_cast %233 : vector<8xf32> to vector<8x1xf32>
    %cst_79 = arith.constant 1.280000e+02 : f32
    %235 = vector.broadcast %cst_79 : f32 to vector<8x1xf32>
    %236 = arith.divf %234, %235 : vector<8x1xf32>
    %237 = vector.broadcast %236 : vector<8x1xf32> to vector<8x128xf32>
    %238 = arith.subf %230, %237 : vector<8x128xf32>
    %239 = arith.mulf %238, %238 : vector<8x128xf32>
    %cst_80 = arith.constant dense<0.000000e+00> : vector<8xf32>
    %240 = vector.multi_reduction <add>, %239, %cst_80 [1] : vector<8x128xf32> to vector<8xf32>
    %241 = vector.shape_cast %240 : vector<8xf32> to vector<8x1xf32>
    %cst_81 = arith.constant 1.280000e+02 : f32
    %242 = vector.broadcast %cst_81 : f32 to vector<8x1xf32>
    %243 = arith.divf %241, %242 : vector<8x1xf32>
    %244 = vector.broadcast %236 : vector<8x1xf32> to vector<8x128xf32>
    %245 = arith.subf %230, %244 : vector<8x128xf32>
    %cst_82 = arith.constant 9.99999974E-6 : f32
    %246 = vector.broadcast %cst_82 : f32 to vector<8x1xf32>
    %247 = arith.addf %243, %246 : vector<8x1xf32>
    %248 = math.rsqrt %247 : vector<8x1xf32>
    %249 = vector.broadcast %248 : vector<8x1xf32> to vector<8x128xf32>
    %250 = arith.mulf %245, %249 : vector<8x128xf32>
    %251 = vector.broadcast %231 : vector<1x128xf32> to vector<8x128xf32>
    %252 = arith.mulf %250, %251 : vector<8x128xf32>
    %253 = vector.broadcast %232 : vector<1x128xf32> to vector<8x128xf32>
    %254 = arith.addf %252, %253 : vector<8x128xf32>
    %255 = arith.truncf %254 : vector<8x128xf32> to vector<8x128xbf16>
    %c0_83 = arith.constant 0 : index
    %c0_84 = arith.constant 0 : index
    %256 = vector.load %arg17[%c0_83, %c0_84] : memref<128x256xbf16, #tpu.memory_space<vmem>>, vector<128x256xbf16>
    %cst_85 = arith.constant dense<0.000000e+00> : vector<8x256xf32>
    %257 = tpu.matmul %255, %256, %cst_85 {dimension_numbers = #tpu.dot_dimension_numbers<[1], [0], [0], [1], [0, 0, 1, 1], [], []>} : vector<8x128xbf16>, vector<128x256xbf16>, vector<8x256xf32> -> vector<8x256xf32>
    %c0_86 = arith.constant 0 : index
    %c0_87 = arith.constant 0 : index
    %258 = vector.load %arg18[%c0_86, %c0_87] : memref<1x256xf32, #tpu.memory_space<vmem>>, vector<1x256xf32>
    %259 = vector.broadcast %258 : vector<1x256xf32> to vector<8x256xf32>
    %260 = arith.addf %257, %259 : vector<8x256xf32>
    %cst_88 = arith.constant 0.000000e+00 : f32
    %261 = vector.broadcast %cst_88 : f32 to vector<8x256xf32>
    %262 = arith.maximumf %260, %261 : vector<8x256xf32>
    %263 = arith.truncf %262 : vector<8x256xf32> to vector<8x256xbf16>
    %c0_89 = arith.constant 0 : index
    %c0_90 = arith.constant 0 : index
    %264 = vector.load %arg19[%c0_89, %c0_90] : memref<256x128xbf16, #tpu.memory_space<vmem>>, vector<256x128xbf16>
    %cst_91 = arith.constant dense<0.000000e+00> : vector<8x128xf32>
    %265 = tpu.matmul %263, %264, %cst_91 {dimension_numbers = #tpu.dot_dimension_numbers<[1], [0], [0], [1], [0, 0, 1, 1], [], []>} : vector<8x256xbf16>, vector<256x128xbf16>, vector<8x128xf32> -> vector<8x128xf32>
    %c0_92 = arith.constant 0 : index
    %c0_93 = arith.constant 0 : index
    %266 = vector.load %arg20[%c0_92, %c0_93] : memref<1x128xf32, #tpu.memory_space<vmem>>, vector<1x128xf32>
    %267 = vector.broadcast %266 : vector<1x128xf32> to vector<8x128xf32>
    %268 = arith.addf %265, %267 : vector<8x128xf32>
    %269 = arith.addf %254, %268 : vector<8x128xf32>
    %c0_94 = arith.constant 0 : index
    %c0_95 = arith.constant 0 : index
    %270 = vector.load %arg21[%c0_94, %c0_95] : memref<1x128xf32, #tpu.memory_space<vmem>>, vector<1x128xf32>
    %c0_96 = arith.constant 0 : index
    %c0_97 = arith.constant 0 : index
    %271 = vector.load %arg22[%c0_96, %c0_97] : memref<1x128xf32, #tpu.memory_space<vmem>>, vector<1x128xf32>
    %cst_98 = arith.constant dense<0.000000e+00> : vector<8xf32>
    %272 = vector.multi_reduction <add>, %269, %cst_98 [1] : vector<8x128xf32> to vector<8xf32>
    %273 = vector.shape_cast %272 : vector<8xf32> to vector<8x1xf32>
    %cst_99 = arith.constant 1.280000e+02 : f32
    %274 = vector.broadcast %cst_99 : f32 to vector<8x1xf32>
    %275 = arith.divf %273, %274 : vector<8x1xf32>
    %276 = vector.broadcast %275 : vector<8x1xf32> to vector<8x128xf32>
    %277 = arith.subf %269, %276 : vector<8x128xf32>
    %278 = arith.mulf %277, %277 : vector<8x128xf32>
    %cst_100 = arith.constant dense<0.000000e+00> : vector<8xf32>
    %279 = vector.multi_reduction <add>, %278, %cst_100 [1] : vector<8x128xf32> to vector<8xf32>
    %280 = vector.shape_cast %279 : vector<8xf32> to vector<8x1xf32>
    %cst_101 = arith.constant 1.280000e+02 : f32
    %281 = vector.broadcast %cst_101 : f32 to vector<8x1xf32>
    %282 = arith.divf %280, %281 : vector<8x1xf32>
    %283 = vector.broadcast %275 : vector<8x1xf32> to vector<8x128xf32>
    %284 = arith.subf %269, %283 : vector<8x128xf32>
    %cst_102 = arith.constant 9.99999974E-6 : f32
    %285 = vector.broadcast %cst_102 : f32 to vector<8x1xf32>
    %286 = arith.addf %282, %285 : vector<8x1xf32>
    %287 = math.rsqrt %286 : vector<8x1xf32>
    %288 = vector.broadcast %287 : vector<8x1xf32> to vector<8x128xf32>
    %289 = arith.mulf %284, %288 : vector<8x128xf32>
    %290 = vector.broadcast %270 : vector<1x128xf32> to vector<8x128xf32>
    %291 = arith.mulf %289, %290 : vector<8x128xf32>
    %292 = vector.broadcast %271 : vector<1x128xf32> to vector<8x128xf32>
    %293 = arith.addf %291, %292 : vector<8x128xf32>
    %c0_103 = arith.constant 0 : index
    %c0_104 = arith.constant 0 : index
    %c0_105 = arith.constant 0 : index
    %294 = vector.load %arg23[%c0_103, %c0_104, %c0_105] : memref<1x8x128xf32, #tpu.memory_space<vmem>>, vector<1x8x128xf32>
    %295 = vector.shape_cast %294 : vector<1x8x128xf32> to vector<8x128xf32>
    %296 = vector.shape_cast %293 : vector<8x128xf32> to vector<1x8x128xf32>
    tpu.vector_store %arg23[%c0_103, %c0_104, %c0_105], %296 {strides = array<i32>} : memref<1x8x128xf32, #tpu.memory_space<vmem>>, vector<1x8x128xf32>,
    return
  }
  func.func @transform_0(%arg0: i32) -> (i32, i32, i32) {
    %c0_i32 = arith.constant 0 : i32
    %c0_i32_0 = arith.constant 0 : i32
    %c0_i32_1 = arith.constant 0 : i32
    return %arg0, %c0_i32, %c0_i32_0 : i32, i32, i32
  }
  func.func @transform_1(%arg0: i32) -> (i32, i32, i32) {
    %c0_i32 = arith.constant 0 : i32
    %c0_i32_0 = arith.constant 0 : i32
    %c0_i32_1 = arith.constant 0 : i32
    return %arg0, %c0_i32, %c0_i32_0 : i32, i32, i32
  }
  func.func @transform_2(%arg0: i32) -> (i32, i32) {
    %c0_i32 = arith.constant 0 : i32
    %c0_i32_0 = arith.constant 0 : i32
    %c0_i32_1 = arith.constant 0 : i32
    return %c0_i32, %c0_i32_0 : i32, i32
  }
  func.func @transform_3(%arg0: i32) -> (i32, i32) {
    %c0_i32 = arith.constant 0 : i32
    %c0_i32_0 = arith.constant 0 : i32
    %c0_i32_1 = arith.constant 0 : i32
    return %c0_i32, %c0_i32_0 : i32, i32
  }
  func.func @transform_4(%arg0: i32) -> (i32, i32) {
    %c0_i32 = arith.constant 0 : i32
    %c0_i32_0 = arith.constant 0 : i32
    %c0_i32_1 = arith.constant 0 : i32
    return %c0_i32, %c0_i32_0 : i32, i32
  }
  func.func @transform_5(%arg0: i32) -> (i32, i32) {
    %c0_i32 = arith.constant 0 : i32
    %c0_i32_0 = arith.constant 0 : i32
    %c0_i32_1 = arith.constant 0 : i32
    return %c0_i32, %c0_i32_0 : i32, i32
  }
  func.func @transform_6(%arg0: i32) -> (i32, i32) {
    %c0_i32 = arith.constant 0 : i32
    %c0_i32_0 = arith.constant 0 : i32
    %c0_i32_1 = arith.constant 0 : i32
    return %c0_i32, %c0_i32_0 : i32, i32
  }
  func.func @transform_7(%arg0: i32) -> (i32, i32) {
    %c0_i32 = arith.constant 0 : i32
    %c0_i32_0 = arith.constant 0 : i32
    %c0_i32_1 = arith.constant 0 : i32
    return %c0_i32, %c0_i32_0 : i32, i32
  }
  func.func @transform_8(%arg0: i32) -> (i32, i32) {
    %c0_i32 = arith.constant 0 : i32
    %c0_i32_0 = arith.constant 0 : i32
    %c0_i32_1 = arith.constant 0 : i32
    return %c0_i32, %c0_i32_0 : i32, i32
  }
  func.func @transform_9(%arg0: i32) -> (i32, i32) {
    %c0_i32 = arith.constant 0 : i32
    %c0_i32_0 = arith.constant 0 : i32
    %c0_i32_1 = arith.constant 0 : i32
    return %c0_i32, %c0_i32_0 : i32, i32
  }
  func.func @transform_10(%arg0: i32) -> (i32, i32) {
    %c0_i32 = arith.constant 0 : i32
    %c0_i32_0 = arith.constant 0 : i32
    %c0_i32_1 = arith.constant 0 : i32
    return %c0_i32, %c0_i32_0 : i32, i32
  }
  func.func @transform_11(%arg0: i32) -> (i32, i32) {
    %c0_i32 = arith.constant 0 : i32
    %c0_i32_0 = arith.constant 0 : i32
    %c0_i32_1 = arith.constant 0 : i32
    return %c0_i32, %c0_i32_0 : i32, i32
  }
  func.func @transform_12(%arg0: i32) -> (i32, i32) {
    %c0_i32 = arith.constant 0 : i32
    %c0_i32_0 = arith.constant 0 : i32
    %c0_i32_1 = arith.constant 0 : i32
    return %c0_i32, %c0_i32_0 : i32, i32
  }
  func.func @transform_13(%arg0: i32) -> (i32, i32) {
    %c0_i32 = arith.constant 0 : i32
    %c0_i32_0 = arith.constant 0 : i32
    %c0_i32_1 = arith.constant 0 : i32
    return %c0_i32, %c0_i32_0 : i32, i32
  }
  func.func @transform_14(%arg0: i32) -> (i32, i32) {
    %c0_i32 = arith.constant 0 : i32
    %c0_i32_0 = arith.constant 0 : i32
    %c0_i32_1 = arith.constant 0 : i32
    return %c0_i32, %c0_i32_0 : i32, i32
  }
  func.func @transform_15(%arg0: i32) -> (i32, i32) {
    %c0_i32 = arith.constant 0 : i32
    %c0_i32_0 = arith.constant 0 : i32
    %c0_i32_1 = arith.constant 0 : i32
    return %c0_i32, %c0_i32_0 : i32, i32
  }
  func.func @transform_16(%arg0: i32) -> (i32, i32) {
    %c0_i32 = arith.constant 0 : i32
    %c0_i32_0 = arith.constant 0 : i32
    %c0_i32_1 = arith.constant 0 : i32
    return %c0_i32, %c0_i32_0 : i32, i32
  }
  func.func @transform_17(%arg0: i32) -> (i32, i32) {
    %c0_i32 = arith.constant 0 : i32
    %c0_i32_0 = arith.constant 0 : i32
    %c0_i32_1 = arith.constant 0 : i32
    return %c0_i32, %c0_i32_0 : i32, i32
  }
  func.func @transform_18(%arg0: i32) -> (i32, i32) {
    %c0_i32 = arith.constant 0 : i32
    %c0_i32_0 = arith.constant 0 : i32
    %c0_i32_1 = arith.constant 0 : i32
    return %c0_i32, %c0_i32_0 : i32, i32
  }
  func.func @transform_19(%arg0: i32) -> (i32, i32) {
    %c0_i32 = arith.constant 0 : i32
    %c0_i32_0 = arith.constant 0 : i32
    %c0_i32_1 = arith.constant 0 : i32
    return %c0_i32, %c0_i32_0 : i32, i32
  }
  func.func @transform_20(%arg0: i32) -> (i32, i32) {
    %c0_i32 = arith.constant 0 : i32
    %c0_i32_0 = arith.constant 0 : i32
    %c0_i32_1 = arith.constant 0 : i32
    return %c0_i32, %c0_i32_0 : i32, i32
  }
  func.func @transform_21(%arg0: i32) -> (i32, i32) {
    %c0_i32 = arith.constant 0 : i32
    %c0_i32_0 = arith.constant 0 : i32
    %c0_i32_1 = arith.constant 0 : i32
    return %c0_i32, %c0_i32_0 : i32, i32
  }
  func.func @transform_22(%arg0: i32) -> (i32, i32, i32) {
    %c0_i32 = arith.constant 0 : i32
    %c0_i32_0 = arith.constant 0 : i32
    %c0_i32_1 = arith.constant 0 : i32
    return %arg0, %c0_i32, %c0_i32_0 : i32, i32, i32
  }
}

</mosaic_0001>

<bundles_post_ra>
// kernel: transformer_forward.9
= control target key start
LH: loop header
LB: loop body
LE: loop exit
PB: predicated region body
PF: predicated region fallthrough
CT: control target
= control target key end

     0   :  { %s363_s0 = inlined_call_operand.vmem [shape: f32[16,128], index: 0, kind: input, shape index: {}]   ;;  %s364_s1 = inlined_call_operand.vmem [shape: f32[1,128], index: 1, kind: input, shape index: {}]   ;;  %s365_s2 = inlined_call_operand.vmem [shape: f32[1,128], index: 2, kind: input, shape index: {}]   ;;  %s366_s3 = inlined_call_operand.vmem [shape: bf16[128,128], index: 3, kind: input, shape index: {}]   ;;  %s367_s4 = inlined_call_operand.vmem [shape: f32[1,128], index: 4, kind: input, shape index: {}]   ;;  %s368_s5 = inlined_call_operand.hbm [shape: f32[16,128], index: 5, kind: output, shape index: {}]  }
   0x1   :  { %v22_v0 = vld [vmem:[%s363_s0] sm:$0xff]  ;;  %v23_v1 = vld [vmem:[%s363_s0 + $0x8] sm:$0xff] }
   0x2   :  { %26 = vadd.xlane.f32.xlu0 %v22_v0 }
   0x6   :  { %28 = vadd.xlane.f32.xlu0 %v23_v1 }
   0x7   :  { %10 = vsyncpa [#allocation3], 0  ;;  %v241_v2 = vld [vmem:[%s366_s3] sm:$0xff]   ;;  %v277_v3 = vmov 0.0   ;;  %v242_v12 = vld [vmem:[%s366_s3 + $0x8] sm:$0xff]   ;;  %vm278_vm0 = vmmov 0  }
   0x8   :  { %216 = vmatprep.subr.bf16.mxu0 %v277_v3  ;;  %v243_v13 = vld [vmem:[%s366_s3 + $0x10] sm:$0xff]   ;;  %v244_v14 = vld [vmem:[%s366_s3 + $0x18] sm:$0xff]   ;;  %v245_v15 = vld [vmem:[%s366_s3 + $0x20] sm:$0xff]   ;;  %232 = vmatprep.mubr.msk.bf16.mxu0 %vm278_vm0, %v277_v3  ;;  %s279_s17 = smov [#allocation2]  }
   0x9   :  { %217 = vmatpush3.bf16.msra.mxu0 %v241_v2  ;;  %v246_v16 = vld [vmem:[%s366_s3 + $0x28] sm:$0xff]   ;;  %v247_v17 = vld [vmem:[%s366_s3 + $0x30] sm:$0xff]   ;;  %v248_v18 = vld [vmem:[%s366_s3 + $0x38] sm:$0xff]   ;;  %s185_s18 = sshll.u32 %s279_s17, 4  ;;  %s186_s18 = int_to_ptr.vmem [resolvable:$true] %s185_s18 }
   0xa   :  { %218 = vmatprep.subr.bf16.mxu0 %v277_v3  ;;  %v196_v27 = vld [vmem:[%s364_s1] ss:$0 sm:$0xff]  ;;  %s253_s1 = scalar_lea.vmem %s186_s18, 256  ;;  %p258_p1 = scmp.lt.s32.totalorder %s186_s18, %s186_s18 }
   0xb   :  { %v197_v31 = vld [vmem:[%s365_s2] ss:$0 sm:$0xff]  ;;  %p254_p0 = scmp.ne.s32.totalorder %s186_s18, %s253_s1  ;;  %p259_p2 = scmp.lt.s32.totalorder %s253_s1, %s253_s1 }
   0xc   :  { %v198_v36 = vld [vmem:[%s367_s4] ss:$0 sm:$0xff] }
   0xd   :  { %219 = vmatpush3.bf16.msra.mxu0 %v242_v12  ;;  %p260_p3 = por %p259_p2, %p258_p1 }
   0xe   :  { %220 = vmatprep.subr.bf16.mxu0 %v277_v3 }
   0xf   :  { %p261_p4 = pnand %p260_p3, %p254_p0 }
  0x11   :  { %221 = vmatpush3.bf16.msra.mxu0 %v243_v13 }
  0x12   :  { %222 = vmatprep.subr.bf16.mxu0 %v277_v3 }
  0x15   :  { %223 = vmatpush3.bf16.msra.mxu0 %v244_v14 }
  0x16   :  { %224 = vmatprep.subr.bf16.mxu0 %v277_v3 }
  0x19   :  { %225 = vmatpush3.bf16.msra.mxu0 %v245_v15 }
  0x1a   :  { %226 = vmatprep.subr.bf16.mxu0 %v277_v3 }
  0x1d   :  { %227 = vmatpush3.bf16.msra.mxu0 %v246_v16 }
  0x1e   :  { %228 = vmatprep.subr.bf16.mxu0 %v277_v3 }
  0x21   :  { %229 = vmatpush3.bf16.msra.mxu0 %v247_v17 }
  0x22   :  { %230 = vmatprep.subr.bf16.mxu0 %v277_v3 }
  0x25   :  { %231 = vmatpush3.bf16.msra.mxu0 %v248_v18 }
  0x8f   :  { %v27_v4 = vpop.xlane.xlu0 %26 }
  0x90   :  { %v31_v5 = vmul.f32 0.0078125, %v27_v4 }
  0x92   :  { %v33_v6 = vsub.f32 %v22_v0, %v31_v5 }
  0x93   :  { %v29_v7 = vpop.xlane.xlu0 %28 }
  0x94   :  { %v32_v8 = vmul.f32 0.0078125, %v29_v7  ;;  %v35_v9 = vmul.f32 %v33_v6, %v33_v6 }
  0x96   :  { %v34_v10 = vsub.f32 %v23_v1, %v32_v8  ;;  %37 = vadd.xlane.f32.xlu1 %v35_v9 }
  0x98   :  { %v36_v11 = vmul.f32 %v34_v10, %v34_v10 }
  0x9a   :  { %39 = vadd.xlane.f32.xlu1 %v36_v11 }
 0x123   :  { %v38_v19 = vpop.xlane.xlu1 %37 }
 0x124   :  { %v41_v20 = vmul.f32 0.0078125, %v38_v19 }
 0x126   :  { %v43_v21 = vadd.f32 1e-05, %v41_v20 }
 0x127   :  { %v40_v22 = vpop.xlane.xlu1 %39 }
 0x128   :  { %249 = vrsqrt.f32 %v43_v21  ;;  %v42_v23 = vmul.f32 0.0078125, %v40_v22 }
 0x12a   :  { %v44_v24 = vadd.f32 1e-05, %v42_v23 }
 0x12c   :  { %251 = vrsqrt.f32 %v44_v24 }
 0x132   :  { %v250_v25 = vpop.eup %249 }
 0x133   :  { %v47_v26 = vmul.f32 %v250_v25, %v33_v6 }
 0x135   :  { %v55_v30 = vmul.f32 %v196_v27, %v47_v26 }
 0x136   :  { %v252_v28 = vpop.eup %251 }
 0x137   :  { %v48_v29 = vmul.f32 %v252_v28, %v34_v10  ;;  %v63_v33 = vadd.f32 %v197_v31, %v55_v30 }
 0x139   :  { %v56_v32 = vmul.f32 %v196_v27, %v48_v29 }
 0x13b   :  { %v64_v34 = vadd.f32 %v197_v31, %v56_v32 }
 0x13d   :  { %v65_v35 = vpack.c.bf16 %v64_v34, %v63_v33 }
 0x13f   :  { %233 = vmatmul.mubr.bf16.vlgmr.msra.gmra.mrb[0].mxu0 %v65_v35 }
 0x212   :  { %v171_v37 = vpop.f32.mrb[0].mxu0 }
 0x213   :  { %v172_v38 = vadd.f32 %v198_v36, %v171_v37  ;;  %v234_v39 = vpop.f32.mrb[1].mxu0 }
 0x214   :  { %v174_v40 = vpop.f32.mrb[2].mxu0 }
 0x215   :  { %178 = vst [vmem:[#allocation2] sm:$0xff] %v172_v38  ;;  %v175_v41 = vadd.f32 %v198_v36, %v174_v40  ;;  %v235_v42 = vpop.f32.mrb[3].mxu0 }
 0x217   :  { %179 = vst [vmem:[#allocation2 + $0x8] sm:$0xff] %v175_v41 }
 0x218   :  { %264 = shalt.err (!%p261_p4)
}
 0x219   :  { %s265_s19 = scalar_lea.hbm %s368_s5, 256 }
 0x21a   :  { %p266_p5 = scmp.ne.s32.totalorder %s368_s5, %s265_s19  ;;  %p269_p6 = scmp.lt.u32.totalorder %s265_s19, %s368_s5 }
 0x21c   :  { %p271_p7 = pnand %p269_p6, %p266_p5 }
 0x21e   :  { %274 = shalt.err (!%p271_p7)
}
 0x21f   :  { %s280_s0 = smov 128   ;;  %s281_s24 = smov 8  }
 0x220   :  { %191 = dma.vmem_to_hbm [thread:$0]  %s186_s18, 256, %s368_s5, [#allocation3], %s280_s0, %s280_s0, %s281_s24  }
 0x221   :  { %275 = dma.done.wait [#allocation3], 256  }
 0x222   :  { %276 = vsyncadd [#allocation3], 4294967040 }
 0x223   :  { %195 = vsyncpa [#allocation3], 1 }

// kernel: transformer_forward.6
= control target key start
LH: loop header
LB: loop body
LE: loop exit
PB: predicated region body
PF: predicated region fallthrough
CT: control target
= control target key end

     0   :  { %s2405_s18 = smov 0   ;;  %s2810_s0 = inlined_call_operand.vmem [shape: f32[2,16,128], index: 0, kind: input, shape index: {}]   ;;  %s2811_s1 = inlined_call_operand.vmem [shape: bf16[128,384], index: 1, kind: input, shape index: {}]   ;;  %s2812_s2 = inlined_call_operand.vmem [shape: f32[1,384], index: 2, kind: input, shape index: {}]   ;;  %s2813_s3 = inlined_call_operand.vmem [shape: bf16[128,128], index: 3, kind: input, shape index: {}]   ;;  %s2814_s4 = inlined_call_operand.vmem [shape: f32[1,128], index: 4, kind: input, shape index: {}]   ;;  %s2815_s5 = inlined_call_operand.vmem [shape: f32[1,128], index: 5, kind: input, shape index: {}]   ;;  %s2816_s6 = inlined_call_operand.vmem [shape: f32[1,128], index: 6, kind: input, shape index: {}]   ;;  %s2817_s7 = inlined_call_operand.vmem [shape: bf16[128,256], index: 7, kind: input, shape index: {}]   ;;  %s2818_s8 = inlined_call_operand.vmem [shape: f32[1,256], index: 8, kind: input, shape index: {}]   ;;  %s2819_s9 = inlined_call_operand.vmem [shape: bf16[256,128], index: 9, kind: input, shape index: {}]   ;;  %s2820_s10 = inlined_call_operand.vmem [shape: f32[1,128], index: 10, kind: input, shape index: {}]   ;;  %s2821_s11 = inlined_call_operand.vmem [shape: f32[1,128], index: 11, kind: input, shape index: {}]   ;;  %s2822_s12 = inlined_call_operand.vmem [shape: f32[1,128], index: 12, kind: input, shape index: {}]   ;;  %s2823_s13 = inlined_call_operand.vmem [shape: f32[1,128], index: 13, kind: input, shape index: {}]   ;;  %s2824_s14 = inlined_call_operand.vmem [shape: f32[1,128], index: 14, kind: input, shape index: {}]   ;;  %s2825_s15 = inlined_call_operand.vmem [shape: f32[2,16,128], index: 15, kind: output, shape index: {}]  }
   0x1 LB: > { %s1921_s19 = sadd.s32 4294967295, %s2317_s18   ;;  %p1925_p0 = scmp.ge.s32.totalorder %s2317_s18, 1  ;;  %s2317_s18 = sphi %s2405_s18, %s25_s18  }
   0x2   : > { %p437_p1 = scmp.lt.s32.totalorder %s2317_s18, 3 }
   0x4   : > { %p438_p2 = pnand %p1925_p0, %p437_p1 }
   0x5   : > { %v2187_v0 = vld [vmem:[%s2811_s1 + $0x4] ss:$12 sps:$4 sm:$0xff] (!%p438_p2)   ;;  %v2189_v1 = vld [vmem:[%s2811_s1] ss:$12 sps:$4 sm:$0xff] (!%p438_p2)   ;;  %v2319_v2 = vmov (!%p438_p2), 0   ;;  %v2320_v4 = vmov (!%p438_p2), 0.0   ;;  %v533_v29 = vlaneseq (!%p438_p2) }
   0x6   : > { %441 = sbr.rel (%p438_p2) target bundleno = 3303 (0xce7), region = 80  ;;  %708 = vmatprep.mubr.bf16.mxu0 (!%p438_p2), %v2319_v2  ;;  %676 = vmatprep.subr.bf16.mxu0 (!%p438_p2), %v2187_v0  ;;  %v2190_v3 = vld [vmem:[%s2811_s1 + $0x1c] ss:$12 sps:$4 sm:$0xff] (!%p438_p2)   ;;  %v2192_v5 = vld [vmem:[%s2811_s1 + $0x18] ss:$12 sps:$4 sm:$0xff] (!%p438_p2)   ;;  %p485_p3 = scmp.lt.s32.totalorder (!%p438_p2), %s1921_s19, 1 }
   0x7   : > { %2070 = vmatprep.subr.bf16.mxu1 (!%p438_p2), %v2320_v4  ;;  %677 = vmatpush1.bf16.msra.mxu0 (!%p438_p2), %v2189_v1  ;;  %v2193_v6 = vld [vmem:[%s2811_s1 + $0x34] ss:$12 sps:$4 sm:$0xff] (!%p438_p2)   ;;  %v2195_v7 = vld [vmem:[%s2811_s1 + $0x30] ss:$12 sps:$4 sm:$0xff] (!%p438_p2)   ;;  %v2196_v8 = vld [vmem:[%s2811_s1 + $0x4c] ss:$12 sps:$4 sm:$0xff] (!%p438_p2)  }
   0x8   : > { %678 = vmatprep.subr.bf16.mxu0 (!%p438_p2), %v2190_v3  ;;  %v2198_v9 = vld [vmem:[%s2811_s1 + $0x48] ss:$12 sps:$4 sm:$0xff] (!%p438_p2)   ;;  %v2199_v10 = vld [vmem:[%s2811_s1 + $0x64] ss:$12 sps:$4 sm:$0xff] (!%p438_p2)   ;;  %v2212_v12 = vld [vmem:[%s2811_s1 + $0x20] ss:$12 sps:$4 sm:$0xff] (!%p438_p2)  }
   0x9   : > { %v2211_v11 = vld [vmem:[%s2811_s1 + $0x8] ss:$12 sps:$4 sm:$0xff] (!%p438_p2)   ;;  %v2201_v13 = vld [vmem:[%s2811_s1 + $0x60] ss:$12 sps:$4 sm:$0xff] (!%p438_p2)   ;;  %v2204_v15 = vld [vmem:[%s2811_s1 + $0x78] ss:$12 sps:$4 sm:$0xff] (!%p438_p2)  }
   0xa   : > { %2071 = vmatpush3.bf16.msra.mxu1 (!%p438_p2), %v2211_v11  ;;  %v2202_v14 = vld [vmem:[%s2811_s1 + $0x7c] ss:$12 sps:$4 sm:$0xff] (!%p438_p2)   ;;  %v2205_v16 = vld [vmem:[%s2811_s1 + $0x94] ss:$12 sps:$4 sm:$0xff] (!%p438_p2)   ;;  %v2213_v17 = vld [vmem:[%s2811_s1 + $0x38] ss:$12 sps:$4 sm:$0xff] (!%p438_p2)  }
   0xb   : > { %679 = vmatpush1.bf16.msra.mxu0 (!%p438_p2), %v2192_v5  ;;  %2072 = vmatprep.subr.bf16.mxu1 (!%p438_p2), %v2320_v4  ;;  %v2214_v18 = vld [vmem:[%s2811_s1 + $0x50] ss:$12 sps:$4 sm:$0xff] (!%p438_p2)   ;;  %v2208_v20 = vld [vmem:[%s2811_s1 + $0xac] ss:$12 sps:$4 sm:$0xff] (!%p438_p2)   ;;  %v2215_v21 = vld [vmem:[%s2811_s1 + $0x68] ss:$12 sps:$4 sm:$0xff] (!%p438_p2)  }
   0xc   : > { %680 = vmatprep.subr.bf16.mxu0 (!%p438_p2), %v2193_v6  ;;  %v2207_v19 = vld [vmem:[%s2811_s1 + $0x90] ss:$12 sps:$4 sm:$0xff] (!%p438_p2)   ;;  %v2210_v22 = vld [vmem:[%s2811_s1 + $0xa8] ss:$12 sps:$4 sm:$0xff] (!%p438_p2)   ;;  %v2216_v25 = vld [vmem:[%s2811_s1 + $0x80] ss:$12 sps:$4 sm:$0xff] (!%p438_p2)  }
   0xd   : > { %s2827_s19 = smov (!%p485_p3, %s1921_s19), 1  ;;  %v2217_v27 = vld [vmem:[%s2811_s1 + $0x98] ss:$12 sps:$4 sm:$0xff]   ;;  %v2218_v28 = vld [vmem:[%s2811_s1 + $0xb0] ss:$12 sps:$4 sm:$0xff]   ;;  %vm2321_vm0 = vmmov 0  }
   0xe   : > { %s2012_s27 = sshll.u32 %s2827_s19, 4  ;;  %2073 = vmatpush3.bf16.msra.mxu1 %v2212_v12  ;;  %2086 = vmatprep.mubr.msk.bf16.mxu1 %vm2321_vm0, %v2320_v4  ;;  %v2516_v30 = vshrl.u32 %v533_v29, 7  ;;  %v531_v32 = vld [vmem:[%s2812_s2] sm:$0x7]  ;;  %vm763_vm1 = vcmask 261120   ;;  %v2537_v56 = vand.u32 127, %v533_v29 }
   0xf   : > { %681 = vmatpush1.bf16.msra.mxu0 %v2195_v7  ;;  %2074 = vmatprep.subr.bf16.mxu1 %v2320_v4  ;;  %s489_s23 = scalar_lea.vmem %s2810_s0, %s2012_s27  ;;  %vm820_vm3 = vcmask 130048   ;;  %s2322_s24 = smov 96   ;;  %vm1286_vm5 = vcmask 523264   ;;  %vm1289_vm6 = vcmask 785408  }
  0x10   : > { %682 = vmatprep.subr.bf16.mxu0 %v2196_v8  ;;  %v2489_v23 = vld [vmem:[%s489_s23] sm:$0xff]  ;;  %v2491_v24 = vld [vmem:[%s489_s23 + $0x8] sm:$0xff]  ;;  %v535_v31 = vsub.s32 0, %v2516_v30  ;;  %v539_v33 = vsub.s32 1, %v2516_v30  ;;  %v543_v47 = vsub.s32 2, %v2516_v30  ;;  %v2540_v57 = vadd.s32 8, %v2516_v30 }
  0x11   : > { %v498_v26 = vpack.c.bf16 %v2491_v24, %v2489_v23  ;;  %vm816_vm2 = vcmp.le.s32.totalorder %v2537_v56, %v2516_v30  ;;  %s2323_s25 = smov 32   ;;  %s2324_s26 = smov 64   ;;  %v1989_v30 = vld [vmem:[%s2820_s10] ss:$0 sm:$0xff] }
  0x12   : > { %2075 = vmatpush3.bf16.msra.mxu1 %v2213_v17  ;;  %v536_v34 = vrot.slane %v531_v32, %v535_v31  ;;  %v540_v36 = vrot.slane %v531_v32, %v539_v33  ;;  %v544_v48 = vrot.slane %v531_v32, %v543_v47  ;;  %vm817_vm4 = vcmp.le.s32.totalorder %v2537_v56, %v2540_v57 }
  0x13   : > { %683 = vmatpush1.bf16.msra.mxu0 %v2198_v9  ;;  %2076 = vmatprep.subr.bf16.mxu1 %v2320_v4 }
  0x14   : > { %684 = vmatprep.subr.bf16.mxu0 %v2199_v10 }
  0x16   : > { %2077 = vmatpush3.bf16.msra.mxu1 %v2214_v18 }
  0x17   : > { %685 = vmatpush1.bf16.msra.mxu0 %v2201_v13  ;;  %2078 = vmatprep.subr.bf16.mxu1 %v2320_v4 }
  0x18   : > { %686 = vmatprep.subr.bf16.mxu0 %v2202_v14 }
  0x1a   : > { %2079 = vmatpush3.bf16.msra.mxu1 %v2215_v21 }
  0x1b   : > { %687 = vmatpush1.bf16.msra.mxu0 %v2204_v15  ;;  %2080 = vmatprep.subr.bf16.mxu1 %v2320_v4 }
  0x1c   : > { %688 = vmatprep.subr.bf16.mxu0 %v2205_v16 }
  0x1e   : > { %2081 = vmatpush3.bf16.msra.mxu1 %v2216_v25 }
  0x1f   : > { %689 = vmatpush1.bf16.msra.mxu0 %v2207_v19  ;;  %2082 = vmatprep.subr.bf16.mxu1 %v2320_v4 }
  0x20   : > { %690 = vmatprep.subr.bf16.mxu0 %v2208_v20 }
  0x22   : > { %2083 = vmatpush3.bf16.msra.mxu1 %v2217_v27 }
  0x23   : > { %691 = vmatpush1.bf16.msra.mxu0 %v2210_v22  ;;  %2084 = vmatprep.subr.bf16.mxu1 %v2320_v4 }
  0x24   : > { %2114 = vmatprep.subr.bf16.mxu0 %v2320_v4 }
  0x26   : > { %709 = vmatmul.mubr.bf16.vlgmr.msra.gmra.mrb[0].mxu0 %v498_v26  ;;  %2085 = vmatpush3.bf16.msra.mxu1 %v2218_v28 }
  0x27   : > { %2090 = vmatprep.subr.bf16.mxu1 %v2320_v4  ;;  %2116 = vmatprep.mubr.msk.bf16.mxu0 %vm2321_vm0, %v2320_v4 }
  0x29   : > { %2087 = vmatmul.mubr.bf16.vlgmr.msra.gmra.mrb[0].mxu1 %v498_v26 }
  0x2a   : > { %2092 = vmatprep.mubr.msk.bf16.mxu1 %vm2321_vm0, %v2320_v4 }
  0xf9   : > { %v710_v35 = vpop.f32.mrb[0].mxu0 }
  0xfa   : > { %v712_v37 = vpop.f32.mrb[1].mxu0  ;;  %v711_v39 = vadd.f32 %v710_v35, %v536_v34 }
  0xfb   : > { %v714_v38 = vpop.f32.mrb[2].mxu0  ;;  %v713_v42 = vadd.f32 %v712_v37, %v540_v36 }
  0xfc   : > { %v715_v40 = vadd.f32 %v714_v38, %v536_v34  ;;  %v716_v41 = vpop.f32.mrb[3].mxu0  ;;  %v753_v49 = vpop.f32.mrb[0].mxu1 }
  0xfd   : > { %v717_v43 = vadd.f32 %v716_v41, %v540_v36  ;;  %v754_v50 = vadd.f32 %v753_v49, %v544_v48  ;;  %v2088_v51 = vpop.f32.mrb[1].mxu1 }
  0xfe   : > { %v760_v44 = vpack.c.bf16 %v715_v40, %v711_v39  ;;  %v756_v52 = vpop.f32.mrb[2].mxu1 }
  0xff   : > { %v761_v45 = vpack.c.bf16 %v717_v43, %v713_v42  ;;  %v757_v53 = vadd.f32 %v756_v52, %v544_v48  ;;  %v2089_v54 = vpop.f32.mrb[3].mxu1 }
 0x101   : > { %v768_v46 = vsel %vm763_vm1, %v761_v45, 0  ;;  %v2533_v55 = vpack.c.bf16 %v757_v53, %v754_v50 }
 0x102   : > { %2091 = vmatpush3.bf16.xpose.msra.mxu1 %v768_v46 }
 0x103   : > { %2096 = vmatprep.subr.bf16.mxu1 %v2320_v4 }
 0x109   : > { %2093 = vmatmul.mubr.msk.bf16.vlgmr.msra.gmra.mrb[4].mxu1 %vm763_vm1, %v760_v44 }
 0x10a   : > { %2098 = vmatprep.mubr.msk.bf16.mxu1 %vm2321_vm0, %v2320_v4  ;;  %2097 = vmatpush3.bf16.msra.mxu1 %v2533_v55 }
 0x10b   : > { %2102 = vmatprep.subr.bf16.mxu1 %v2320_v4 }
 0x1dc   : > { %v804_v58 = vpop.f32.mrb[4].mxu1 }
 0x1dd   : > { %v818_v59 = vsel %vm816_vm2, %v804_v58, -1e+30  ;;  %v2094_v60 = vpop.f32.mrb[5].mxu1 }
 0x1de   : > { %v807_v61 = vpop.f32.mrb[6].mxu1  ;;  %v821_v62 = vsel %vm820_vm3, %v818_v59, -inf }
 0x1df   : > { %v819_v63 = vsel %vm817_vm4, %v807_v61, -1e+30  ;;  %822 = vmax.xlane.f32.xlu0 %v821_v62  ;;  %v2095_v0 = vpop.f32.mrb[7].mxu1 }
 0x1e0   : > { %v824_v1 = vsel %vm820_vm3, %v819_v63, -inf }
 0x1e3   : > { %825 = vmax.xlane.f32.xlu0 %v824_v1 }
 0x1f9   : > { %892 = vrot.lane.b32.xlu0 %v761_v45, %s2322_s24 }
 0x1fd   : > { %1139 = vrot.lane.b32.xlu0 %v761_v45, %s2323_s25 }
 0x26c   : > { %v823_v3 = vpop.xlane.xlu0 %822 }
 0x26d   : > { %v827_v5 = vsub.f32 %v818_v59, %v823_v3 }
 0x26f   : > { %v829_v6 = vmul.f32 1.442695, %v827_v5 }
 0x270   : > { %v826_v7 = vpop.xlane.xlu0 %825 }
 0x271   : > { %2267 = vpow2.f32 %v829_v6  ;;  %v828_v8 = vsub.f32 %v819_v63, %v826_v7 }
 0x273   : > { %v831_v9 = vmul.f32 1.442695, %v828_v8 }
 0x274   : > { %v893_v17 = vpop.permute.xlu0 %892 }
 0x275   : > { %2269 = vpow2.f32 %v831_v9  ;;  %v898_v28 = vsel %vm763_vm1, %v893_v17, 0 }
 0x278   : > { %v1140_v26 = vpop.permute.xlu0 %1139 }
 0x279   : > { %v1145_v32 = vsel %vm763_vm1, %v1140_v26, 0 }
 0x27b   : > { %v2268_v10 = vpop.eup %2267 }
 0x27c   : > { %v833_v11 = vsel %vm820_vm3, %v2268_v10, 0.0 }
 0x27d   : > { %834 = vadd.xlane.f32.xlu1 %v833_v11 }
 0x27f   : > { %v2270_v12 = vpop.eup %2269 }
 0x280   : > { %v836_v13 = vsel %vm820_vm3, %v2270_v12, 0.0 }
 0x281   : > { %837 = vadd.xlane.f32.xlu1 %v836_v13 }
 0x292   : > { %889 = vrot.lane.b32.xlu1 %v760_v44, %s2322_s24 }
 0x296   : > { %1016 = vrot.lane.b32.xlu1 %v761_v45, %s2324_s26 }
 0x29a   : > { %1014 = vrot.lane.b32.xlu1 %v760_v44, %s2324_s26 }
 0x29e   : > { %1137 = vrot.lane.b32.xlu1 %v760_v44, %s2323_s25 }
 0x30a   : > { %v835_v14 = vpop.xlane.xlu1 %834 }
 0x30b   : > { %2271 = vrcp.f32 %v835_v14 }
 0x30e   : > { %v838_v15 = vpop.xlane.xlu1 %837 }
 0x30f   : > { %2273 = vrcp.f32 %v838_v15 }
 0x312   : > { %v890_v16 = vpop.permute.xlu1 %889 }
 0x315   : > { %v2272_v19 = vpop.eup %2271 }
 0x316   : > { %v1017_v18 = vpop.permute.xlu1 %1016  ;;  %v840_v22 = vmul.f32 %v2272_v19, %v2268_v10 }
 0x317   : > { %v1022_v20 = vsel %vm763_vm1, %v1017_v18, 0 }
 0x318   : > { %2115 = vmatpush3.bf16.xpose.msra.mxu0 %v1022_v20 }
 0x319   : > { %v2274_v21 = vpop.eup %2273  ;;  %2126 = vmatprep.subr.bf16.mxu0 %v2320_v4 }
 0x31a   : > { %v842_v25 = vmul.f32 %v2274_v21, %v2270_v12  ;;  %v1015_v29 = vpop.permute.xlu1 %1014 }
 0x31c   : > { %v843_v27 = vpack.c.bf16 %v842_v25, %v840_v22 }
 0x31e   : > { %2099 = vmatmul.mubr.msk.bf16.vlgmr.msra.gmra.mrb[8].mxu1 %vm820_vm3, %v843_v27  ;;  %v1138_v34 = vpop.permute.xlu1 %1137 }
 0x31f   : > { %2103 = vmatpush3.bf16.xpose.msra.mxu1 %v898_v28  ;;  %2117 = vmatmul.mubr.msk.bf16.vlgmr.msra.gmra.mrb[4].mxu0 %vm763_vm1, %v1015_v29 }
 0x320   : > { %2127 = vmatpush3.bf16.xpose.msra.mxu0 %v1145_v32  ;;  %2104 = vmatprep.mubr.msk.bf16.mxu1 %vm2321_vm0, %v2320_v4 }
 0x321   : > { %2128 = vmatprep.mubr.msk.bf16.mxu0 %vm2321_vm0, %v2320_v4  ;;  %2108 = vmatprep.subr.bf16.mxu1 %v2320_v4 }
 0x322   : > { %2138 = vmatprep.subr.bf16.mxu0 %v2320_v4 }
 0x326   : > { %2105 = vmatmul.mubr.msk.bf16.vlgmr.msra.gmra.mrb[12].mxu1 %vm763_vm1, %v890_v16 }
 0x327   : > { %2129 = vmatmul.mubr.msk.bf16.vlgmr.msra.gmra.mrb[8].mxu0 %vm763_vm1, %v1138_v34  ;;  %2110 = vmatprep.mubr.msk.bf16.mxu1 %vm2321_vm0, %v2320_v4 }
 0x328   : > { %2154 = vmatprep.mubr.msk.bf16.mxu0 %vm2321_vm0, %v2320_v4 }
 0x3f1   : > { %v2580_v35 = vpop.f32.mrb[8].mxu1 }
 0x3f2   : > { %v2100_v36 = vpop.f32.mrb[9].mxu1  ;;  %v1058_v37 = vpop.f32.mrb[4].mxu0 }
 0x3f3   : > { %v2582_v38 = vpop.f32.mrb[10].mxu1  ;;  %v2118_v39 = vpop.f32.mrb[5].mxu0  ;;  %v1065_v50 = vsel %vm816_vm2, %v1058_v37, -1e+30 }
 0x3f4   : > { %v2101_v40 = vpop.f32.mrb[11].mxu1  ;;  %v1061_v41 = vpop.f32.mrb[6].mxu0  ;;  %v1067_v60 = vsel %vm820_vm3, %v1065_v50, -inf }
 0x3f5   : > { %v2119_v42 = vpop.f32.mrb[7].mxu0  ;;  %v1066_v61 = vsel %vm817_vm4, %v1061_v41, -1e+30 }
 0x3f6   : > { %v1070_v63 = vsel %vm820_vm3, %v1066_v61, -inf }
 0x3f9   : > { %v934_v43 = vpop.f32.mrb[12].mxu1 }
 0x3fa   : > { %v941_v44 = vsel %vm816_vm2, %v934_v43, -1e+30  ;;  %v2106_v45 = vpop.f32.mrb[13].mxu1  ;;  %v1181_v46 = vpop.f32.mrb[8].mxu0 }
 0x3fb   : > { %v937_v47 = vpop.f32.mrb[14].mxu1  ;;  %v2130_v48 = vpop.f32.mrb[9].mxu0  ;;  %v943_v49 = vsel %vm820_vm3, %v941_v44, -inf  ;;  %v1188_v0 = vsel %vm816_vm2, %v1181_v46, -1e+30 }
 0x3fc   : > { %v942_v51 = vsel %vm817_vm4, %v937_v47, -1e+30  ;;  %v1184_v52 = vpop.f32.mrb[10].mxu0  ;;  %944 = vmax.xlane.f32.xlu0 %v943_v49  ;;  %v2107_v53 = vpop.f32.mrb[15].mxu1  ;;  %v1190_v1 = vsel %vm820_vm3, %v1188_v0, -inf }
 0x3fd   : > { %v2131_v54 = vpop.f32.mrb[11].mxu0  ;;  %v946_v58 = vsel %vm820_vm3, %v942_v51, -inf  ;;  %v1189_v59 = vsel %vm817_vm4, %v1184_v52, -1e+30 }
 0x3fe   : > { %947 = vmax.xlane.f32.xlu1 %v946_v58  ;;  %v1193_v62 = vsel %vm820_vm3, %v1189_v59, -inf }
 0x400   : > { %1068 = vmax.xlane.f32.xlu0 %v1067_v60 }
 0x402   : > { %1194 = vmax.xlane.f32.xlu1 %v1193_v62 }
 0x404   : > { %1071 = vmax.xlane.f32.xlu0 %v1070_v63 }
 0x408   : > { %1191 = vmax.xlane.f32.xlu0 %v1190_v1  ;;  %v2219_v1 = vld [vmem:[%s2813_s3] sm:$0xff]  }
 0x409   : > { %2139 = vmatpush3.bf16.msra.mxu0 %v2219_v1  ;;  %v2233_v1 = vld [vmem:[%s2817_s7 + $0x20] ss:$8 sps:$4 sm:$0xff]  }
 0x40a   : > { %2140 = vmatprep.subr.bf16.mxu0 %v2320_v4 }
 0x489   : > { %v945_v3 = vpop.xlane.xlu0 %944 }
 0x48a   : > { %v949_v12 = vsub.f32 %v941_v44, %v945_v3  ;;  %v2220_v3 = vld [vmem:[%s2813_s3 + $0x8] sm:$0xff]  }
 0x48b   : > { %v948_v5 = vpop.xlane.xlu1 %947  ;;  %2141 = vmatpush3.bf16.msra.mxu0 %v2220_v3  ;;  %v2238_v3 = vld [vmem:[%s2817_s7 + $0x34] ss:$8 sps:$4 sm:$0xff]  }
 0x48c   : > { %v950_v13 = vsub.f32 %v942_v51, %v948_v5  ;;  %v951_v17 = vmul.f32 1.442695, %v949_v12  ;;  %v2221_v5 = vld [vmem:[%s2813_s3 + $0x10] sm:$0xff]   ;;  %2142 = vmatprep.subr.bf16.mxu0 %v2320_v4 }
 0x48d   : > { %v1069_v6 = vpop.xlane.xlu0 %1068  ;;  %v2225_v12 = vld [vmem:[%s2813_s3 + $0x30] sm:$0xff]  }
 0x48e   : > { %v1073_v7 = vsub.f32 %v1065_v50, %v1069_v6  ;;  %v953_v18 = vmul.f32 1.442695, %v950_v13  ;;  %v2223_v6 = vld [vmem:[%s2813_s3 + $0x20] sm:$0xff]  }
 0x48f   : > { %v1195_v57 = vpop.xlane.xlu1 %1194  ;;  %2143 = vmatpush3.bf16.msra.mxu0 %v2221_v5  ;;  %v2236_v5 = vld [vmem:[%s2817_s7 + $0x30] ss:$8 sps:$4 sm:$0xff]  }
 0x490   : > { %v1075_v8 = vmul.f32 1.442695, %v1073_v7  ;;  %v1197_v9 = vsub.f32 %v1189_v59, %v1195_v57  ;;  %2144 = vmatprep.subr.bf16.mxu0 %v2320_v4 }
 0x491   : > { %v1072_v10 = vpop.xlane.xlu0 %1071 }
 0x492   : > { %2275 = vpow2.f32 %v1075_v8  ;;  %v1074_v11 = vsub.f32 %v1066_v61, %v1072_v10  ;;  %v1200_v14 = vmul.f32 1.442695, %v1197_v9  ;;  %v2224_v8 = vld [vmem:[%s2813_s3 + $0x28] sm:$0xff]  }
 0x494   : > { %v1077_v15 = vmul.f32 1.442695, %v1074_v11 }
 0x495   : > { %v1192_v56 = vpop.xlane.xlu0 %1191 }
 0x496   : > { %2277 = vpow2.f32 %v1077_v15  ;;  %v1196_v16 = vsub.f32 %v1188_v0, %v1192_v56  ;;  %v2226_v15 = vld [vmem:[%s2813_s3 + $0x38] sm:$0xff]  }
 0x497   : > { %2279 = vpow2.f32 %v1200_v14 }
 0x498   : > { %v1198_v19 = vmul.f32 1.442695, %v1196_v16 }
 0x49a   : > { %2281 = vpow2.f32 %v1198_v19 }
 0x49b   : > { %2283 = vpow2.f32 %v951_v17 }
 0x49c   : > { %v2276_v20 = vpop.eup %2275  ;;  %2285 = vpow2.f32 %v953_v18 }
 0x49d   : > { %v1079_v21 = vsel %vm820_vm3, %v2276_v20, 0.0 }
 0x49e   : > { %1080 = vadd.xlane.f32.xlu0 %v1079_v21 }
 0x4a0   : > { %v2278_v22 = vpop.eup %2277 }
 0x4a1   : > { %v1082_v25 = vsel %vm820_vm3, %v2278_v22, 0.0  ;;  %v2280_v26 = vpop.eup %2279 }
 0x4a2   : > { %1083 = vadd.xlane.f32.xlu1 %v1082_v25  ;;  %v1205_v32 = vsel %vm820_vm3, %v2280_v26, 0.0 }
 0x4a4   : > { %v2282_v27 = vpop.eup %2281 }
 0x4a5   : > { %v2284_v28 = vpop.eup %2283  ;;  %v1202_v29 = vsel %vm820_vm3, %v2282_v27, 0.0 }
 0x4a6   : > { %v2286_v34 = vpop.eup %2285  ;;  %1203 = vadd.xlane.f32.xlu0 %v1202_v29  ;;  %1206 = vadd.xlane.f32.xlu1 %v1205_v32  ;;  %v955_v36 = vsel %vm820_vm3, %v2284_v28, 0.0 }
 0x4a7   : > { %v958_v37 = vsel %vm820_vm3, %v2286_v34, 0.0 }
 0x4aa   : > { %956 = vadd.xlane.f32.xlu0 %v955_v36  ;;  %959 = vadd.xlane.f32.xlu1 %v958_v37 }
 0x4bb   : > { %1090 = vrot.lane.b32.xlu1 %v2533_v55, %s2324_s26 }
 0x4bf   : > { %1213 = vrot.lane.b32.xlu1 %v2533_v55, %s2323_s25 }
 0x4c0   : > { %967 = vrot.lane.b32.xlu0 %v2533_v55, %s2322_s24 }
 0x52b   : > { %v1081_v39 = vpop.xlane.xlu0 %1080 }
 0x52f   : > { %v1084_v40 = vpop.xlane.xlu1 %1083 }
 0x533   : > { %v1204_v41 = vpop.xlane.xlu0 %1203  ;;  %v1207_v42 = vpop.xlane.xlu1 %1206 }
 0x537   : > { %v957_v43 = vpop.xlane.xlu0 %956  ;;  %v960_v44 = vpop.xlane.xlu1 %959 }
 0x538   : > { %2287 = vrcp.f32 %v957_v43 }
 0x539   : > { %2289 = vrcp.f32 %v960_v44 }
 0x53a   : > { %2291 = vrcp.f32 %v1084_v40 }
 0x53b   : > { %v968_v45 = vpop.permute.xlu0 %967  ;;  %2293 = vrcp.f32 %v1081_v39  ;;  %v1091_v51 = vpop.permute.xlu1 %1090 }
 0x53c   : > { %2109 = vmatpush3.bf16.msra.mxu1 %v968_v45  ;;  %2295 = vrcp.f32 %v1204_v41  ;;  %v1962_v45 = vld [vmem:[%s2814_s4] ss:$0 sm:$0xff] }
 0x53d   : > { %2120 = vmatprep.subr.bf16.mxu1 %v2320_v4  ;;  %2297 = vrcp.f32 %v1207_v42 }
 0x53f   : > { %v1214_v61 = vpop.permute.xlu1 %1213 }
 0x542   : > { %v2288_v46 = vpop.eup %2287 }
 0x543   : > { %v2290_v47 = vpop.eup %2289  ;;  %v962_v48 = vmul.f32 %v2288_v46, %v2284_v28 }
 0x544   : > { %v964_v49 = vmul.f32 %v2290_v47, %v2286_v34  ;;  %v2292_v50 = vpop.eup %2291 }
 0x545   : > { %v2294_v52 = vpop.eup %2293  ;;  %v1088_v53 = vmul.f32 %v2292_v50, %v2278_v22 }
 0x546   : > { %v965_v55 = vpack.c.bf16 %v964_v49, %v962_v48  ;;  %v1086_v54 = vmul.f32 %v2294_v52, %v2276_v20  ;;  %v2296_v58 = vpop.eup %2295  ;;  %v2229_v52 = vld [vmem:[%s2817_s7 + $0x4] ss:$8 sps:$4 sm:$0xff]  }
 0x547   : > { %v2298_v60 = vpop.eup %2297  ;;  %v1209_v62 = vmul.f32 %v2296_v58, %v2282_v27 }
 0x548   : > { %2111 = vmatmul.mubr.msk.bf16.vlgmr.msra.gmra.mrb[16].mxu1 %vm820_vm3, %v965_v55  ;;  %v1089_v59 = vpack.c.bf16 %v1088_v53, %v1086_v54  ;;  %v1211_v63 = vmul.f32 %v2298_v60, %v2280_v26  ;;  %v2232_v53 = vld [vmem:[%s2817_s7 + $0x14] ss:$8 sps:$4 sm:$0xff]  }
 0x549   : > { %2121 = vmatpush3.bf16.msra.mxu1 %v1091_v51  ;;  %2122 = vmatprep.mubr.msk.bf16.mxu1 %vm2321_vm0, %v2320_v4  ;;  %v2227_v51 = vld [vmem:[%s2817_s7] ss:$8 sps:$4 sm:$0xff]  }
 0x54a   : > { %2132 = vmatprep.subr.bf16.mxu1 %v2320_v4  ;;  %v1212_v0 = vpack.c.bf16 %v1211_v63, %v1209_v62 }
 0x550   : > { %2123 = vmatmul.mubr.msk.bf16.vlgmr.msra.gmra.mrb[20].mxu1 %vm820_vm3, %v1089_v59 }
 0x551   : > { %2133 = vmatpush3.bf16.msra.mxu1 %v1214_v61  ;;  %2134 = vmatprep.mubr.msk.bf16.mxu1 %vm2321_vm0, %v2320_v4 }
 0x552   : > { %1557 = vmatprep.subr.bf16.mxu1 %v2229_v52 }
 0x558   : > { %2135 = vmatmul.mubr.msk.bf16.vlgmr.msra.gmra.mrb[24].mxu1 %vm820_vm3, %v1212_v0  ;;  %v2235_v0 = vld [vmem:[%s2817_s7 + $0x24] ss:$8 sps:$4 sm:$0xff]  }
 0x559   : > { %1589 = vmatprep.mubr.bf16.mxu1 %v2319_v2  ;;  %v2222_v2 = vld [vmem:[%s2813_s3 + $0x18] sm:$0xff]   ;;  %1558 = vmatpush1.bf16.msra.mxu1 %v2227_v51 }
 0x55a   : > { %2145 = vmatpush3.bf16.msra.mxu0 %v2222_v2  ;;  %1559 = vmatprep.subr.bf16.mxu1 %v2232_v53  ;;  %v2241_v2 = vld [vmem:[%s2817_s7 + $0x44] ss:$8 sps:$4 sm:$0xff]  }
 0x55b   : > { %2146 = vmatprep.subr.bf16.mxu0 %v2320_v4 }
 0x55e   : > { %2147 = vmatpush3.bf16.msra.mxu0 %v2223_v6  ;;  %v2239_v6 = vld [vmem:[%s2817_s7 + $0x40] ss:$8 sps:$4 sm:$0xff]  }
 0x55f   : > { %2148 = vmatprep.subr.bf16.mxu0 %v2320_v4 }
 0x562   : > { %2149 = vmatpush3.bf16.msra.mxu0 %v2224_v8  ;;  %v2247_v8 = vld [vmem:[%s2817_s7 + $0x64] ss:$8 sps:$4 sm:$0xff]  }
 0x563   : > { %2150 = vmatprep.subr.bf16.mxu0 %v2320_v4 }
 0x566   : > { %2151 = vmatpush3.bf16.msra.mxu0 %v2225_v12  ;;  %v2251_v12 = vld [vmem:[%s2819_s9 + $0x40] sm:$0xff]  }
 0x567   : > { %2152 = vmatprep.subr.bf16.mxu0 %v2320_v4 }
 0x56a   : > { %2153 = vmatpush3.bf16.msra.mxu0 %v2226_v15  ;;  %v2254_v15 = vld [vmem:[%s2819_s9 + $0x8] sm:$0xff]  }
 0x56b   : > { %2048 = vmatprep.subr.bf16.mxu0 %v2251_v12 }
 0x61b   : > { %v1007_v7 = vpop.f32.mrb[16].mxu1 }
 0x61c   : > { %v2112_v57 = vpop.f32.mrb[17].mxu1 }
 0x61d   : > { %v1010_v9 = vpop.f32.mrb[18].mxu1  ;;  %v2242_v57 = vld [vmem:[%s2817_s7 + $0x50] ss:$8 sps:$4 sm:$0xff]  }
 0x61e   : > { %v2172_v10 = vpack.i.bf16 %v1010_v9, %v1007_v7  ;;  %v2113_v11 = vpop.f32.mrb[19].mxu1  ;;  %v2244_v7 = vld [vmem:[%s2817_s7 + $0x54] ss:$8 sps:$4 sm:$0xff]   ;;  %v2245_v9 = vld [vmem:[%s2817_s7 + $0x60] ss:$8 sps:$4 sm:$0xff]  }
 0x61f   : > { %v2248_v11 = vld [vmem:[%s2817_s7 + $0x70] ss:$8 sps:$4 sm:$0xff]  }
 0x620   : > { %2173 = vrot.lane.b32.xlu1 %v2172_v10, %s2323_s25  ;;  %v2250_v10 = vld [vmem:[%s2817_s7 + $0x74] ss:$8 sps:$4 sm:$0xff]  }
 0x623   : > { %v1130_v13 = vpop.f32.mrb[20].mxu1 }
 0x624   : > { %v2124_v14 = vpop.f32.mrb[21].mxu1 }
 0x625   : > { %v1133_v56 = vpop.f32.mrb[22].mxu1  ;;  %v2253_v14 = vld [vmem:[%s2819_s9 + $0x48] sm:$0xff]  }
 0x626   : > { %v2177_v16 = vpack.i.bf16 %v1133_v56, %v1130_v13  ;;  %v2125_v17 = vpop.f32.mrb[23].mxu1  ;;  %v2252_v13 = vld [vmem:[%s2819_s9] sm:$0xff]   ;;  %v2255_v56 = vld [vmem:[%s2819_s9 + $0x50] sm:$0xff]  }
 0x627   : > { %v2257_v17 = vld [vmem:[%s2819_s9 + $0x58] sm:$0xff]  }
 0x628   : > { %2178 = vrot.lane.b32.xlu0 %v2177_v16, %s2324_s26  ;;  %v2256_v16 = vld [vmem:[%s2819_s9 + $0x10] sm:$0xff]  }
 0x62b   : > { %v1253_v18 = vpop.f32.mrb[24].mxu1 }
 0x62c   : > { %v2136_v19 = vpop.f32.mrb[25].mxu1 }
 0x62d   : > { %v1256_v20 = vpop.f32.mrb[26].mxu1  ;;  %v2259_v19 = vld [vmem:[%s2819_s9 + $0x60] sm:$0xff]  }
 0x62e   : > { %v2182_v21 = vpack.i.bf16 %v1256_v20, %v1253_v18  ;;  %v2137_v22 = vpop.f32.mrb[27].mxu1  ;;  %v2258_v18 = vld [vmem:[%s2819_s9 + $0x18] sm:$0xff]   ;;  %v2260_v20 = vld [vmem:[%s2819_s9 + $0x20] sm:$0xff]  }
 0x630   : > { %2183 = vrot.lane.b32.xlu1 %v2182_v21, %s2322_s24  ;;  %v2261_v21 = vld [vmem:[%s2819_s9 + $0x68] sm:$0xff]   ;;  %s494_s24 = scalar_lea.vmem %s2825_s15, %s2012_s27 }
 0x692   : > { %v2174_v25 = vpop.permute.xlu1 %2173 }
 0x693   : > { %v2176_v26 = vunpack.i.h.bf16 %v2174_v25  ;;  %v2175_v27 = vunpack.i.l.bf16 %v2174_v25 }
 0x695   : > { %v1285_v34 = vsel %vm763_vm1, %v2582_v38, %v2176_v26  ;;  %v1284_v36 = vsel %vm763_vm1, %v2580_v35, %v2175_v27 }
 0x69a   : > { %v2179_v4 = vpop.permute.xlu0 %2178 }
 0x69b   : > { %v2181_v28 = vunpack.i.h.bf16 %v2179_v4  ;;  %v2180_v29 = vunpack.i.l.bf16 %v2179_v4 }
 0x69d   : > { %v1288_v40 = vsel %vm1286_vm5, %v1285_v34, %v2181_v28  ;;  %v1287_v41 = vsel %vm1286_vm5, %v1284_v36, %v2180_v29  ;;  %v1971_v34 = vld [vmem:[%s2815_s5] ss:$0 sm:$0xff] }
 0x6a2   : > { %v2184_v32 = vpop.permute.xlu1 %2183 }
 0x6a3   : > { %v2186_v37 = vunpack.i.h.bf16 %v2184_v32  ;;  %v2185_v39 = vunpack.i.l.bf16 %v2184_v32 }
 0x6a5   : > { %v1291_v42 = vsel %vm1289_vm6, %v1288_v40, %v2186_v37  ;;  %v1290_v43 = vsel %vm1289_vm6, %v1287_v41, %v2185_v39  ;;  %v1972_v40 = vld [vmem:[%s2816_s6] ss:$0 sm:$0xff] }
 0x6a6   : > { %v1292_v44 = vpack.c.bf16 %v1291_v42, %v1290_v43 }
 0x6a8   : > { %2155 = vmatmul.mubr.bf16.vlgmr.msra.gmra.mrb[12].mxu0 %v1292_v44 }
 0x6a9   : > { %2049 = vmatpush3.bf16.msra.mxu0 %v2252_v13 }
 0x6aa   : > { %2050 = vmatprep.subr.bf16.mxu0 %v2253_v14 }
 0x6ad   : > { %2051 = vmatpush3.bf16.msra.mxu0 %v2254_v15 }
 0x6ae   : > { %2052 = vmatprep.subr.bf16.mxu0 %v2255_v56 }
 0x6b1   : > { %2053 = vmatpush3.bf16.msra.mxu0 %v2256_v16 }
 0x6b2   : > { %2054 = vmatprep.subr.bf16.mxu0 %v2257_v17 }
 0x6b5   : > { %2055 = vmatpush3.bf16.msra.mxu0 %v2258_v18 }
 0x6b6   : > { %2056 = vmatprep.subr.bf16.mxu0 %v2259_v19 }
 0x6b9   : > { %2057 = vmatpush3.bf16.msra.mxu0 %v2260_v20 }
 0x6ba   : > { %2058 = vmatprep.subr.bf16.mxu0 %v2261_v21 }
 0x77b   : > { %v1398_v46 = vpop.f32.mrb[12].mxu0 }
 0x77c   : > { %v1399_v47 = vadd.f32 %v1962_v45, %v1398_v46  ;;  %v2156_v48 = vpop.f32.mrb[13].mxu0  ;;  %v2263_v46 = vld [vmem:[%s2819_s9 + $0x70] sm:$0xff]  }
 0x77d   : > { %v1401_v49 = vpop.f32.mrb[14].mxu0  ;;  %v2265_v48 = vld [vmem:[%s2819_s9 + $0x78] sm:$0xff]  }
 0x77e   : > { %v1402_v38 = vadd.f32 %v1962_v45, %v1401_v49  ;;  %v2157_v55 = vpop.f32.mrb[15].mxu0  ;;  %v1405_v35 = vadd.f32 %v1399_v47, %v2489_v23  ;;  %v2230_v23 = vld [vmem:[%s2817_s7 + $0x10] ss:$8 sps:$4 sm:$0xff]   ;;  %v2262_v45 = vld [vmem:[%s2819_s9 + $0x28] sm:$0xff]  }
 0x77f   : > { %1560 = vmatpush1.bf16.msra.mxu1 %v2230_v23  ;;  %2059 = vmatpush3.bf16.msra.mxu0 %v2262_v45  ;;  %v2264_v47 = vld [vmem:[%s2819_s9 + $0x30] sm:$0xff]   ;;  %v2266_v49 = vld [vmem:[%s2819_s9 + $0x38] sm:$0xff]  }
 0x780   : > { %1409 = vadd.xlane.f32.xlu0 %v1405_v35  ;;  %v1406_v50 = vadd.f32 %v1402_v38, %v2491_v24  ;;  %1561 = vmatprep.subr.bf16.mxu1 %v2235_v0  ;;  %v1465_v38 = vld [vmem:[%s2818_s8] sm:$0x3] }
 0x781   : > { %2060 = vmatprep.subr.bf16.mxu0 %v2263_v46  ;;  %v1470_v55 = vrot.slane %v1465_v38, %v535_v31 }
 0x782   : > { %1411 = vadd.xlane.f32.xlu1 %v1406_v50 }
 0x783   : > { %1562 = vmatpush1.bf16.msra.mxu1 %v2233_v1  ;;  %2061 = vmatpush3.bf16.msra.mxu0 %v2264_v47 }
 0x784   : > { %1563 = vmatprep.subr.bf16.mxu1 %v2238_v3  ;;  %2062 = vmatprep.subr.bf16.mxu0 %v2265_v48 }
 0x787   : > { %1564 = vmatpush1.bf16.msra.mxu1 %v2236_v5  ;;  %2063 = vmatpush3.bf16.msra.mxu0 %v2266_v49 }
 0x788   : > { %1565 = vmatprep.subr.bf16.mxu1 %v2241_v2 }
 0x78b   : > { %1566 = vmatpush1.bf16.msra.mxu1 %v2239_v6 }
 0x78c   : > { %1567 = vmatprep.subr.bf16.mxu1 %v2244_v7 }
 0x78f   : > { %1568 = vmatpush1.bf16.msra.mxu1 %v2242_v57 }
 0x790   : > { %1569 = vmatprep.subr.bf16.mxu1 %v2247_v8 }
 0x793   : > { %1570 = vmatpush1.bf16.msra.mxu1 %v2245_v9 }
 0x794   : > { %1571 = vmatprep.subr.bf16.mxu1 %v2250_v10 }
 0x797   : > { %1572 = vmatpush1.bf16.msra.mxu1 %v2248_v11 }
 0x80d   : > { %v1410_v24 = vpop.xlane.xlu0 %1409 }
 0x80e   : > { %v1414_v54 = vmul.f32 0.0078125, %v1410_v24 }
 0x80f   : > { %v1412_v58 = vpop.xlane.xlu1 %1411 }
 0x810   : > { %v1416_v59 = vsub.f32 %v1405_v35, %v1414_v54  ;;  %v1415_v60 = vmul.f32 0.0078125, %v1412_v58  ;;  %v1474_v35 = vrot.slane %v1465_v38, %v539_v33 }
 0x812   : > { %v2685_v61 = vsub.f32 %v1406_v50, %v1415_v60  ;;  %v1418_v62 = vmul.f32 %v1416_v59, %v1416_v59 }
 0x814   : > { %1420 = vadd.xlane.f32.xlu0 %v1418_v62  ;;  %v1419_v63 = vmul.f32 %v2685_v61, %v2685_v61 }
 0x818   : > { %1422 = vadd.xlane.f32.xlu0 %v1419_v63 }
 0x8a1   : > { %v1421_v22 = vpop.xlane.xlu0 %1420 }
 0x8a2   : > { %v1424_v25 = vmul.f32 0.0078125, %v1421_v22 }
 0x8a4   : > { %v1426_v4 = vadd.f32 1e-05, %v1424_v25  ;;  %v2006_v25 = vld [vmem:[%s2821_s11] ss:$0 sm:$0xff] }
 0x8a5   : > { %v1423_v26 = vpop.xlane.xlu0 %1422 }
 0x8a6   : > { %2299 = vrsqrt.f32 %v1426_v4  ;;  %v1425_v27 = vmul.f32 0.0078125, %v1423_v26 }
 0x8a8   : > { %v1427_v28 = vadd.f32 1e-05, %v1425_v27  ;;  %v2007_v27 = vld [vmem:[%s2822_s12] ss:$0 sm:$0xff] }
 0x8aa   : > { %2301 = vrsqrt.f32 %v1427_v28 }
 0x8b0   : > { %v2300_v29 = vpop.eup %2299 }
 0x8b1   : > { %v1430_v32 = vmul.f32 %v2300_v29, %v1416_v59 }
 0x8b3   : > { %v1438_v39 = vmul.f32 %v1971_v34, %v1430_v32 }
 0x8b4   : > { %v2302_v36 = vpop.eup %2301 }
 0x8b5   : > { %v1431_v37 = vmul.f32 %v2302_v36, %v2685_v61  ;;  %v1446_v42 = vadd.f32 %v1972_v40, %v1438_v39 }
 0x8b7   : > { %v1439_v41 = vmul.f32 %v1971_v34, %v1431_v37 }
 0x8b9   : > { %v1447_v43 = vadd.f32 %v1972_v40, %v1439_v41 }
 0x8bb   : > { %v1448_v44 = vpack.c.bf16 %v1447_v43, %v1446_v42 }
 0x8bd   : > { %1590 = vmatmul.mubr.bf16.vlgmr.msra.gmra.mrb[28].mxu1 %v1448_v44 }
 0x990   : > { %v1591_v50 = vpop.f32.mrb[28].mxu1 }
 0x991   : > { %v1592_v51 = vadd.f32 %v1591_v50, %v1470_v55  ;;  %v1593_v52 = vpop.f32.mrb[29].mxu1  ;;  %v2008_v50 = vld [vmem:[%s2823_s13] ss:$0 sm:$0xff] }
 0x992   : > { %v1594_v53 = vadd.f32 %v1593_v52, %v1474_v35  ;;  %v1595_v23 = vpop.f32.mrb[30].mxu1 }
 0x993   : > { %v1596_v24 = vadd.f32 %v1595_v23, %v1470_v55  ;;  %v1597_v54 = vpop.f32.mrb[31].mxu1  ;;  %v1600_v59 = vmax.f32 %v1592_v51, 0.0 }
 0x994   : > { %v1598_v58 = vadd.f32 %v1597_v54, %v1474_v35  ;;  %v1601_v61 = vmax.f32 %v1594_v53, 0.0  ;;  %v2009_v53 = vld [vmem:[%s2824_s14] ss:$0 sm:$0xff] }
 0x995   : > { %v1602_v60 = vmax.f32 %v1596_v24, 0.0 }
 0x996   : > { %v1603_v62 = vmax.f32 %v1598_v58, 0.0 }
 0x997   : > { %v1604_v63 = vpack.c.bf16 %v1602_v60, %v1600_v59 }
 0x998   : > { %v1605_v0 = vpack.c.bf16 %v1603_v62, %v1601_v61 }
 0x99a   : > { %1773 = vmatprep.mubr.bf16.mxu0 %v1605_v0 }
 0x99b   : > { %1774 = vmatmul.mubr.bf16.vlgmr.msra.gmra.mrb[16].mxu0 %v1604_v63 }
 0xa6e   : > { %v2064_v31 = vpop.f32.mrb[16].mxu0 }
 0xa6f   : > { %v2065_v33 = vpop.f32.mrb[17].mxu0 }
 0xa70   : > { %v2066_v1 = vadd.f32 %v2065_v33, %v2064_v31  ;;  %v2067_v3 = vpop.f32.mrb[18].mxu0 }
 0xa71   : > { %v2068_v5 = vpop.f32.mrb[19].mxu0 }
 0xa72   : > { %v1776_v2 = vadd.f32 %v2066_v1, %v1989_v30  ;;  %v2069_v6 = vadd.f32 %v2068_v5, %v2067_v3 }
 0xa74   : > { %v1779_v7 = vadd.f32 %v2069_v6, %v1989_v30  ;;  %v1782_v57 = vadd.f32 %v1776_v2, %v1446_v42 }
 0xa76   : > { %1786 = vadd.xlane.f32.xlu0 %v1782_v57  ;;  %v1783_v8 = vadd.f32 %v1779_v7, %v1447_v43 }
 0xa78   : > { %1788 = vadd.xlane.f32.xlu1 %v1783_v8 }
 0xb03   : > { %v1787_v9 = vpop.xlane.xlu0 %1786 }
 0xb04   : > { %v1790_v10 = vmul.f32 0.0078125, %v1787_v9 }
 0xb05   : > { %v1789_v11 = vpop.xlane.xlu1 %1788 }
 0xb06   : > { %v1792_v12 = vsub.f32 %v1782_v57, %v1790_v10  ;;  %v1791_v13 = vmul.f32 0.0078125, %v1789_v11 }
 0xb08   : > { %v1793_v14 = vsub.f32 %v1783_v8, %v1791_v13  ;;  %v1794_v15 = vmul.f32 %v1792_v12, %v1792_v12 }
 0xb0a   : > { %1796 = vadd.xlane.f32.xlu0 %v1794_v15  ;;  %v1795_v56 = vmul.f32 %v1793_v14, %v1793_v14 }
 0xb0c   : > { %1798 = vadd.xlane.f32.xlu1 %v1795_v56 }
 0xb97   : > { %v1797_v16 = vpop.xlane.xlu0 %1796 }
 0xb98   : > { %v1800_v17 = vmul.f32 0.0078125, %v1797_v16 }
 0xb99   : > { %v1799_v18 = vpop.xlane.xlu1 %1798 }
 0xb9a   : > { %v1802_v19 = vadd.f32 1e-05, %v1800_v17  ;;  %v1801_v20 = vmul.f32 0.0078125, %v1799_v18 }
 0xb9c   : > { %2303 = vrsqrt.f32 %v1802_v19  ;;  %v1803_v21 = vadd.f32 1e-05, %v1801_v20 }
 0xb9e   : > { %2305 = vrsqrt.f32 %v1803_v21 }
 0xba6   : > { %v2304_v22 = vpop.eup %2303 }
 0xba7   : > { %v1806_v4 = vmul.f32 %v2304_v22, %v1792_v12 }
 0xba8   : > { %v2306_v26 = vpop.eup %2305 }
 0xba9   : > { %v1814_v28 = vmul.f32 %v2006_v25, %v1806_v4  ;;  %v1807_v29 = vmul.f32 %v2306_v26, %v1793_v14 }
 0xbab   : > { %v1822_v32 = vadd.f32 %v2007_v27, %v1814_v28  ;;  %v1815_v34 = vmul.f32 %v2006_v25, %v1807_v29 }
 0xbad   : > { %1826 = vadd.xlane.f32.xlu0 %v1822_v32  ;;  %v1823_v36 = vadd.f32 %v2007_v27, %v1815_v34 }
 0xbaf   : > { %1828 = vadd.xlane.f32.xlu1 %v1823_v36 }
 0xc3a   : > { %v1827_v37 = vpop.xlane.xlu0 %1826 }
 0xc3b   : > { %v1830_v39 = vmul.f32 0.0078125, %v1827_v37 }
 0xc3c   : > { %v1829_v40 = vpop.xlane.xlu1 %1828 }
 0xc3d   : > { %v1832_v41 = vsub.f32 %v1822_v32, %v1830_v39  ;;  %v1831_v42 = vmul.f32 0.0078125, %v1829_v40 }
 0xc3f   : > { %v1833_v43 = vsub.f32 %v1823_v36, %v1831_v42  ;;  %v1834_v44 = vmul.f32 %v1832_v41, %v1832_v41 }
 0xc41   : > { %1836 = vadd.xlane.f32.xlu0 %v1834_v44  ;;  %v1835_v45 = vmul.f32 %v1833_v43, %v1833_v43 }
 0xc43   : > { %1838 = vadd.xlane.f32.xlu1 %v1835_v45 }
 0xcce   : > { %v1837_v46 = vpop.xlane.xlu0 %1836 }
 0xccf   : > { %v1840_v47 = vmul.f32 0.0078125, %v1837_v46 }
 0xcd0   : > { %v1839_v48 = vpop.xlane.xlu1 %1838 }
 0xcd1   : > { %v1842_v49 = vadd.f32 1e-05, %v1840_v47  ;;  %v1841_v38 = vmul.f32 0.0078125, %v1839_v48 }
 0xcd3   : > { %2307 = vrsqrt.f32 %v1842_v49  ;;  %v1843_v55 = vadd.f32 1e-05, %v1841_v38 }
 0xcd5   : > { %2309 = vrsqrt.f32 %v1843_v55 }
 0xcdd   : > { %v2308_v35 = vpop.eup %2307 }
 0xcde   : > { %v1846_v51 = vmul.f32 %v2308_v35, %v1832_v41 }
 0xcdf   : > { %v2310_v52 = vpop.eup %2309 }
 0xce0   : > { %v1854_v23 = vmul.f32 %v2008_v50, %v1846_v51  ;;  %v1847_v24 = vmul.f32 %v2310_v52, %v1833_v43 }
 0xce2   : > { %v1862_v54 = vadd.f32 %v2009_v53, %v1854_v23  ;;  %v1855_v58 = vmul.f32 %v2008_v50, %v1847_v24 }
 0xce4   : > { %1864 = vst [vmem:[%s494_s24] sm:$0xff] %v1862_v54  ;;  %v1863_v59 = vadd.f32 %v2009_v53, %v1855_v58 }
 0xce6   : > { %1865 = vst [vmem:[%s494_s24 + $0x8] sm:$0xff] %v1863_v59 }
 0xce7 PF: > { %s25_s18 = sadd.s32 1, %s2317_s18  }
 0xce8   : > { %p22_p4 = scmp.ge.s32.totalorder %s25_s18, 4  }
 0xcea   :  { %24 = sbr.rel (!%p22_p4) target bundleno = 1 (0x1), region = 110 }

// kernel: transformer_forward.5
= control target key start
LH: loop header
LB: loop body
LE: loop exit
PB: predicated region body
PF: predicated region fallthrough
CT: control target
= control target key end

     0   :  { %s2359_s18 = smov 0   ;;  %s2758_s0 = inlined_call_operand.vmem [shape: f32[2,16,128], index: 0, kind: input, shape index: {}]   ;;  %s2759_s1 = inlined_call_operand.vmem [shape: bf16[128,384], index: 1, kind: input, shape index: {}]   ;;  %s2760_s2 = inlined_call_operand.vmem [shape: f32[1,384], index: 2, kind: input, shape index: {}]   ;;  %s2761_s3 = inlined_call_operand.vmem [shape: bf16[128,128], index: 3, kind: input, shape index: {}]   ;;  %s2762_s4 = inlined_call_operand.vmem [shape: f32[1,128], index: 4, kind: input, shape index: {}]   ;;  %s2763_s5 = inlined_call_operand.vmem [shape: f32[1,128], index: 5, kind: input, shape index: {}]   ;;  %s2764_s6 = inlined_call_operand.vmem [shape: f32[1,128], index: 6, kind: input, shape index: {}]   ;;  %s2765_s7 = inlined_call_operand.vmem [shape: bf16[128,256], index: 7, kind: input, shape index: {}]   ;;  %s2766_s8 = inlined_call_operand.vmem [shape: f32[1,256], index: 8, kind: input, shape index: {}]   ;;  %s2767_s9 = inlined_call_operand.vmem [shape: bf16[256,128], index: 9, kind: input, shape index: {}]   ;;  %s2768_s10 = inlined_call_operand.vmem [shape: f32[1,128], index: 10, kind: input, shape index: {}]   ;;  %s2769_s11 = inlined_call_operand.vmem [shape: f32[1,128], index: 11, kind: input, shape index: {}]   ;;  %s2770_s12 = inlined_call_operand.vmem [shape: f32[1,128], index: 12, kind: input, shape index: {}]   ;;  %s2771_s13 = inlined_call_operand.vmem [shape: f32[1,128], index: 13, kind: input, shape index: {}]   ;;  %s2772_s14 = inlined_call_operand.vmem [shape: f32[1,128], index: 14, kind: input, shape index: {}]   ;;  %s2773_s15 = inlined_call_operand.vmem [shape: f32[2,16,128], index: 15, kind: output, shape index: {}]  }
   0x1 LB: > { %s1881_s19 = sadd.s32 4294967295, %s2271_s18   ;;  %p1885_p0 = scmp.ge.s32.totalorder %s2271_s18, 1  ;;  %s2271_s18 = sphi %s2359_s18, %s25_s18  }
   0x2   : > { %p437_p1 = scmp.lt.s32.totalorder %s2271_s18, 3 }
   0x4   : > { %p438_p2 = pnand %p1885_p0, %p437_p1 }
   0x5   : > { %v2145_v0 = vld [vmem:[%s2759_s1 + $0x4] ss:$12 sps:$4 sm:$0xff] (!%p438_p2)   ;;  %v2147_v1 = vld [vmem:[%s2759_s1] ss:$12 sps:$4 sm:$0xff] (!%p438_p2)   ;;  %v2273_v2 = vmov (!%p438_p2), 0   ;;  %v2274_v4 = vmov (!%p438_p2), 0.0   ;;  %v533_v29 = vlaneseq (!%p438_p2) }
   0x6   : > { %441 = sbr.rel (%p438_p2) target bundleno = 2992 (0xbb0), region = 80  ;;  %708 = vmatprep.mubr.bf16.mxu0 (!%p438_p2), %v2273_v2  ;;  %676 = vmatprep.subr.bf16.mxu0 (!%p438_p2), %v2145_v0  ;;  %v2148_v3 = vld [vmem:[%s2759_s1 + $0x1c] ss:$12 sps:$4 sm:$0xff] (!%p438_p2)   ;;  %v2150_v5 = vld [vmem:[%s2759_s1 + $0x18] ss:$12 sps:$4 sm:$0xff] (!%p438_p2)   ;;  %p485_p3 = scmp.lt.s32.totalorder (!%p438_p2), %s1881_s19, 1 }
   0x7   : > { %2028 = vmatprep.subr.bf16.mxu1 (!%p438_p2), %v2274_v4  ;;  %677 = vmatpush1.bf16.msra.mxu0 (!%p438_p2), %v2147_v1  ;;  %v2151_v6 = vld [vmem:[%s2759_s1 + $0x34] ss:$12 sps:$4 sm:$0xff] (!%p438_p2)   ;;  %v2153_v7 = vld [vmem:[%s2759_s1 + $0x30] ss:$12 sps:$4 sm:$0xff] (!%p438_p2)   ;;  %v2154_v8 = vld [vmem:[%s2759_s1 + $0x4c] ss:$12 sps:$4 sm:$0xff] (!%p438_p2)  }
   0x8   : > { %678 = vmatprep.subr.bf16.mxu0 (!%p438_p2), %v2148_v3  ;;  %v2156_v9 = vld [vmem:[%s2759_s1 + $0x48] ss:$12 sps:$4 sm:$0xff] (!%p438_p2)   ;;  %v2157_v10 = vld [vmem:[%s2759_s1 + $0x64] ss:$12 sps:$4 sm:$0xff] (!%p438_p2)   ;;  %v2170_v12 = vld [vmem:[%s2759_s1 + $0x20] ss:$12 sps:$4 sm:$0xff] (!%p438_p2)  }
   0x9   : > { %v2169_v11 = vld [vmem:[%s2759_s1 + $0x8] ss:$12 sps:$4 sm:$0xff] (!%p438_p2)   ;;  %v2159_v13 = vld [vmem:[%s2759_s1 + $0x60] ss:$12 sps:$4 sm:$0xff] (!%p438_p2)   ;;  %v2162_v15 = vld [vmem:[%s2759_s1 + $0x78] ss:$12 sps:$4 sm:$0xff] (!%p438_p2)  }
   0xa   : > { %2029 = vmatpush3.bf16.msra.mxu1 (!%p438_p2), %v2169_v11  ;;  %v2160_v14 = vld [vmem:[%s2759_s1 + $0x7c] ss:$12 sps:$4 sm:$0xff] (!%p438_p2)   ;;  %v2163_v16 = vld [vmem:[%s2759_s1 + $0x94] ss:$12 sps:$4 sm:$0xff] (!%p438_p2)   ;;  %v2171_v17 = vld [vmem:[%s2759_s1 + $0x38] ss:$12 sps:$4 sm:$0xff] (!%p438_p2)  }
   0xb   : > { %679 = vmatpush1.bf16.msra.mxu0 (!%p438_p2), %v2150_v5  ;;  %2030 = vmatprep.subr.bf16.mxu1 (!%p438_p2), %v2274_v4  ;;  %v2172_v18 = vld [vmem:[%s2759_s1 + $0x50] ss:$12 sps:$4 sm:$0xff] (!%p438_p2)   ;;  %v2166_v20 = vld [vmem:[%s2759_s1 + $0xac] ss:$12 sps:$4 sm:$0xff] (!%p438_p2)   ;;  %v2173_v21 = vld [vmem:[%s2759_s1 + $0x68] ss:$12 sps:$4 sm:$0xff] (!%p438_p2)  }
   0xc   : > { %680 = vmatprep.subr.bf16.mxu0 (!%p438_p2), %v2151_v6  ;;  %v2165_v19 = vld [vmem:[%s2759_s1 + $0x90] ss:$12 sps:$4 sm:$0xff] (!%p438_p2)   ;;  %v2168_v22 = vld [vmem:[%s2759_s1 + $0xa8] ss:$12 sps:$4 sm:$0xff] (!%p438_p2)   ;;  %v2174_v25 = vld [vmem:[%s2759_s1 + $0x80] ss:$12 sps:$4 sm:$0xff] (!%p438_p2)  }
   0xd   : > { %s2775_s19 = smov (!%p485_p3, %s1881_s19), 1  ;;  %v2175_v27 = vld [vmem:[%s2759_s1 + $0x98] ss:$12 sps:$4 sm:$0xff]   ;;  %v2176_v28 = vld [vmem:[%s2759_s1 + $0xb0] ss:$12 sps:$4 sm:$0xff]   ;;  %vm2275_vm0 = vmmov 0  }
   0xe   : > { %s1970_s23 = sshll.u32 %s2775_s19, 4  ;;  %2031 = vmatpush3.bf16.msra.mxu1 %v2170_v12  ;;  %2044 = vmatprep.mubr.msk.bf16.mxu1 %vm2275_vm0, %v2274_v4  ;;  %v2470_v30 = vshrl.u32 %v533_v29, 7  ;;  %v531_v32 = vld [vmem:[%s2760_s2] sm:$0x7]  ;;  %vm763_vm1 = vcmask 261120   ;;  %v2491_v56 = vand.u32 127, %v533_v29 }
   0xf   : > { %681 = vmatpush1.bf16.msra.mxu0 %v2153_v7  ;;  %2032 = vmatprep.subr.bf16.mxu1 %v2274_v4  ;;  %s489_s30 = scalar_lea.vmem %s2758_s0, %s1970_s23  ;;  %vm820_vm3 = vcmask 130048   ;;  %s2276_s29 = smov 96   ;;  %vm1286_vm5 = vcmask 523264   ;;  %vm1289_vm6 = vcmask 785408  }
  0x10   : > { %682 = vmatprep.subr.bf16.mxu0 %v2154_v8  ;;  %v2443_v23 = vld [vmem:[%s489_s30] sm:$0xff]  ;;  %v2445_v24 = vld [vmem:[%s489_s30 + $0x8] sm:$0xff]  ;;  %v535_v31 = vsub.s32 0, %v2470_v30  ;;  %v539_v33 = vsub.s32 1, %v2470_v30  ;;  %v543_v47 = vsub.s32 2, %v2470_v30  ;;  %v2494_v57 = vadd.s32 8, %v2470_v30  ;;  %s494_s13 = scalar_lea.vmem %s2773_s15, %s1970_s23 }
  0x11   : > { %v498_v26 = vpack.c.bf16 %v2445_v24, %v2443_v23  ;;  %vm816_vm2 = vcmp.le.s32.totalorder %v2491_v56, %v2470_v30  ;;  %s2277_s30 = smov 32   ;;  %s2278_s16 = smov 64   ;;  %v1949_v30 = vld [vmem:[%s2768_s10] ss:$0 sm:$0xff] }
  0x12   : > { %2033 = vmatpush3.bf16.msra.mxu1 %v2171_v17  ;;  %v536_v34 = vrot.slane %v531_v32, %v535_v31  ;;  %v540_v36 = vrot.slane %v531_v32, %v539_v33  ;;  %v544_v48 = vrot.slane %v531_v32, %v543_v47  ;;  %vm817_vm4 = vcmp.le.s32.totalorder %v2491_v56, %v2494_v57 }
  0x13   : > { %683 = vmatpush1.bf16.msra.mxu0 %v2156_v9  ;;  %2034 = vmatprep.subr.bf16.mxu1 %v2274_v4 }
  0x14   : > { %684 = vmatprep.subr.bf16.mxu0 %v2157_v10 }
  0x16   : > { %2035 = vmatpush3.bf16.msra.mxu1 %v2172_v18 }
  0x17   : > { %685 = vmatpush1.bf16.msra.mxu0 %v2159_v13  ;;  %2036 = vmatprep.subr.bf16.mxu1 %v2274_v4 }
  0x18   : > { %686 = vmatprep.subr.bf16.mxu0 %v2160_v14 }
  0x1a   : > { %2037 = vmatpush3.bf16.msra.mxu1 %v2173_v21 }
  0x1b   : > { %687 = vmatpush1.bf16.msra.mxu0 %v2162_v15  ;;  %2038 = vmatprep.subr.bf16.mxu1 %v2274_v4 }
  0x1c   : > { %688 = vmatprep.subr.bf16.mxu0 %v2163_v16 }
  0x1e   : > { %2039 = vmatpush3.bf16.msra.mxu1 %v2174_v25 }
  0x1f   : > { %689 = vmatpush1.bf16.msra.mxu0 %v2165_v19  ;;  %2040 = vmatprep.subr.bf16.mxu1 %v2274_v4 }
  0x20   : > { %690 = vmatprep.subr.bf16.mxu0 %v2166_v20 }
  0x22   : > { %2041 = vmatpush3.bf16.msra.mxu1 %v2175_v27 }
  0x23   : > { %691 = vmatpush1.bf16.msra.mxu0 %v2168_v22  ;;  %2042 = vmatprep.subr.bf16.mxu1 %v2274_v4 }
  0x24   : > { %2072 = vmatprep.subr.bf16.mxu0 %v2274_v4 }
  0x26   : > { %709 = vmatmul.mubr.bf16.vlgmr.msra.gmra.mrb[0].mxu0 %v498_v26  ;;  %2043 = vmatpush3.bf16.msra.mxu1 %v2176_v28 }
  0x27   : > { %2048 = vmatprep.subr.bf16.mxu1 %v2274_v4  ;;  %2074 = vmatprep.mubr.msk.bf16.mxu0 %vm2275_vm0, %v2274_v4 }
  0x29   : > { %2045 = vmatmul.mubr.bf16.vlgmr.msra.gmra.mrb[0].mxu1 %v498_v26 }
  0x2a   : > { %2050 = vmatprep.mubr.msk.bf16.mxu1 %vm2275_vm0, %v2274_v4 }
  0xf9   : > { %v710_v35 = vpop.f32.mrb[0].mxu0 }
  0xfa   : > { %v712_v37 = vpop.f32.mrb[1].mxu0  ;;  %v711_v39 = vadd.f32 %v710_v35, %v536_v34 }
  0xfb   : > { %v714_v38 = vpop.f32.mrb[2].mxu0  ;;  %v713_v42 = vadd.f32 %v712_v37, %v540_v36 }
  0xfc   : > { %v715_v40 = vadd.f32 %v714_v38, %v536_v34  ;;  %v716_v41 = vpop.f32.mrb[3].mxu0  ;;  %v753_v49 = vpop.f32.mrb[0].mxu1 }
  0xfd   : > { %v717_v43 = vadd.f32 %v716_v41, %v540_v36  ;;  %v754_v50 = vadd.f32 %v753_v49, %v544_v48  ;;  %v2046_v51 = vpop.f32.mrb[1].mxu1 }
  0xfe   : > { %v760_v44 = vpack.c.bf16 %v715_v40, %v711_v39  ;;  %v756_v52 = vpop.f32.mrb[2].mxu1 }
  0xff   : > { %v761_v45 = vpack.c.bf16 %v717_v43, %v713_v42  ;;  %v757_v53 = vadd.f32 %v756_v52, %v544_v48  ;;  %v2047_v54 = vpop.f32.mrb[3].mxu1 }
 0x101   : > { %v768_v46 = vsel %vm763_vm1, %v761_v45, 0  ;;  %v2487_v55 = vpack.c.bf16 %v757_v53, %v754_v50 }
 0x102   : > { %2049 = vmatpush3.bf16.xpose.msra.mxu1 %v768_v46 }
 0x103   : > { %2054 = vmatprep.subr.bf16.mxu1 %v2274_v4 }
 0x109   : > { %2051 = vmatmul.mubr.msk.bf16.vlgmr.msra.gmra.mrb[4].mxu1 %vm763_vm1, %v760_v44 }
 0x10a   : > { %2056 = vmatprep.mubr.msk.bf16.mxu1 %vm2275_vm0, %v2274_v4  ;;  %2055 = vmatpush3.bf16.msra.mxu1 %v2487_v55 }
 0x10b   : > { %2060 = vmatprep.subr.bf16.mxu1 %v2274_v4 }
 0x1dc   : > { %v804_v58 = vpop.f32.mrb[4].mxu1 }
 0x1dd   : > { %v818_v59 = vsel %vm816_vm2, %v804_v58, -1e+30  ;;  %v2052_v60 = vpop.f32.mrb[5].mxu1 }
 0x1de   : > { %v807_v61 = vpop.f32.mrb[6].mxu1  ;;  %v821_v62 = vsel %vm820_vm3, %v818_v59, -inf }
 0x1df   : > { %v819_v63 = vsel %vm817_vm4, %v807_v61, -1e+30  ;;  %822 = vmax.xlane.f32.xlu0 %v821_v62  ;;  %v2053_v0 = vpop.f32.mrb[7].mxu1 }
 0x1e0   : > { %v824_v1 = vsel %vm820_vm3, %v819_v63, -inf }
 0x1e3   : > { %825 = vmax.xlane.f32.xlu0 %v824_v1 }
 0x1f9   : > { %892 = vrot.lane.b32.xlu0 %v761_v45, %s2276_s29 }
 0x1fd   : > { %1139 = vrot.lane.b32.xlu0 %v761_v45, %s2277_s30 }
 0x26c   : > { %v823_v3 = vpop.xlane.xlu0 %822 }
 0x26d   : > { %v827_v5 = vsub.f32 %v818_v59, %v823_v3 }
 0x26f   : > { %v829_v6 = vmul.f32 1.442695, %v827_v5 }
 0x270   : > { %v826_v7 = vpop.xlane.xlu0 %825 }
 0x271   : > { %2225 = vpow2.f32 %v829_v6  ;;  %v828_v8 = vsub.f32 %v819_v63, %v826_v7 }
 0x273   : > { %v831_v9 = vmul.f32 1.442695, %v828_v8 }
 0x274   : > { %v893_v17 = vpop.permute.xlu0 %892 }
 0x275   : > { %2227 = vpow2.f32 %v831_v9  ;;  %v898_v28 = vsel %vm763_vm1, %v893_v17, 0 }
 0x278   : > { %v1140_v26 = vpop.permute.xlu0 %1139 }
 0x279   : > { %v1145_v32 = vsel %vm763_vm1, %v1140_v26, 0 }
 0x27b   : > { %v2226_v10 = vpop.eup %2225 }
 0x27c   : > { %v833_v11 = vsel %vm820_vm3, %v2226_v10, 0.0 }
 0x27d   : > { %834 = vadd.xlane.f32.xlu1 %v833_v11 }
 0x27f   : > { %v2228_v12 = vpop.eup %2227 }
 0x280   : > { %v836_v13 = vsel %vm820_vm3, %v2228_v12, 0.0 }
 0x281   : > { %837 = vadd.xlane.f32.xlu1 %v836_v13 }
 0x292   : > { %889 = vrot.lane.b32.xlu1 %v760_v44, %s2276_s29 }
 0x296   : > { %1016 = vrot.lane.b32.xlu1 %v761_v45, %s2278_s16 }
 0x29a   : > { %1014 = vrot.lane.b32.xlu1 %v760_v44, %s2278_s16 }
 0x29e   : > { %1137 = vrot.lane.b32.xlu1 %v760_v44, %s2277_s30 }
 0x30a   : > { %v835_v14 = vpop.xlane.xlu1 %834 }
 0x30b   : > { %2229 = vrcp.f32 %v835_v14 }
 0x30e   : > { %v838_v15 = vpop.xlane.xlu1 %837 }
 0x30f   : > { %2231 = vrcp.f32 %v838_v15 }
 0x312   : > { %v890_v16 = vpop.permute.xlu1 %889 }
 0x315   : > { %v2230_v19 = vpop.eup %2229 }
 0x316   : > { %v1017_v18 = vpop.permute.xlu1 %1016  ;;  %v840_v22 = vmul.f32 %v2230_v19, %v2226_v10 }
 0x317   : > { %v1022_v20 = vsel %vm763_vm1, %v1017_v18, 0 }
 0x318   : > { %2073 = vmatpush3.bf16.xpose.msra.mxu0 %v1022_v20 }
 0x319   : > { %v2232_v21 = vpop.eup %2231  ;;  %2084 = vmatprep.subr.bf16.mxu0 %v2274_v4 }
 0x31a   : > { %v842_v25 = vmul.f32 %v2232_v21, %v2228_v12  ;;  %v1015_v29 = vpop.permute.xlu1 %1014 }
 0x31c   : > { %v843_v27 = vpack.c.bf16 %v842_v25, %v840_v22 }
 0x31e   : > { %2057 = vmatmul.mubr.msk.bf16.vlgmr.msra.gmra.mrb[8].mxu1 %vm820_vm3, %v843_v27  ;;  %v1138_v34 = vpop.permute.xlu1 %1137 }
 0x31f   : > { %2061 = vmatpush3.bf16.xpose.msra.mxu1 %v898_v28  ;;  %2075 = vmatmul.mubr.msk.bf16.vlgmr.msra.gmra.mrb[4].mxu0 %vm763_vm1, %v1015_v29 }
 0x320   : > { %2085 = vmatpush3.bf16.xpose.msra.mxu0 %v1145_v32  ;;  %2062 = vmatprep.mubr.msk.bf16.mxu1 %vm2275_vm0, %v2274_v4 }
 0x321   : > { %2086 = vmatprep.mubr.msk.bf16.mxu0 %vm2275_vm0, %v2274_v4  ;;  %2066 = vmatprep.subr.bf16.mxu1 %v2274_v4 }
 0x322   : > { %2096 = vmatprep.subr.bf16.mxu0 %v2274_v4 }
 0x326   : > { %2063 = vmatmul.mubr.msk.bf16.vlgmr.msra.gmra.mrb[12].mxu1 %vm763_vm1, %v890_v16 }
 0x327   : > { %2087 = vmatmul.mubr.msk.bf16.vlgmr.msra.gmra.mrb[8].mxu0 %vm763_vm1, %v1138_v34  ;;  %2068 = vmatprep.mubr.msk.bf16.mxu1 %vm2275_vm0, %v2274_v4 }
 0x328   : > { %2112 = vmatprep.mubr.msk.bf16.mxu0 %vm2275_vm0, %v2274_v4 }
 0x3f1   : > { %v2534_v35 = vpop.f32.mrb[8].mxu1 }
 0x3f2   : > { %v2058_v36 = vpop.f32.mrb[9].mxu1  ;;  %v1058_v37 = vpop.f32.mrb[4].mxu0 }
 0x3f3   : > { %v2536_v38 = vpop.f32.mrb[10].mxu1  ;;  %v2076_v39 = vpop.f32.mrb[5].mxu0  ;;  %v1065_v50 = vsel %vm816_vm2, %v1058_v37, -1e+30 }
 0x3f4   : > { %v2059_v40 = vpop.f32.mrb[11].mxu1  ;;  %v1061_v41 = vpop.f32.mrb[6].mxu0  ;;  %v1067_v60 = vsel %vm820_vm3, %v1065_v50, -inf }
 0x3f5   : > { %v2077_v42 = vpop.f32.mrb[7].mxu0  ;;  %v1066_v61 = vsel %vm817_vm4, %v1061_v41, -1e+30 }
 0x3f6   : > { %v1070_v63 = vsel %vm820_vm3, %v1066_v61, -inf }
 0x3f9   : > { %v934_v43 = vpop.f32.mrb[12].mxu1 }
 0x3fa   : > { %v941_v44 = vsel %vm816_vm2, %v934_v43, -1e+30  ;;  %v2064_v45 = vpop.f32.mrb[13].mxu1  ;;  %v1181_v46 = vpop.f32.mrb[8].mxu0 }
 0x3fb   : > { %v937_v47 = vpop.f32.mrb[14].mxu1  ;;  %v2088_v48 = vpop.f32.mrb[9].mxu0  ;;  %v943_v49 = vsel %vm820_vm3, %v941_v44, -inf  ;;  %v1188_v0 = vsel %vm816_vm2, %v1181_v46, -1e+30 }
 0x3fc   : > { %v942_v51 = vsel %vm817_vm4, %v937_v47, -1e+30  ;;  %v1184_v52 = vpop.f32.mrb[10].mxu0  ;;  %944 = vmax.xlane.f32.xlu0 %v943_v49  ;;  %v2065_v53 = vpop.f32.mrb[15].mxu1  ;;  %v1190_v1 = vsel %vm820_vm3, %v1188_v0, -inf }
 0x3fd   : > { %v2089_v54 = vpop.f32.mrb[11].mxu0  ;;  %v946_v58 = vsel %vm820_vm3, %v942_v51, -inf  ;;  %v1189_v59 = vsel %vm817_vm4, %v1184_v52, -1e+30 }
 0x3fe   : > { %947 = vmax.xlane.f32.xlu1 %v946_v58  ;;  %v1193_v62 = vsel %vm820_vm3, %v1189_v59, -inf }
 0x400   : > { %1068 = vmax.xlane.f32.xlu0 %v1067_v60 }
 0x402   : > { %1194 = vmax.xlane.f32.xlu1 %v1193_v62 }
 0x404   : > { %1071 = vmax.xlane.f32.xlu0 %v1070_v63 }
 0x408   : > { %1191 = vmax.xlane.f32.xlu0 %v1190_v1  ;;  %v2177_v1 = vld [vmem:[%s2761_s3] sm:$0xff]  }
 0x409   : > { %2097 = vmatpush3.bf16.msra.mxu0 %v2177_v1  ;;  %v2191_v1 = vld [vmem:[%s2765_s7 + $0x20] ss:$8 sps:$4 sm:$0xff]  }
 0x40a   : > { %2098 = vmatprep.subr.bf16.mxu0 %v2274_v4 }
 0x489   : > { %v945_v3 = vpop.xlane.xlu0 %944 }
 0x48a   : > { %v949_v12 = vsub.f32 %v941_v44, %v945_v3  ;;  %v2178_v3 = vld [vmem:[%s2761_s3 + $0x8] sm:$0xff]  }
 0x48b   : > { %v948_v5 = vpop.xlane.xlu1 %947  ;;  %2099 = vmatpush3.bf16.msra.mxu0 %v2178_v3  ;;  %v2196_v3 = vld [vmem:[%s2765_s7 + $0x34] ss:$8 sps:$4 sm:$0xff]  }
 0x48c   : > { %v950_v13 = vsub.f32 %v942_v51, %v948_v5  ;;  %v951_v17 = vmul.f32 1.442695, %v949_v12  ;;  %v2179_v5 = vld [vmem:[%s2761_s3 + $0x10] sm:$0xff]   ;;  %2100 = vmatprep.subr.bf16.mxu0 %v2274_v4 }
 0x48d   : > { %v1069_v6 = vpop.xlane.xlu0 %1068  ;;  %v2183_v12 = vld [vmem:[%s2761_s3 + $0x30] sm:$0xff]  }
 0x48e   : > { %v1073_v7 = vsub.f32 %v1065_v50, %v1069_v6  ;;  %v953_v18 = vmul.f32 1.442695, %v950_v13  ;;  %v2181_v6 = vld [vmem:[%s2761_s3 + $0x20] sm:$0xff]  }
 0x48f   : > { %v1195_v57 = vpop.xlane.xlu1 %1194  ;;  %2101 = vmatpush3.bf16.msra.mxu0 %v2179_v5  ;;  %v2194_v5 = vld [vmem:[%s2765_s7 + $0x30] ss:$8 sps:$4 sm:$0xff]  }
 0x490   : > { %v1075_v8 = vmul.f32 1.442695, %v1073_v7  ;;  %v1197_v9 = vsub.f32 %v1189_v59, %v1195_v57  ;;  %2102 = vmatprep.subr.bf16.mxu0 %v2274_v4 }
 0x491   : > { %v1072_v10 = vpop.xlane.xlu0 %1071 }
 0x492   : > { %2233 = vpow2.f32 %v1075_v8  ;;  %v1074_v11 = vsub.f32 %v1066_v61, %v1072_v10  ;;  %v1200_v14 = vmul.f32 1.442695, %v1197_v9  ;;  %v2182_v8 = vld [vmem:[%s2761_s3 + $0x28] sm:$0xff]  }
 0x494   : > { %v1077_v15 = vmul.f32 1.442695, %v1074_v11 }
 0x495   : > { %v1192_v56 = vpop.xlane.xlu0 %1191 }
 0x496   : > { %2235 = vpow2.f32 %v1077_v15  ;;  %v1196_v16 = vsub.f32 %v1188_v0, %v1192_v56  ;;  %v2184_v15 = vld [vmem:[%s2761_s3 + $0x38] sm:$0xff]  }
 0x497   : > { %2237 = vpow2.f32 %v1200_v14 }
 0x498   : > { %v1198_v19 = vmul.f32 1.442695, %v1196_v16 }
 0x49a   : > { %2239 = vpow2.f32 %v1198_v19 }
 0x49b   : > { %2241 = vpow2.f32 %v951_v17 }
 0x49c   : > { %v2234_v20 = vpop.eup %2233  ;;  %2243 = vpow2.f32 %v953_v18 }
 0x49d   : > { %v1079_v21 = vsel %vm820_vm3, %v2234_v20, 0.0 }
 0x49e   : > { %1080 = vadd.xlane.f32.xlu0 %v1079_v21 }
 0x4a0   : > { %v2236_v22 = vpop.eup %2235 }
 0x4a1   : > { %v1082_v25 = vsel %vm820_vm3, %v2236_v22, 0.0  ;;  %v2238_v26 = vpop.eup %2237 }
 0x4a2   : > { %1083 = vadd.xlane.f32.xlu1 %v1082_v25  ;;  %v1205_v32 = vsel %vm820_vm3, %v2238_v26, 0.0 }
 0x4a4   : > { %v2240_v27 = vpop.eup %2239 }
 0x4a5   : > { %v2242_v28 = vpop.eup %2241  ;;  %v1202_v29 = vsel %vm820_vm3, %v2240_v27, 0.0 }
 0x4a6   : > { %v2244_v34 = vpop.eup %2243  ;;  %1203 = vadd.xlane.f32.xlu0 %v1202_v29  ;;  %1206 = vadd.xlane.f32.xlu1 %v1205_v32  ;;  %v955_v36 = vsel %vm820_vm3, %v2242_v28, 0.0 }
 0x4a7   : > { %v958_v37 = vsel %vm820_vm3, %v2244_v34, 0.0 }
 0x4aa   : > { %956 = vadd.xlane.f32.xlu0 %v955_v36  ;;  %959 = vadd.xlane.f32.xlu1 %v958_v37 }
 0x4bb   : > { %1090 = vrot.lane.b32.xlu1 %v2487_v55, %s2278_s16 }
 0x4bf   : > { %1213 = vrot.lane.b32.xlu1 %v2487_v55, %s2277_s30 }
 0x4c0   : > { %967 = vrot.lane.b32.xlu0 %v2487_v55, %s2276_s29 }
 0x52b   : > { %v1081_v39 = vpop.xlane.xlu0 %1080 }
 0x52f   : > { %v1084_v40 = vpop.xlane.xlu1 %1083 }
 0x533   : > { %v1204_v41 = vpop.xlane.xlu0 %1203  ;;  %v1207_v42 = vpop.xlane.xlu1 %1206 }
 0x537   : > { %v957_v43 = vpop.xlane.xlu0 %956  ;;  %v960_v44 = vpop.xlane.xlu1 %959 }
 0x538   : > { %2245 = vrcp.f32 %v957_v43 }
 0x539   : > { %2247 = vrcp.f32 %v960_v44 }
 0x53a   : > { %2249 = vrcp.f32 %v1084_v40 }
 0x53b   : > { %v968_v45 = vpop.permute.xlu0 %967  ;;  %2251 = vrcp.f32 %v1081_v39  ;;  %v1091_v51 = vpop.permute.xlu1 %1090 }
 0x53c   : > { %2067 = vmatpush3.bf16.msra.mxu1 %v968_v45  ;;  %2253 = vrcp.f32 %v1204_v41  ;;  %v1922_v45 = vld [vmem:[%s2762_s4] ss:$0 sm:$0xff] }
 0x53d   : > { %2078 = vmatprep.subr.bf16.mxu1 %v2274_v4  ;;  %2255 = vrcp.f32 %v1207_v42 }
 0x53f   : > { %v1214_v61 = vpop.permute.xlu1 %1213 }
 0x542   : > { %v2246_v46 = vpop.eup %2245 }
 0x543   : > { %v2248_v47 = vpop.eup %2247  ;;  %v962_v48 = vmul.f32 %v2246_v46, %v2242_v28 }
 0x544   : > { %v964_v49 = vmul.f32 %v2248_v47, %v2244_v34  ;;  %v2250_v50 = vpop.eup %2249 }
 0x545   : > { %v2252_v52 = vpop.eup %2251  ;;  %v1088_v53 = vmul.f32 %v2250_v50, %v2236_v22 }
 0x546   : > { %v965_v55 = vpack.c.bf16 %v964_v49, %v962_v48  ;;  %v1086_v54 = vmul.f32 %v2252_v52, %v2234_v20  ;;  %v2254_v58 = vpop.eup %2253  ;;  %v2187_v52 = vld [vmem:[%s2765_s7 + $0x4] ss:$8 sps:$4 sm:$0xff]  }
 0x547   : > { %v2256_v60 = vpop.eup %2255  ;;  %v1209_v62 = vmul.f32 %v2254_v58, %v2240_v27 }
 0x548   : > { %2069 = vmatmul.mubr.msk.bf16.vlgmr.msra.gmra.mrb[16].mxu1 %vm820_vm3, %v965_v55  ;;  %v1089_v59 = vpack.c.bf16 %v1088_v53, %v1086_v54  ;;  %v1211_v63 = vmul.f32 %v2256_v60, %v2238_v26  ;;  %v2190_v53 = vld [vmem:[%s2765_s7 + $0x14] ss:$8 sps:$4 sm:$0xff]  }
 0x549   : > { %2079 = vmatpush3.bf16.msra.mxu1 %v1091_v51  ;;  %2080 = vmatprep.mubr.msk.bf16.mxu1 %vm2275_vm0, %v2274_v4  ;;  %v2185_v51 = vld [vmem:[%s2765_s7] ss:$8 sps:$4 sm:$0xff]  }
 0x54a   : > { %2090 = vmatprep.subr.bf16.mxu1 %v2274_v4  ;;  %v1212_v0 = vpack.c.bf16 %v1211_v63, %v1209_v62 }
 0x550   : > { %2081 = vmatmul.mubr.msk.bf16.vlgmr.msra.gmra.mrb[20].mxu1 %vm820_vm3, %v1089_v59 }
 0x551   : > { %2091 = vmatpush3.bf16.msra.mxu1 %v1214_v61  ;;  %2092 = vmatprep.mubr.msk.bf16.mxu1 %vm2275_vm0, %v2274_v4 }
 0x552   : > { %1557 = vmatprep.subr.bf16.mxu1 %v2187_v52 }
 0x558   : > { %2093 = vmatmul.mubr.msk.bf16.vlgmr.msra.gmra.mrb[24].mxu1 %vm820_vm3, %v1212_v0  ;;  %v2193_v0 = vld [vmem:[%s2765_s7 + $0x24] ss:$8 sps:$4 sm:$0xff]  }
 0x559   : > { %1589 = vmatprep.mubr.bf16.mxu1 %v2273_v2  ;;  %v2180_v2 = vld [vmem:[%s2761_s3 + $0x18] sm:$0xff]   ;;  %1558 = vmatpush1.bf16.msra.mxu1 %v2185_v51 }
 0x55a   : > { %2103 = vmatpush3.bf16.msra.mxu0 %v2180_v2  ;;  %1559 = vmatprep.subr.bf16.mxu1 %v2190_v53  ;;  %v2199_v2 = vld [vmem:[%s2765_s7 + $0x44] ss:$8 sps:$4 sm:$0xff]  }
 0x55b   : > { %2104 = vmatprep.subr.bf16.mxu0 %v2274_v4 }
 0x55e   : > { %2105 = vmatpush3.bf16.msra.mxu0 %v2181_v6  ;;  %v2197_v6 = vld [vmem:[%s2765_s7 + $0x40] ss:$8 sps:$4 sm:$0xff]  }
 0x55f   : > { %2106 = vmatprep.subr.bf16.mxu0 %v2274_v4 }
 0x562   : > { %2107 = vmatpush3.bf16.msra.mxu0 %v2182_v8  ;;  %v2205_v8 = vld [vmem:[%s2765_s7 + $0x64] ss:$8 sps:$4 sm:$0xff]  }
 0x563   : > { %2108 = vmatprep.subr.bf16.mxu0 %v2274_v4 }
 0x566   : > { %2109 = vmatpush3.bf16.msra.mxu0 %v2183_v12  ;;  %v2209_v12 = vld [vmem:[%s2767_s9 + $0x40] sm:$0xff]  }
 0x567   : > { %2110 = vmatprep.subr.bf16.mxu0 %v2274_v4 }
 0x56a   : > { %2111 = vmatpush3.bf16.msra.mxu0 %v2184_v15  ;;  %v2212_v15 = vld [vmem:[%s2767_s9 + $0x8] sm:$0xff]  }
 0x56b   : > { %2006 = vmatprep.subr.bf16.mxu0 %v2209_v12 }
 0x61b   : > { %v1007_v7 = vpop.f32.mrb[16].mxu1 }
 0x61c   : > { %v2070_v57 = vpop.f32.mrb[17].mxu1 }
 0x61d   : > { %v1010_v9 = vpop.f32.mrb[18].mxu1  ;;  %v2200_v57 = vld [vmem:[%s2765_s7 + $0x50] ss:$8 sps:$4 sm:$0xff]  }
 0x61e   : > { %v2130_v10 = vpack.i.bf16 %v1010_v9, %v1007_v7  ;;  %v2071_v11 = vpop.f32.mrb[19].mxu1  ;;  %v2202_v7 = vld [vmem:[%s2765_s7 + $0x54] ss:$8 sps:$4 sm:$0xff]   ;;  %v2203_v9 = vld [vmem:[%s2765_s7 + $0x60] ss:$8 sps:$4 sm:$0xff]  }
 0x61f   : > { %v2206_v11 = vld [vmem:[%s2765_s7 + $0x70] ss:$8 sps:$4 sm:$0xff]  }
 0x620   : > { %2131 = vrot.lane.b32.xlu1 %v2130_v10, %s2277_s30  ;;  %v2208_v10 = vld [vmem:[%s2765_s7 + $0x74] ss:$8 sps:$4 sm:$0xff]  }
 0x623   : > { %v1130_v13 = vpop.f32.mrb[20].mxu1 }
 0x624   : > { %v2082_v14 = vpop.f32.mrb[21].mxu1 }
 0x625   : > { %v1133_v56 = vpop.f32.mrb[22].mxu1  ;;  %v2211_v14 = vld [vmem:[%s2767_s9 + $0x48] sm:$0xff]  }
 0x626   : > { %v2135_v16 = vpack.i.bf16 %v1133_v56, %v1130_v13  ;;  %v2083_v17 = vpop.f32.mrb[23].mxu1  ;;  %v2210_v13 = vld [vmem:[%s2767_s9] sm:$0xff]   ;;  %v2213_v56 = vld [vmem:[%s2767_s9 + $0x50] sm:$0xff]  }
 0x627   : > { %v2215_v17 = vld [vmem:[%s2767_s9 + $0x58] sm:$0xff]  }
 0x628   : > { %2136 = vrot.lane.b32.xlu0 %v2135_v16, %s2278_s16  ;;  %v2214_v16 = vld [vmem:[%s2767_s9 + $0x10] sm:$0xff]  }
 0x62b   : > { %v1253_v18 = vpop.f32.mrb[24].mxu1 }
 0x62c   : > { %v2094_v19 = vpop.f32.mrb[25].mxu1 }
 0x62d   : > { %v1256_v20 = vpop.f32.mrb[26].mxu1  ;;  %v2217_v19 = vld [vmem:[%s2767_s9 + $0x60] sm:$0xff]  }
 0x62e   : > { %v2140_v21 = vpack.i.bf16 %v1256_v20, %v1253_v18  ;;  %v2095_v22 = vpop.f32.mrb[27].mxu1  ;;  %v2216_v18 = vld [vmem:[%s2767_s9 + $0x18] sm:$0xff]   ;;  %v2218_v20 = vld [vmem:[%s2767_s9 + $0x20] sm:$0xff]  }
 0x630   : > { %2141 = vrot.lane.b32.xlu1 %v2140_v21, %s2276_s29  ;;  %v2219_v21 = vld [vmem:[%s2767_s9 + $0x68] sm:$0xff]  }
 0x692   : > { %v2132_v25 = vpop.permute.xlu1 %2131 }
 0x693   : > { %v2134_v26 = vunpack.i.h.bf16 %v2132_v25  ;;  %v2133_v27 = vunpack.i.l.bf16 %v2132_v25 }
 0x695   : > { %v1285_v34 = vsel %vm763_vm1, %v2536_v38, %v2134_v26  ;;  %v1284_v36 = vsel %vm763_vm1, %v2534_v35, %v2133_v27 }
 0x69a   : > { %v2137_v4 = vpop.permute.xlu0 %2136 }
 0x69b   : > { %v2139_v28 = vunpack.i.h.bf16 %v2137_v4  ;;  %v2138_v29 = vunpack.i.l.bf16 %v2137_v4 }
 0x69d   : > { %v1288_v40 = vsel %vm1286_vm5, %v1285_v34, %v2139_v28  ;;  %v1287_v41 = vsel %vm1286_vm5, %v1284_v36, %v2138_v29  ;;  %v1931_v34 = vld [vmem:[%s2763_s5] ss:$0 sm:$0xff] }
 0x6a2   : > { %v2142_v32 = vpop.permute.xlu1 %2141 }
 0x6a3   : > { %v2144_v37 = vunpack.i.h.bf16 %v2142_v32  ;;  %v2143_v39 = vunpack.i.l.bf16 %v2142_v32 }
 0x6a5   : > { %v1291_v42 = vsel %vm1289_vm6, %v1288_v40, %v2144_v37  ;;  %v1290_v43 = vsel %vm1289_vm6, %v1287_v41, %v2143_v39  ;;  %v1932_v40 = vld [vmem:[%s2764_s6] ss:$0 sm:$0xff] }
 0x6a6   : > { %v1292_v44 = vpack.c.bf16 %v1291_v42, %v1290_v43 }
 0x6a8   : > { %2113 = vmatmul.mubr.bf16.vlgmr.msra.gmra.mrb[12].mxu0 %v1292_v44 }
 0x6a9   : > { %2007 = vmatpush3.bf16.msra.mxu0 %v2210_v13 }
 0x6aa   : > { %2008 = vmatprep.subr.bf16.mxu0 %v2211_v14 }
 0x6ad   : > { %2009 = vmatpush3.bf16.msra.mxu0 %v2212_v15 }
 0x6ae   : > { %2010 = vmatprep.subr.bf16.mxu0 %v2213_v56 }
 0x6b1   : > { %2011 = vmatpush3.bf16.msra.mxu0 %v2214_v16 }
 0x6b2   : > { %2012 = vmatprep.subr.bf16.mxu0 %v2215_v17 }
 0x6b5   : > { %2013 = vmatpush3.bf16.msra.mxu0 %v2216_v18 }
 0x6b6   : > { %2014 = vmatprep.subr.bf16.mxu0 %v2217_v19 }
 0x6b9   : > { %2015 = vmatpush3.bf16.msra.mxu0 %v2218_v20 }
 0x6ba   : > { %2016 = vmatprep.subr.bf16.mxu0 %v2219_v21 }
 0x77b   : > { %v1398_v46 = vpop.f32.mrb[12].mxu0 }
 0x77c   : > { %v1399_v47 = vadd.f32 %v1922_v45, %v1398_v46  ;;  %v2114_v48 = vpop.f32.mrb[13].mxu0  ;;  %v2221_v46 = vld [vmem:[%s2767_s9 + $0x70] sm:$0xff]  }
 0x77d   : > { %v1401_v49 = vpop.f32.mrb[14].mxu0  ;;  %v2223_v48 = vld [vmem:[%s2767_s9 + $0x78] sm:$0xff]  }
 0x77e   : > { %v1402_v38 = vadd.f32 %v1922_v45, %v1401_v49  ;;  %v2115_v55 = vpop.f32.mrb[15].mxu0  ;;  %v1405_v35 = vadd.f32 %v1399_v47, %v2443_v23  ;;  %v2188_v23 = vld [vmem:[%s2765_s7 + $0x10] ss:$8 sps:$4 sm:$0xff]   ;;  %v2220_v45 = vld [vmem:[%s2767_s9 + $0x28] sm:$0xff]  }
 0x77f   : > { %1560 = vmatpush1.bf16.msra.mxu1 %v2188_v23  ;;  %2017 = vmatpush3.bf16.msra.mxu0 %v2220_v45  ;;  %v2222_v47 = vld [vmem:[%s2767_s9 + $0x30] sm:$0xff]   ;;  %v2224_v49 = vld [vmem:[%s2767_s9 + $0x38] sm:$0xff]  }
 0x780   : > { %1409 = vadd.xlane.f32.xlu0 %v1405_v35  ;;  %v1406_v50 = vadd.f32 %v1402_v38, %v2445_v24  ;;  %1561 = vmatprep.subr.bf16.mxu1 %v2193_v0  ;;  %v1465_v38 = vld [vmem:[%s2766_s8] sm:$0x3] }
 0x781   : > { %2018 = vmatprep.subr.bf16.mxu0 %v2221_v46  ;;  %v1470_v55 = vrot.slane %v1465_v38, %v535_v31 }
 0x782   : > { %1411 = vadd.xlane.f32.xlu1 %v1406_v50 }
 0x783   : > { %1562 = vmatpush1.bf16.msra.mxu1 %v2191_v1  ;;  %2019 = vmatpush3.bf16.msra.mxu0 %v2222_v47 }
 0x784   : > { %1563 = vmatprep.subr.bf16.mxu1 %v2196_v3  ;;  %2020 = vmatprep.subr.bf16.mxu0 %v2223_v48 }
 0x787   : > { %1564 = vmatpush1.bf16.msra.mxu1 %v2194_v5  ;;  %2021 = vmatpush3.bf16.msra.mxu0 %v2224_v49 }
 0x788   : > { %1565 = vmatprep.subr.bf16.mxu1 %v2199_v2 }
 0x78b   : > { %1566 = vmatpush1.bf16.msra.mxu1 %v2197_v6 }
 0x78c   : > { %1567 = vmatprep.subr.bf16.mxu1 %v2202_v7 }
 0x78f   : > { %1568 = vmatpush1.bf16.msra.mxu1 %v2200_v57 }
 0x790   : > { %1569 = vmatprep.subr.bf16.mxu1 %v2205_v8 }
 0x793   : > { %1570 = vmatpush1.bf16.msra.mxu1 %v2203_v9 }
 0x794   : > { %1571 = vmatprep.subr.bf16.mxu1 %v2208_v10 }
 0x797   : > { %1572 = vmatpush1.bf16.msra.mxu1 %v2206_v11 }
 0x80d   : > { %v1410_v24 = vpop.xlane.xlu0 %1409 }
 0x80e   : > { %v1414_v54 = vmul.f32 0.0078125, %v1410_v24 }
 0x80f   : > { %v1412_v58 = vpop.xlane.xlu1 %1411 }
 0x810   : > { %v1416_v59 = vsub.f32 %v1405_v35, %v1414_v54  ;;  %v1415_v60 = vmul.f32 0.0078125, %v1412_v58  ;;  %v1474_v35 = vrot.slane %v1465_v38, %v539_v33 }
 0x812   : > { %v2639_v61 = vsub.f32 %v1406_v50, %v1415_v60  ;;  %v1418_v62 = vmul.f32 %v1416_v59, %v1416_v59 }
 0x814   : > { %1420 = vadd.xlane.f32.xlu0 %v1418_v62  ;;  %v1419_v63 = vmul.f32 %v2639_v61, %v2639_v61 }
 0x818   : > { %1422 = vadd.xlane.f32.xlu0 %v1419_v63 }
 0x8a1   : > { %v1421_v22 = vpop.xlane.xlu0 %1420 }
 0x8a2   : > { %v1424_v25 = vmul.f32 0.0078125, %v1421_v22 }
 0x8a4   : > { %v1426_v4 = vadd.f32 1e-05, %v1424_v25  ;;  %v1966_v25 = vld [vmem:[%s2769_s11] ss:$0 sm:$0xff] }
 0x8a5   : > { %v1423_v26 = vpop.xlane.xlu0 %1422 }
 0x8a6   : > { %2257 = vrsqrt.f32 %v1426_v4  ;;  %v1425_v27 = vmul.f32 0.0078125, %v1423_v26 }
 0x8a8   : > { %v1427_v28 = vadd.f32 1e-05, %v1425_v27  ;;  %v1967_v27 = vld [vmem:[%s2770_s12] ss:$0 sm:$0xff] }
 0x8aa   : > { %2259 = vrsqrt.f32 %v1427_v28 }
 0x8b0   : > { %v2258_v29 = vpop.eup %2257 }
 0x8b1   : > { %v1430_v32 = vmul.f32 %v2258_v29, %v1416_v59 }
 0x8b3   : > { %v1438_v39 = vmul.f32 %v1931_v34, %v1430_v32 }
 0x8b4   : > { %v2260_v36 = vpop.eup %2259 }
 0x8b5   : > { %v1431_v37 = vmul.f32 %v2260_v36, %v2639_v61  ;;  %v1446_v42 = vadd.f32 %v1932_v40, %v1438_v39 }
 0x8b7   : > { %v1439_v41 = vmul.f32 %v1931_v34, %v1431_v37 }
 0x8b9   : > { %v1447_v43 = vadd.f32 %v1932_v40, %v1439_v41 }
 0x8bb   : > { %v1448_v44 = vpack.c.bf16 %v1447_v43, %v1446_v42 }
 0x8bd   : > { %1590 = vmatmul.mubr.bf16.vlgmr.msra.gmra.mrb[28].mxu1 %v1448_v44 }
 0x990   : > { %v1591_v50 = vpop.f32.mrb[28].mxu1 }
 0x991   : > { %v1592_v51 = vadd.f32 %v1591_v50, %v1470_v55  ;;  %v1593_v52 = vpop.f32.mrb[29].mxu1 }
 0x992   : > { %v1594_v53 = vadd.f32 %v1593_v52, %v1474_v35  ;;  %v1595_v23 = vpop.f32.mrb[30].mxu1 }
 0x993   : > { %v1596_v24 = vadd.f32 %v1595_v23, %v1470_v55  ;;  %v1597_v54 = vpop.f32.mrb[31].mxu1  ;;  %v1600_v59 = vmax.f32 %v1592_v51, 0.0 }
 0x994   : > { %v1598_v58 = vadd.f32 %v1597_v54, %v1474_v35  ;;  %v1601_v61 = vmax.f32 %v1594_v53, 0.0 }
 0x995   : > { %v1602_v60 = vmax.f32 %v1596_v24, 0.0 }
 0x996   : > { %v1603_v62 = vmax.f32 %v1598_v58, 0.0 }
 0x997   : > { %v1604_v63 = vpack.c.bf16 %v1602_v60, %v1600_v59 }
 0x998   : > { %v1605_v0 = vpack.c.bf16 %v1603_v62, %v1601_v61 }
 0x99a   : > { %1773 = vmatprep.mubr.bf16.mxu0 %v1605_v0 }
 0x99b   : > { %1774 = vmatmul.mubr.bf16.vlgmr.msra.gmra.mrb[16].mxu0 %v1604_v63 }
 0xa6e   : > { %v2022_v31 = vpop.f32.mrb[16].mxu0 }
 0xa6f   : > { %v2023_v33 = vpop.f32.mrb[17].mxu0 }
 0xa70   : > { %v2024_v1 = vadd.f32 %v2023_v33, %v2022_v31  ;;  %v2025_v3 = vpop.f32.mrb[18].mxu0 }
 0xa71   : > { %v2026_v5 = vpop.f32.mrb[19].mxu0 }
 0xa72   : > { %v1776_v2 = vadd.f32 %v2024_v1, %v1949_v30  ;;  %v2027_v6 = vadd.f32 %v2026_v5, %v2025_v3 }
 0xa74   : > { %v1779_v7 = vadd.f32 %v2027_v6, %v1949_v30  ;;  %v1782_v57 = vadd.f32 %v1776_v2, %v1446_v42 }
 0xa76   : > { %1786 = vadd.xlane.f32.xlu0 %v1782_v57  ;;  %v1783_v8 = vadd.f32 %v1779_v7, %v1447_v43 }
 0xa78   : > { %1788 = vadd.xlane.f32.xlu1 %v1783_v8 }
 0xb03   : > { %v1787_v9 = vpop.xlane.xlu0 %1786 }
 0xb04   : > { %v1790_v10 = vmul.f32 0.0078125, %v1787_v9 }
 0xb05   : > { %v1789_v11 = vpop.xlane.xlu1 %1788 }
 0xb06   : > { %v1792_v12 = vsub.f32 %v1782_v57, %v1790_v10  ;;  %v1791_v13 = vmul.f32 0.0078125, %v1789_v11 }
 0xb08   : > { %v1793_v14 = vsub.f32 %v1783_v8, %v1791_v13  ;;  %v1794_v15 = vmul.f32 %v1792_v12, %v1792_v12 }
 0xb0a   : > { %1796 = vadd.xlane.f32.xlu0 %v1794_v15  ;;  %v1795_v56 = vmul.f32 %v1793_v14, %v1793_v14 }
 0xb0c   : > { %1798 = vadd.xlane.f32.xlu1 %v1795_v56 }
 0xb97   : > { %v1797_v16 = vpop.xlane.xlu0 %1796 }
 0xb98   : > { %v1800_v17 = vmul.f32 0.0078125, %v1797_v16 }
 0xb99   : > { %v1799_v18 = vpop.xlane.xlu1 %1798 }
 0xb9a   : > { %v1802_v19 = vadd.f32 1e-05, %v1800_v17  ;;  %v1801_v20 = vmul.f32 0.0078125, %v1799_v18 }
 0xb9c   : > { %2261 = vrsqrt.f32 %v1802_v19  ;;  %v1803_v21 = vadd.f32 1e-05, %v1801_v20 }
 0xb9e   : > { %2263 = vrsqrt.f32 %v1803_v21 }
 0xba6   : > { %v2262_v22 = vpop.eup %2261 }
 0xba7   : > { %v1806_v4 = vmul.f32 %v2262_v22, %v1792_v12 }
 0xba8   : > { %v2264_v26 = vpop.eup %2263 }
 0xba9   : > { %v1814_v28 = vmul.f32 %v1966_v25, %v1806_v4  ;;  %v1807_v29 = vmul.f32 %v2264_v26, %v1793_v14 }
 0xbab   : > { %v1822_v32 = vadd.f32 %v1967_v27, %v1814_v28  ;;  %v1815_v34 = vmul.f32 %v1966_v25, %v1807_v29 }
 0xbad   : > { %1824 = vst [vmem:[%s494_s13] sm:$0xff] %v1822_v32  ;;  %v1823_v36 = vadd.f32 %v1967_v27, %v1815_v34 }
 0xbaf   : > { %1825 = vst [vmem:[%s494_s13 + $0x8] sm:$0xff] %v1823_v36 }
 0xbb0 PF: > { %s25_s18 = sadd.s32 1, %s2271_s18  }
 0xbb1   : > { %p22_p4 = scmp.ge.s32.totalorder %s25_s18, 4  }
 0xbb3   :  { %24 = sbr.rel (!%p22_p4) target bundleno = 1 (0x1), region = 110 }

// kernel: transformer_forward.7
= control target key start
LH: loop header
LB: loop body
LE: loop exit
PB: predicated region body
PF: predicated region fallthrough
CT: control target
= control target key end

     0   :  { %s4126_s0 = inlined_call_operand.vmem [shape: f32[2,8,128], index: 0, kind: input, shape index: {}]   ;;  %s4127_s1 = inlined_call_operand.vmem [shape: f32[2,16,128], index: 1, kind: input, shape index: {}]   ;;  %s4128_s2 = inlined_call_operand.vmem [shape: bf16[128,384], index: 2, kind: input, shape index: {}]   ;;  %s4129_s3 = inlined_call_operand.vmem [shape: f32[1,384], index: 3, kind: input, shape index: {}]   ;;  %s4130_s4 = inlined_call_operand.vmem [shape: bf16[128,128], index: 4, kind: input, shape index: {}]   ;;  %s4131_s5 = inlined_call_operand.vmem [shape: f32[1,128], index: 5, kind: input, shape index: {}]   ;;  %s4132_s6 = inlined_call_operand.vmem [shape: f32[1,128], index: 6, kind: input, shape index: {}]   ;;  %s4133_s7 = inlined_call_operand.vmem [shape: f32[1,128], index: 7, kind: input, shape index: {}]   ;;  %s4134_s8 = inlined_call_operand.vmem [shape: bf16[128,128], index: 8, kind: input, shape index: {}]   ;;  %s4135_s9 = inlined_call_operand.vmem [shape: f32[1,128], index: 9, kind: input, shape index: {}]   ;;  %s4136_s10 = inlined_call_operand.vmem [shape: bf16[128,256], index: 10, kind: input, shape index: {}]   ;;  %s4137_s11 = inlined_call_operand.vmem [shape: f32[1,256], index: 11, kind: input, shape index: {}]   ;;  %s4138_s12 = inlined_call_operand.vmem [shape: bf16[128,128], index: 12, kind: input, shape index: {}]   ;;  %s4139_s13 = inlined_call_operand.vmem [shape: f32[1,128], index: 13, kind: input, shape index: {}]   ;;  %s4140_s14 = inlined_call_operand.vmem [shape: f32[1,128], index: 14, kind: input, shape index: {}]   ;;  %s4141_s15 = inlined_call_operand.vmem [shape: f32[1,128], index: 15, kind: input, shape index: {}]   ;;  %s4142_s16 = inlined_call_operand.vmem [shape: bf16[128,256], index: 16, kind: input, shape index: {}]   ;;  %s4143_s17 = inlined_call_operand.vmem [shape: f32[1,256], index: 17, kind: input, shape index: {}]   ;;  %s4144_s18 = inlined_call_operand.vmem [shape: bf16[256,128], index: 18, kind: input, shape index: {}]   ;;  %s4145_s19 = inlined_call_operand.vmem [shape: f32[1,128], index: 19, kind: input, shape index: {}]   ;;  %s4146_s20 = inlined_call_operand.vmem [shape: f32[1,128], index: 20, kind: input, shape index: {}]   ;;  %s4147_s21 = inlined_call_operand.vmem [shape: f32[1,128], index: 21, kind: input, shape index: {}]   ;;  %s4148_s22 = inlined_call_operand.vmem [shape: f32[2,8,128], index: 22, kind: output, shape index: {}]  }
   0x1   :  { %4158 = sst [smem:[#allocation2_spill]] %s4126_s0 }
   0x2   :  { %4159 = sst [smem:[#allocation3_spill]] %s4127_s1 }
   0x3   :  { %4160 = sst [smem:[#allocation4_spill]] %s4128_s2 }
   0x4   :  { %4161 = sst [smem:[#allocation5_spill]] %s4129_s3  ;;  %s3547_s3 = smov 0  }
   0x5   :  { %4162 = sst [smem:[#allocation6_spill]] %s4130_s4 }
   0x6   :  { %4163 = sst [smem:[#allocation7_spill]] %s4131_s5 }
   0x7   :  { %4164 = sst [smem:[#allocation8_spill]] %s4132_s6 }
   0x8 LB: > { %s2846_s28 = sadd.s32 4294967295, %s3424_s3   ;;  %p2850_p0 = scmp.ge.s32.totalorder %s3424_s3, 1  ;;  %s3424_s3 = sphi %s3547_s3, %s32_s3  }
   0x9   : > { %p621_p1 = scmp.lt.s32.totalorder %s3424_s3, 3 }
   0xb   : > { %p622_p2 = pnand %p2850_p0, %p621_p1 }
   0xc   : > { %s4165_s4 = sld [smem:[#allocation4_spill]] (!%p622_p2)  ;;  %v3426_v2 = vmov (!%p622_p2), 0   ;;  %v3427_v4 = vmov (!%p622_p2), 0.0   ;;  %p686_p3 = scmp.lt.s32.totalorder (!%p622_p2), %s2846_s28, 1  ;;  %vm3428_vm0 = vmmov (!%p622_p2), 0   ;;  %v738_v28 = vlaneseq (!%p622_p2) }
   0xd   : > { %625 = sbr.rel (%p622_p2) target bundleno = 5136 (0x1410), region = 108  ;;  %913 = vmatprep.mubr.bf16.mxu0 (!%p622_p2), %v3426_v2  ;;  %3070 = vmatprep.subr.bf16.mxu1 (!%p622_p2), %v3427_v4  ;;  %s4166_s24 = sld [smem:[#allocation2_spill]] (!%p622_p2)  ;;  %vm965_vm1 = vcmask (!%p622_p2), 261120   ;;  %vm1034_vm2 = vcmask (!%p622_p2), 1043456   ;;  %vm1018_vm4 = vcmask (!%p622_p2), 64512   ;;  %vm1427_vm5 = vcmask (!%p622_p2), 523264  }
   0xe   : > { %3086 = vmatprep.mubr.msk.bf16.mxu1 (!%p622_p2), %vm3428_vm0, %v3427_v4  ;;  %v3656_v29 = vshrl.u32 (!%p622_p2), %v738_v28, 7  ;;  %s4167_s26 = sld [smem:[#allocation5_spill]] (!%p622_p2)  ;;  %s4156_s27 = smov (!%p622_p2), 96   ;;  %v3685_v53 = vand.u32 (!%p622_p2), 127, %v738_v28  ;;  %vm1429_vm6 = vcmask (!%p622_p2), 785408   ;;  %vm1885_vm7 = vcmask (!%p622_p2), 130048  }
   0xf   : > { %s4154_s29 = smov (!%p622_p2), 64   ;;  %s4152_s30 = smov (!%p622_p2), 32  }
  0x10   : > { %v3659_v30 = vsub.s32 (!%p622_p2), 1, %v3656_v29  ;;  %v3665_v32 = vsub.s32 (!%p622_p2), 0, %v3656_v29  ;;  %v748_v44 = vsub.s32 (!%p622_p2), 2, %v3656_v29  ;;  %vm1016_vm3 = vcmp.le.s32.totalorder (!%p622_p2), %v3685_v53, %v3656_v29  ;;  %s4168_s1 = sld [smem:[#allocation6_spill]] (!%p622_p2)  ;;  %s4169_s5 = sld [smem:[#allocation7_spill]] (!%p622_p2) }
  0x11   : > { %s4170_s0 = sld [smem:[#allocation3_spill]] (!%p622_p2) }
  0x12   : > { %v3260_v0 = vld [vmem:[%s4165_s4 + $0x4] ss:$12 sps:$4 sm:$0xff] (!%p622_p2)   ;;  %v3262_v1 = vld [vmem:[%s4165_s4] ss:$12 sps:$4 sm:$0xff] (!%p622_p2)   ;;  %v3263_v3 = vld [vmem:[%s4165_s4 + $0x1c] ss:$12 sps:$4 sm:$0xff] (!%p622_p2)  }
  0x13   : > { %881 = vmatprep.subr.bf16.mxu0 (!%p622_p2), %v3260_v0  ;;  %v3265_v5 = vld [vmem:[%s4165_s4 + $0x18] ss:$12 sps:$4 sm:$0xff] (!%p622_p2)   ;;  %v3266_v6 = vld [vmem:[%s4165_s4 + $0x34] ss:$12 sps:$4 sm:$0xff] (!%p622_p2)   ;;  %v3268_v7 = vld [vmem:[%s4165_s4 + $0x30] ss:$12 sps:$4 sm:$0xff] (!%p622_p2)  }
  0x14   : > { %882 = vmatpush1.bf16.msra.mxu0 %v3262_v1  ;;  %v3269_v8 = vld [vmem:[%s4165_s4 + $0x4c] ss:$12 sps:$4 sm:$0xff]   ;;  %v3271_v9 = vld [vmem:[%s4165_s4 + $0x48] ss:$12 sps:$4 sm:$0xff]   ;;  %s4177_s28 = smov (!%p686_p3, %s2846_s28), 1 }
  0x15   : > { %883 = vmatprep.subr.bf16.mxu0 %v3263_v3  ;;  %v3284_v10 = vld [vmem:[%s4165_s4 + $0x8] ss:$12 sps:$4 sm:$0xff]   ;;  %v3272_v11 = vld [vmem:[%s4165_s4 + $0x64] ss:$12 sps:$4 sm:$0xff]   ;;  %v3285_v12 = vld [vmem:[%s4165_s4 + $0x20] ss:$12 sps:$4 sm:$0xff]  }
  0x16   : > { %3071 = vmatpush3.bf16.msra.mxu1 %v3284_v10  ;;  %s4151_s2 = sshll.u32 %s4177_s28, 3  ;;  %v3274_v13 = vld [vmem:[%s4165_s4 + $0x60] ss:$12 sps:$4 sm:$0xff]   ;;  %v3275_v14 = vld [vmem:[%s4165_s4 + $0x7c] ss:$12 sps:$4 sm:$0xff]  }
  0x17   : > { %3072 = vmatprep.subr.bf16.mxu1 %v3427_v4  ;;  %v3277_v15 = vld [vmem:[%s4165_s4 + $0x78] ss:$12 sps:$4 sm:$0xff]   ;;  %v3278_v17 = vld [vmem:[%s4165_s4 + $0x94] ss:$12 sps:$4 sm:$0xff]   ;;  %v3287_v18 = vld [vmem:[%s4165_s4 + $0x50] ss:$12 sps:$4 sm:$0xff]   ;;  %s689_s6 = scalar_lea.vmem %s4166_s24, %s4151_s2 }
  0x18   : > { %884 = vmatpush1.bf16.msra.mxu0 %v3265_v5  ;;  %v3286_v16 = vld [vmem:[%s4165_s4 + $0x38] ss:$12 sps:$4 sm:$0xff]   ;;  %v3280_v19 = vld [vmem:[%s4165_s4 + $0x90] ss:$12 sps:$4 sm:$0xff]   ;;  %v3288_v21 = vld [vmem:[%s4165_s4 + $0x68] ss:$12 sps:$4 sm:$0xff]  }
  0x19   : > { %885 = vmatprep.subr.bf16.mxu0 %v3266_v6  ;;  %v3281_v20 = vld [vmem:[%s4165_s4 + $0xac] ss:$12 sps:$4 sm:$0xff]   ;;  %v3283_v22 = vld [vmem:[%s4165_s4 + $0xa8] ss:$12 sps:$4 sm:$0xff]   ;;  %v3631_v23 = vld [vmem:[%s689_s6] sm:$0xff]  ;;  %s2979_s24 = sshll.u32 %s4177_s28, 4 }
  0x1a   : > { %3073 = vmatpush3.bf16.msra.mxu1 %v3285_v12  ;;  %v3289_v24 = vld [vmem:[%s4165_s4 + $0x80] ss:$12 sps:$4 sm:$0xff]   ;;  %v703_v25 = vpack.c.bf16 %v3631_v23, %v3631_v23  ;;  %v3290_v26 = vld [vmem:[%s4165_s4 + $0x98] ss:$12 sps:$4 sm:$0xff]   ;;  %v3291_v27 = vld [vmem:[%s4165_s4 + $0xb0] ss:$12 sps:$4 sm:$0xff]  }
  0x1b   : > { %3074 = vmatprep.subr.bf16.mxu1 %v3427_v4  ;;  %v736_v31 = vld [vmem:[%s4167_s26] sm:$0x7]  ;;  %s4171_s26 = sld [smem:[#allocation8_spill]]  ;;  %s4174_s6 = smov 32  }
  0x1c   : > { %886 = vmatpush1.bf16.msra.mxu0 %v3268_v7  ;;  %v745_v33 = vrot.slane %v736_v31, %v3659_v30  ;;  %v741_v34 = vrot.slane %v736_v31, %v3665_v32  ;;  %v749_v45 = vrot.slane %v736_v31, %v748_v44 }
  0x1d   : > { %887 = vmatprep.subr.bf16.mxu0 %v3269_v8 }
  0x1e   : > { %3075 = vmatpush3.bf16.msra.mxu1 %v3286_v16 }
  0x1f   : > { %3076 = vmatprep.subr.bf16.mxu1 %v3427_v4 }
  0x20   : > { %888 = vmatpush1.bf16.msra.mxu0 %v3271_v9 }
  0x21   : > { %889 = vmatprep.subr.bf16.mxu0 %v3272_v11 }
  0x22   : > { %3077 = vmatpush3.bf16.msra.mxu1 %v3287_v18 }
  0x23   : > { %3078 = vmatprep.subr.bf16.mxu1 %v3427_v4 }
  0x24   : > { %890 = vmatpush1.bf16.msra.mxu0 %v3274_v13 }
  0x25   : > { %891 = vmatprep.subr.bf16.mxu0 %v3275_v14 }
  0x26   : > { %3079 = vmatpush3.bf16.msra.mxu1 %v3288_v21 }
  0x27   : > { %3080 = vmatprep.subr.bf16.mxu1 %v3427_v4 }
  0x28   : > { %892 = vmatpush1.bf16.msra.mxu0 %v3277_v15 }
  0x29   : > { %893 = vmatprep.subr.bf16.mxu0 %v3278_v17 }
  0x2a   : > { %3081 = vmatpush3.bf16.msra.mxu1 %v3289_v24 }
  0x2b   : > { %3082 = vmatprep.subr.bf16.mxu1 %v3427_v4 }
  0x2c   : > { %894 = vmatpush1.bf16.msra.mxu0 %v3280_v19 }
  0x2d   : > { %895 = vmatprep.subr.bf16.mxu0 %v3281_v20 }
  0x2e   : > { %3083 = vmatpush3.bf16.msra.mxu1 %v3290_v26 }
  0x2f   : > { %3084 = vmatprep.subr.bf16.mxu1 %v3427_v4 }
  0x30   : > { %896 = vmatpush1.bf16.msra.mxu0 %v3283_v22 }
  0x31   : > { %3114 = vmatprep.subr.bf16.mxu0 %v3427_v4 }
  0x32   : > { %3085 = vmatpush3.bf16.msra.mxu1 %v3291_v27 }
  0x33   : > { %914 = vmatmul.mubr.bf16.vlgmr.msra.gmra.mrb[0].mxu0 %v703_v25  ;;  %3090 = vmatprep.subr.bf16.mxu1 %v3427_v4 }
  0x34   : > { %3116 = vmatprep.mubr.msk.bf16.mxu0 %vm3428_vm0, %v3427_v4 }
  0x35   : > { %3087 = vmatmul.mubr.bf16.vlgmr.msra.gmra.mrb[0].mxu1 %v703_v25 }
  0x36   : > { %3092 = vmatprep.mubr.msk.bf16.mxu1 %vm3428_vm0, %v3427_v4 }
 0x106   : > { %v915_v35 = vpop.f32.mrb[0].mxu0 }
 0x107   : > { %v917_v36 = vpop.f32.mrb[1].mxu0  ;;  %v916_v40 = vadd.f32 %v915_v35, %v741_v34 }
 0x108   : > { %v918_v37 = vadd.f32 %v917_v36, %v745_v33  ;;  %v919_v38 = vpop.f32.mrb[2].mxu0  ;;  %v956_v46 = vpop.f32.mrb[0].mxu1 }
 0x109   : > { %v920_v39 = vpop.f32.mrb[3].mxu0  ;;  %v962_v43 = vpack.c.bf16 %v916_v40, %v916_v40  ;;  %v957_v47 = vadd.f32 %v956_v46, %v749_v45  ;;  %v3088_v48 = vpop.f32.mrb[1].mxu1 }
 0x10a   : > { %v963_v41 = vpack.c.bf16 %v918_v37, %v918_v37  ;;  %v959_v49 = vpop.f32.mrb[2].mxu1 }
 0x10b   : > { %v3680_v50 = vpack.c.bf16 %v957_v47, %v957_v47  ;;  %v3089_v51 = vpop.f32.mrb[3].mxu1 }
 0x10c   : > { %1082 = vrot.lane.b32.xlu1 %v963_v41, %s4156_s27  ;;  %v970_v42 = vsel %vm965_vm1, %v963_v41, 0 }
 0x10d   : > { %3091 = vmatpush3.bf16.xpose.msra.mxu1 %v970_v42  ;;  %v1036_v52 = vsel %vm1034_vm2, %v3680_v50, 0 }
 0x10e   : > { %3096 = vmatprep.subr.bf16.mxu1 %v3427_v4 }
 0x110   : > { %1079 = vrot.lane.b32.xlu1 %v962_v43, %s4156_s27 }
 0x114   : > { %1192 = vrot.lane.b32.xlu1 %v962_v43, %s4154_s29  ;;  %3093 = vmatmul.mubr.msk.bf16.vlgmr.msra.gmra.mrb[4].mxu1 %vm965_vm1, %v962_v43 }
 0x115   : > { %3098 = vmatprep.mubr.msk.bf16.mxu1 %vm3428_vm0, %v3427_v4  ;;  %3097 = vmatpush3.bf16.msra.mxu1 %v1036_v52 }
 0x116   : > { %3102 = vmatprep.subr.bf16.mxu1 %v3427_v4 }
 0x118   : > { %1305 = vrot.lane.b32.xlu1 %v963_v41, %s4152_s30 }
 0x11c   : > { %1303 = vrot.lane.b32.xlu1 %v962_v43, %s4152_s30 }
 0x17e   : > { %v1083_v1 = vpop.permute.xlu1 %1082 }
 0x17f   : > { %v1088_v14 = vsel %vm965_vm1, %v1083_v1, 0 }
 0x182   : > { %v1080_v3 = vpop.permute.xlu1 %1079 }
 0x186   : > { %v1193_v6 = vpop.permute.xlu1 %1192 }
 0x18a   : > { %v1306_v9 = vpop.permute.xlu1 %1305 }
 0x18b   : > { %v1311_v12 = vsel %vm965_vm1, %v1306_v9, 0 }
 0x18e   : > { %v1304_v15 = vpop.permute.xlu1 %1303 }
 0x1e7   : > { %v1006_v54 = vpop.f32.mrb[4].mxu1 }
 0x1e8   : > { %v1017_v55 = vsel %vm1016_vm3, %v1006_v54, -1e+30  ;;  %v3094_v56 = vpop.f32.mrb[5].mxu1 }
 0x1e9   : > { %v1009_v57 = vpop.f32.mrb[6].mxu1  ;;  %v1019_v58 = vsel %vm1018_vm4, %v1017_v55, -inf }
 0x1ea   : > { %1020 = vmax.xlane.f32.xlu0 %v1019_v58  ;;  %v3095_v59 = vpop.f32.mrb[7].mxu1 }
 0x277   : > { %v1021_v60 = vpop.xlane.xlu0 %1020 }
 0x278   : > { %v1022_v61 = vsub.f32 %v1017_v55, %v1021_v60 }
 0x27a   : > { %v1023_v62 = vmul.f32 1.442695, %v1022_v61 }
 0x27c   : > { %3380 = vpow2.f32 %v1023_v62 }
 0x286   : > { %v3381_v63 = vpop.eup %3380 }
 0x287   : > { %v1025_v0 = vsel %vm1018_vm4, %v3381_v63, 0.0 }
 0x288   : > { %1026 = vadd.xlane.f32.xlu0 %v1025_v0 }
 0x29e   : > { %1194 = vrot.lane.b32.xlu0 %v963_v41, %s4154_s29 }
 0x315   : > { %v1027_v5 = vpop.xlane.xlu0 %1026 }
 0x316   : > { %3382 = vrcp.f32 %v1027_v5 }
 0x319   : > { %v1195_v7 = vpop.permute.xlu0 %1194 }
 0x31a   : > { %v1200_v8 = vsel %vm965_vm1, %v1195_v7, 0 }
 0x31b   : > { %3115 = vmatpush3.bf16.xpose.msra.mxu0 %v1200_v8 }
 0x31c   : > { %3126 = vmatprep.subr.bf16.mxu0 %v3427_v4 }
 0x320   : > { %v3383_v10 = vpop.eup %3382 }
 0x321   : > { %v1029_v11 = vmul.f32 %v3383_v10, %v3381_v63 }
 0x322   : > { %3117 = vmatmul.mubr.msk.bf16.vlgmr.msra.gmra.mrb[4].mxu0 %vm965_vm1, %v1193_v6 }
 0x323   : > { %3127 = vmatpush3.bf16.xpose.msra.mxu0 %v1311_v12  ;;  %v1030_v13 = vpack.c.bf16 %v1029_v11, %v1029_v11  ;;  %3128 = vmatprep.mubr.msk.bf16.mxu0 %vm3428_vm0, %v3427_v4  ;;  %v3292_v12 = vld [vmem:[%s4168_s1] sm:$0xff]  }
 0x324   : > { %3138 = vmatprep.subr.bf16.mxu0 %v3427_v4 }
 0x325   : > { %3099 = vmatmul.mubr.msk.bf16.vlgmr.msra.gmra.mrb[8].mxu1 %vm1018_vm4, %v1030_v13  ;;  %v3293_v13 = vld [vmem:[%s4168_s1 + $0x8] sm:$0xff]  }
 0x326   : > { %3103 = vmatpush3.bf16.xpose.msra.mxu1 %v1088_v14  ;;  %3104 = vmatprep.mubr.msk.bf16.mxu1 %vm3428_vm0, %v3427_v4  ;;  %v3294_v14 = vld [vmem:[%s4168_s1 + $0x10] sm:$0xff]  }
 0x327   : > { %3108 = vmatprep.subr.bf16.mxu1 %v3427_v4 }
 0x32a   : > { %3129 = vmatmul.mubr.msk.bf16.vlgmr.msra.gmra.mrb[8].mxu0 %vm965_vm1, %v1304_v15  ;;  %v3295_v15 = vld [vmem:[%s4168_s1 + $0x18] sm:$0xff]  }
 0x32b   : > { %3154 = vmatprep.mubr.msk.bf16.mxu0 %vm3428_vm0, %v3427_v4  ;;  %3139 = vmatpush3.bf16.msra.mxu0 %v3292_v12 }
 0x32c   : > { %3140 = vmatprep.subr.bf16.mxu0 %v3427_v4 }
 0x32d   : > { %3105 = vmatmul.mubr.msk.bf16.vlgmr.msra.gmra.mrb[12].mxu1 %vm965_vm1, %v1080_v3 }
 0x32e   : > { %3110 = vmatprep.mubr.msk.bf16.mxu1 %vm3428_vm0, %v3427_v4 }
 0x32f   : > { %3141 = vmatpush3.bf16.msra.mxu0 %v3293_v13 }
 0x330   : > { %3142 = vmatprep.subr.bf16.mxu0 %v3427_v4 }
 0x333   : > { %3143 = vmatpush3.bf16.msra.mxu0 %v3294_v14  ;;  %v3329_v14 = vld [vmem:[%s4134_s8 + $0x28] sm:$0xff]  }
 0x334   : > { %3144 = vmatprep.subr.bf16.mxu0 %v3427_v4 }
 0x337   : > { %3145 = vmatpush3.bf16.msra.mxu0 %v3295_v15  ;;  %v3330_v15 = vld [vmem:[%s4134_s8 + $0x30] sm:$0xff]  }
 0x338   : > { %3146 = vmatprep.subr.bf16.mxu0 %v3427_v4 }
 0x3f5   : > { %v1236_v16 = vpop.f32.mrb[4].mxu0 }
 0x3f6   : > { %v1242_v17 = vsel %vm1016_vm3, %v1236_v16, -1e+30  ;;  %v3118_v18 = vpop.f32.mrb[5].mxu0  ;;  %v3296_v16 = vld [vmem:[%s4168_s1 + $0x20] sm:$0xff]  }
 0x3f7   : > { %v1239_v19 = vpop.f32.mrb[6].mxu0  ;;  %v1243_v20 = vsel %vm1018_vm4, %v1242_v17, -inf  ;;  %3147 = vmatpush3.bf16.msra.mxu0 %v3296_v16  ;;  %v3298_v18 = vld [vmem:[%s4168_s1 + $0x30] sm:$0xff]   ;;  %v3331_v16 = vld [vmem:[%s4134_s8 + $0x38] sm:$0xff]  }
 0x3f8   : > { %1244 = vmax.xlane.f32.xlu0 %v1243_v20  ;;  %v3717_v21 = vpop.f32.mrb[8].mxu1  ;;  %v3119_v22 = vpop.f32.mrb[7].mxu0  ;;  %3148 = vmatprep.subr.bf16.mxu0 %v3427_v4 }
 0x3f9   : > { %v3100_v24 = vpop.f32.mrb[9].mxu1 }
 0x3fa   : > { %v1075_v25 = vpop.f32.mrb[10].mxu1 }
 0x3fb   : > { %v3101_v26 = vpop.f32.mrb[11].mxu1  ;;  %v3299_v25 = vld [vmem:[%s4168_s1 + $0x38] sm:$0xff]  }
 0x3fd   : > { %v1347_v27 = vpop.f32.mrb[8].mxu0 }
 0x3fe   : > { %v3130_v28 = vpop.f32.mrb[9].mxu0  ;;  %v1353_v39 = vsel %vm1016_vm3, %v1347_v27, -1e+30 }
 0x3ff   : > { %v1350_v31 = vpop.f32.mrb[10].mxu0  ;;  %v1354_v41 = vsel %vm1018_vm4, %v1353_v39, -inf }
 0x400   : > { %v1124_v33 = vpop.f32.mrb[12].mxu1  ;;  %v3131_v34 = vpop.f32.mrb[11].mxu0 }
 0x401   : > { %v1130_v35 = vsel %vm1016_vm3, %v1124_v33, -1e+30  ;;  %v3106_v36 = vpop.f32.mrb[13].mxu1 }
 0x402   : > { %v1127_v37 = vpop.f32.mrb[14].mxu1  ;;  %v1131_v38 = vsel %vm1018_vm4, %v1130_v35, -inf }
 0x403   : > { %1132 = vmax.xlane.f32.xlu1 %v1131_v38  ;;  %v3107_v40 = vpop.f32.mrb[15].mxu1 }
 0x407   : > { %1355 = vmax.xlane.f32.xlu1 %v1354_v41 }
 0x485   : > { %v1245_v42 = vpop.xlane.xlu0 %1244 }
 0x486   : > { %v1246_v43 = vsub.f32 %v1242_v17, %v1245_v42  ;;  %v3297_v17 = vld [vmem:[%s4168_s1 + $0x28] sm:$0xff]  }
 0x487   : > { %3149 = vmatpush3.bf16.msra.mxu0 %v3297_v17 }
 0x488   : > { %v1247_v44 = vmul.f32 1.442695, %v1246_v43  ;;  %3150 = vmatprep.subr.bf16.mxu0 %v3427_v4 }
 0x48a   : > { %3384 = vpow2.f32 %v1247_v44  ;;  %v2887_v44 = vld [vmem:[%s4169_s5] ss:$0 sm:$0xff] }
 0x48b   : > { %3151 = vmatpush3.bf16.msra.mxu0 %v3298_v18 }
 0x48c   : > { %3152 = vmatprep.subr.bf16.mxu0 %v3427_v4 }
 0x48f   : > { %3153 = vmatpush3.bf16.msra.mxu0 %v3299_v25  ;;  %v2897_v25 = vld [vmem:[%s4133_s7] ss:$0 sm:$0xff] }
 0x490   : > { %v1133_v45 = vpop.xlane.xlu1 %1132 }
 0x491   : > { %v1134_v46 = vsub.f32 %v1130_v35, %v1133_v45 }
 0x493   : > { %v1135_v52 = vmul.f32 1.442695, %v1134_v46 }
 0x494   : > { %v3385_v47 = vpop.eup %3384  ;;  %v1356_v48 = vpop.xlane.xlu1 %1355 }
 0x495   : > { %v1357_v49 = vsub.f32 %v1353_v39, %v1356_v48  ;;  %v1249_v51 = vsel %vm1018_vm4, %v3385_v47, 0.0 }
 0x496   : > { %1250 = vadd.xlane.f32.xlu0 %v1249_v51  ;;  %v3300_v51 = vld [vmem:[%s4136_s10] ss:$8 sps:$4 sm:$0xff]  }
 0x497   : > { %v1358_v29 = vmul.f32 1.442695, %v1357_v49 }
 0x499   : > { %3386 = vpow2.f32 %v1358_v29  ;;  %v3305_v29 = vld [vmem:[%s4136_s10 + $0x14] ss:$8 sps:$4 sm:$0xff]  }
 0x49a   : > { %3388 = vpow2.f32 %v1135_v52  ;;  %v3302_v52 = vld [vmem:[%s4136_s10 + $0x4] ss:$8 sps:$4 sm:$0xff]  }
 0x49b   : > { %1793 = vmatprep.subr.bf16.mxu0 %v3302_v52 }
 0x4a3   : > { %v3387_v53 = vpop.eup %3386 }
 0x4a4   : > { %v1360_v54 = vsel %vm1018_vm4, %v3387_v53, 0.0  ;;  %v3389_v55 = vpop.eup %3388 }
 0x4a5   : > { %1361 = vadd.xlane.f32.xlu1 %v1360_v54  ;;  %v1137_v56 = vsel %vm1018_vm4, %v3389_v55, 0.0  ;;  %v3308_v54 = vld [vmem:[%s4136_s10 + $0x24] ss:$8 sps:$4 sm:$0xff]  }
 0x4a9   : > { %1138 = vadd.xlane.f32.xlu1 %v1137_v56  ;;  %v3306_v56 = vld [vmem:[%s4136_s10 + $0x20] ss:$8 sps:$4 sm:$0xff]  }
 0x4ac   : > { %1144 = vrot.lane.b32.xlu0 %v3680_v50, %s4156_s27 }
 0x4ba   : > { %1255 = vrot.lane.b32.xlu1 %v3680_v50, %s4154_s29 }
 0x4be   : > { %1366 = vrot.lane.b32.xlu1 %v3680_v50, %s4152_s30 }
 0x523   : > { %v1251_v57 = vpop.xlane.xlu0 %1250 }
 0x527   : > { %v1145_v58 = vpop.permute.xlu0 %1144 }
 0x528   : > { %v1150_v59 = vsel %vm1034_vm2, %v1145_v58, 0  ;;  %v3309_v58 = vld [vmem:[%s4136_s10 + $0x30] ss:$8 sps:$4 sm:$0xff]  }
 0x529   : > { %3109 = vmatpush3.bf16.msra.mxu1 %v1150_v59  ;;  %v3315_v59 = vld [vmem:[%s4136_s10 + $0x44] ss:$8 sps:$4 sm:$0xff]  }
 0x52a   : > { %3120 = vmatprep.subr.bf16.mxu1 %v3427_v4 }
 0x532   : > { %v1362_v60 = vpop.xlane.xlu1 %1361 }
 0x536   : > { %v1139_v61 = vpop.xlane.xlu1 %1138 }
 0x537   : > { %3390 = vrcp.f32 %v1139_v61  ;;  %v3319_v61 = vld [vmem:[%s4136_s10 + $0x54] ss:$8 sps:$4 sm:$0xff]  }
 0x538   : > { %3392 = vrcp.f32 %v1251_v57  ;;  %v3311_v57 = vld [vmem:[%s4136_s10 + $0x34] ss:$8 sps:$4 sm:$0xff]  }
 0x539   : > { %3394 = vrcp.f32 %v1362_v60  ;;  %v3313_v60 = vld [vmem:[%s4136_s10 + $0x40] ss:$8 sps:$4 sm:$0xff]  }
 0x53a   : > { %v1256_v0 = vpop.permute.xlu1 %1255 }
 0x53b   : > { %v1261_v5 = vsel %vm1034_vm2, %v1256_v0, 0 }
 0x53e   : > { %v1367_v6 = vpop.permute.xlu1 %1366 }
 0x53f   : > { %v1372_v9 = vsel %vm1034_vm2, %v1367_v6, 0  ;;  %v3321_v6 = vld [vmem:[%s4136_s10 + $0x60] ss:$8 sps:$4 sm:$0xff]  }
 0x541   : > { %v3391_v62 = vpop.eup %3390 }
 0x542   : > { %v1141_v63 = vmul.f32 %v3391_v62, %v3389_v55  ;;  %v3393_v3 = vpop.eup %3392  ;;  %v3316_v55 = vld [vmem:[%s4134_s8 + $0x8] sm:$0xff]   ;;  %v3317_v62 = vld [vmem:[%s4136_s10 + $0x50] ss:$8 sps:$4 sm:$0xff]  }
 0x543   : > { %v1253_v50 = vmul.f32 %v3393_v3, %v3385_v47  ;;  %v3395_v8 = vpop.eup %3394 }
 0x544   : > { %v1142_v1 = vpack.c.bf16 %v1141_v63, %v1141_v63  ;;  %v1364_v10 = vmul.f32 %v3395_v8, %v3387_v53  ;;  %v3312_v53 = vld [vmem:[%s4134_s8] sm:$0xff]   ;;  %v3327_v8 = vld [vmem:[%s4136_s10 + $0x74] ss:$8 sps:$4 sm:$0xff]  }
 0x545   : > { %v1254_v7 = vpack.c.bf16 %v1253_v50, %v1253_v50  ;;  %v3323_v50 = vld [vmem:[%s4136_s10 + $0x64] ss:$8 sps:$4 sm:$0xff]  }
 0x546   : > { %3111 = vmatmul.mubr.msk.bf16.vlgmr.msra.gmra.mrb[16].mxu1 %vm1018_vm4, %v1142_v1  ;;  %v1365_v11 = vpack.c.bf16 %v1364_v10, %v1364_v10  ;;  %v3328_v10 = vld [vmem:[%s4134_s8 + $0x20] sm:$0xff]  }
 0x547   : > { %3121 = vmatpush3.bf16.msra.mxu1 %v1261_v5  ;;  %3122 = vmatprep.mubr.msk.bf16.mxu1 %vm3428_vm0, %v3427_v4  ;;  %v3320_v5 = vld [vmem:[%s4134_s8 + $0x10] sm:$0xff]  }
 0x548   : > { %3132 = vmatprep.subr.bf16.mxu1 %v3427_v4 }
 0x54e   : > { %3123 = vmatmul.mubr.msk.bf16.vlgmr.msra.gmra.mrb[20].mxu1 %vm1018_vm4, %v1254_v7  ;;  %v3324_v7 = vld [vmem:[%s4134_s8 + $0x18] sm:$0xff]  }
 0x54f   : > { %3133 = vmatpush3.bf16.msra.mxu1 %v1372_v9  ;;  %3134 = vmatprep.mubr.msk.bf16.mxu1 %vm3428_vm0, %v3427_v4  ;;  %v3325_v9 = vld [vmem:[%s4136_s10 + $0x70] ss:$8 sps:$4 sm:$0xff]  }
 0x550   : > { %3158 = vmatprep.subr.bf16.mxu1 %v3427_v4 }
 0x556   : > { %3135 = vmatmul.mubr.msk.bf16.vlgmr.msra.gmra.mrb[24].mxu1 %vm1018_vm4, %v1365_v11 }
 0x557   : > { %3174 = vmatprep.mubr.msk.bf16.mxu1 %vm3428_vm0, %v3427_v4  ;;  %3159 = vmatpush3.bf16.msra.mxu1 %v3312_v53 }
 0x558   : > { %3160 = vmatprep.subr.bf16.mxu1 %v3427_v4 }
 0x55b   : > { %3161 = vmatpush3.bf16.msra.mxu1 %v3316_v55 }
 0x55c   : > { %3162 = vmatprep.subr.bf16.mxu1 %v3427_v4 }
 0x55f   : > { %3163 = vmatpush3.bf16.msra.mxu1 %v3320_v5 }
 0x560   : > { %3164 = vmatprep.subr.bf16.mxu1 %v3427_v4 }
 0x563   : > { %3165 = vmatpush3.bf16.msra.mxu1 %v3324_v7 }
 0x564   : > { %3166 = vmatprep.subr.bf16.mxu1 %v3427_v4 }
 0x567   : > { %3167 = vmatpush3.bf16.msra.mxu1 %v3328_v10 }
 0x568   : > { %3168 = vmatprep.subr.bf16.mxu1 %v3427_v4 }
 0x56b   : > { %3169 = vmatpush3.bf16.msra.mxu1 %v3329_v14 }
 0x56c   : > { %3170 = vmatprep.subr.bf16.mxu1 %v3427_v4 }
 0x56f   : > { %3171 = vmatpush3.bf16.msra.mxu1 %v3330_v15 }
 0x570   : > { %3172 = vmatprep.subr.bf16.mxu1 %v3427_v4 }
 0x573   : > { %3173 = vmatpush3.bf16.msra.mxu1 %v3331_v16 }
 0x574   : > { %3178 = vmatprep.subr.bf16.mxu1 %v3427_v4 }
 0x619   : > { %v1186_v19 = vpop.f32.mrb[16].mxu1 }
 0x61a   : > { %1415 = vrot.lane.b32.xlu0 %v1186_v19, %s4152_s30  ;;  %v3112_v20 = vpop.f32.mrb[17].mxu1 }
 0x61b   : > { %v1189_v22 = vpop.f32.mrb[18].mxu1 }
 0x61c   : > { %v3113_v24 = vpop.f32.mrb[19].mxu1  ;;  %v2896_v22 = vld [vmem:[%s4171_s26] ss:$0 sm:$0xff] }
 0x621   : > { %v1297_v26 = vpop.f32.mrb[20].mxu1 }
 0x622   : > { %1419 = vrot.lane.b32.xlu1 %v1297_v26, %s4154_s29  ;;  %v3124_v27 = vpop.f32.mrb[21].mxu1 }
 0x623   : > { %v1300_v28 = vpop.f32.mrb[22].mxu1 }
 0x624   : > { %v3125_v31 = vpop.f32.mrb[23].mxu1 }
 0x625   : > { %v1701_v31 = vld [vmem:[%s4137_s11] sm:$0x3] }
 0x629   : > { %v1408_v33 = vpop.f32.mrb[24].mxu1 }
 0x62a   : > { %1423 = vrot.lane.b32.xlu0 %v1408_v33, %s4156_s27  ;;  %v3136_v34 = vpop.f32.mrb[25].mxu1  ;;  %s694_s27 = scalar_lea.vmem %s4170_s0, %s2979_s24  ;;  %v1706_v33 = vrot.slane %v1701_v31, %v3665_v32  ;;  %s4173_s24 = smov 64  }
 0x62b   : > { %v1411_v35 = vpop.f32.mrb[26].mxu1  ;;  %v701_v11 = vld [vmem:[%s694_s27] sm:$0xff]  ;;  %v702_v12 = vld [vmem:[%s694_s27 + $0x8] sm:$0xff]  ;;  %v1710_v34 = vrot.slane %v1701_v31, %v3659_v30  ;;  %s4172_s27 = smov 96  }
 0x62c   : > { %v3137_v36 = vpop.f32.mrb[27].mxu1  ;;  %v1684_v13 = vpack.c.bf16 %v702_v12, %v701_v11 }
 0x68c   : > { %v1416_v37 = vpop.permute.xlu0 %1415 }
 0x68d   : > { %v1426_v39 = vsel %vm965_vm1, %v3717_v21, %v1416_v37 }
 0x694   : > { %v1420_v38 = vpop.permute.xlu1 %1419 }
 0x695   : > { %v1428_v40 = vsel %vm1427_vm5, %v1426_v39, %v1420_v38 }
 0x69c   : > { %v1424_v41 = vpop.permute.xlu0 %1423 }
 0x69d   : > { %v1430_v42 = vsel %vm1429_vm6, %v1428_v40, %v1424_v41 }
 0x69e   : > { %v1431_v43 = vpack.c.bf16 %v1430_v42, %v1430_v42 }
 0x6a0   : > { %3155 = vmatmul.mubr.bf16.vlgmr.msra.gmra.mrb[12].mxu0 %v1431_v43 }
 0x6a1   : > { %1825 = vmatprep.mubr.bf16.mxu0 %v3426_v2  ;;  %1794 = vmatpush1.bf16.msra.mxu0 %v3300_v51 }
 0x6a2   : > { %1795 = vmatprep.subr.bf16.mxu0 %v3305_v29 }
 0x773   : > { %v1537_v45 = vpop.f32.mrb[12].mxu0 }
 0x774   : > { %v1538_v46 = vadd.f32 %v2887_v44, %v1537_v45  ;;  %v3156_v47 = vpop.f32.mrb[13].mxu0 }
 0x775   : > { %v1540_v48 = vpop.f32.mrb[14].mxu0 }
 0x776   : > { %v3157_v49 = vpop.f32.mrb[15].mxu0  ;;  %v1543_v21 = vadd.f32 %v1538_v46, %v3631_v23  ;;  %v3303_v23 = vld [vmem:[%s4136_s10 + $0x10] ss:$8 sps:$4 sm:$0xff]   ;;  %v2898_v46 = vld [vmem:[%s4135_s9] ss:$0 sm:$0xff] }
 0x777   : > { %1796 = vmatpush1.bf16.msra.mxu0 %v3303_v23 }
 0x778   : > { %1546 = vadd.xlane.f32.xlu1 %v1543_v21  ;;  %1797 = vmatprep.subr.bf16.mxu0 %v3308_v54 }
 0x77b   : > { %1798 = vmatpush1.bf16.msra.mxu0 %v3306_v56 }
 0x77c   : > { %1799 = vmatprep.subr.bf16.mxu0 %v3311_v57 }
 0x77f   : > { %1800 = vmatpush1.bf16.msra.mxu0 %v3309_v58 }
 0x780   : > { %1801 = vmatprep.subr.bf16.mxu0 %v3315_v59 }
 0x783   : > { %1802 = vmatpush1.bf16.msra.mxu0 %v3313_v60 }
 0x784   : > { %1803 = vmatprep.subr.bf16.mxu0 %v3319_v61 }
 0x787   : > { %1804 = vmatpush1.bf16.msra.mxu0 %v3317_v62 }
 0x788   : > { %1805 = vmatprep.subr.bf16.mxu0 %v3323_v50 }
 0x78b   : > { %1806 = vmatpush1.bf16.msra.mxu0 %v3321_v6 }
 0x78c   : > { %1807 = vmatprep.subr.bf16.mxu0 %v3327_v8 }
 0x78f   : > { %1808 = vmatpush1.bf16.msra.mxu0 %v3325_v9 }
 0x790   : > { %3202 = vmatprep.subr.bf16.mxu0 %v3427_v4 }
 0x792   : > { %1826 = vmatmul.mubr.bf16.vlgmr.msra.gmra.mrb[16].mxu0 %v1684_v13 }
 0x793   : > { %3204 = vmatprep.mubr.msk.bf16.mxu0 %vm3428_vm0, %v3427_v4 }
 0x805   : > { %v1547_v63 = vpop.xlane.xlu1 %1546 }
 0x806   : > { %v1549_v0 = vmul.f32 0.0078125, %v1547_v63 }
 0x808   : > { %v1550_v1 = vsub.f32 %v1543_v21, %v1549_v0 }
 0x80a   : > { %v1551_v3 = vmul.f32 %v1550_v1, %v1550_v1 }
 0x80c   : > { %1552 = vadd.xlane.f32.xlu0 %v1551_v3 }
 0x865   : > { %v1827_v35 = vpop.f32.mrb[16].mxu0 }
 0x866   : > { %v1828_v36 = vadd.f32 %v1827_v35, %v1706_v33  ;;  %v1829_v37 = vpop.f32.mrb[17].mxu0 }
 0x867   : > { %v1830_v38 = vadd.f32 %v1829_v37, %v1710_v34  ;;  %v1831_v39 = vpop.f32.mrb[18].mxu0 }
 0x868   : > { %v1832_v40 = vadd.f32 %v1831_v39, %v1706_v33  ;;  %v1833_v41 = vpop.f32.mrb[19].mxu0 }
 0x869   : > { %v1834_v42 = vadd.f32 %v1833_v41, %v1710_v34 }
 0x86a   : > { %v1837_v43 = vpack.c.bf16 %v1832_v40, %v1828_v36 }
 0x86b   : > { %v3898_v44 = vpack.c.bf16 %v1834_v42, %v1830_v38 }
 0x86c   : > { %v1843_v45 = vsel %vm965_vm1, %v1837_v43, 0 }
 0x899   : > { %v1553_v17 = vpop.xlane.xlu0 %1552 }
 0x89a   : > { %v1554_v18 = vmul.f32 0.0078125, %v1553_v17 }
 0x89c   : > { %v1555_v19 = vadd.f32 1e-05, %v1554_v18 }
 0x89e   : > { %3396 = vrsqrt.f32 %v1555_v19 }
 0x8a8   : > { %v3397_v20 = vpop.eup %3396 }
 0x8a9   : > { %v1557_v24 = vmul.f32 %v3397_v20, %v1550_v1 }
 0x8ab   : > { %v1564_v26 = vmul.f32 %v2896_v22, %v1557_v24 }
 0x8ad   : > { %v3887_v27 = vadd.f32 %v2897_v25, %v1564_v26 }
 0x8af   : > { %v1572_v28 = vpack.c.bf16 %v3887_v27, %v3887_v27 }
 0x8b1   : > { %3175 = vmatmul.mubr.bf16.vlgmr.msra.gmra.mrb[28].mxu1 %v1572_v28 }
 0x8b2   : > { %3180 = vmatprep.mubr.msk.bf16.mxu1 %vm3428_vm0, %v3427_v4  ;;  %3179 = vmatpush3.bf16.xpose.msra.mxu1 %v1843_v45 }
 0x8b3   : > { %3184 = vmatprep.subr.bf16.mxu1 %v3427_v4 }
 0x984   : > { %v1678_v47 = vpop.f32.mrb[28].mxu1 }
 0x985   : > { %v1679_v48 = vadd.f32 %v2898_v46, %v1678_v47  ;;  %v3176_v49 = vpop.f32.mrb[29].mxu1 }
 0x986   : > { %v1681_v21 = vpop.f32.mrb[30].mxu1 }
 0x987   : > { %v1836_v51 = vpack.c.bf16 %v1679_v48, %v1679_v48  ;;  %v3177_v52 = vpop.f32.mrb[31].mxu1 }
 0x989   : > { %3181 = vmatmul.mubr.msk.bf16.vlgmr.msra.gmra.mrb[32].mxu1 %vm965_vm1, %v1836_v51 }
 0x98a   : > { %3185 = vmatpush3.bf16.msra.mxu1 %v3898_v44  ;;  %3186 = vmatprep.mubr.msk.bf16.mxu1 %vm3428_vm0, %v3427_v4 }
 0x98b   : > { %3190 = vmatprep.subr.bf16.mxu1 %v3427_v4 }
 0xa5c   : > { %v1879_v29 = vpop.f32.mrb[32].mxu1 }
 0xa5d   : > { %v3182_v53 = vpop.f32.mrb[33].mxu1  ;;  %v1886_v23 = vsel %vm1885_vm7, %v1879_v29, -inf }
 0xa5e   : > { %1887 = vmax.xlane.f32.xlu0 %v1886_v23  ;;  %v1882_v54 = vpop.f32.mrb[34].mxu1 }
 0xa5f   : > { %v3183_v55 = vpop.f32.mrb[35].mxu1 }
 0xa74   : > { %1945 = vrot.lane.b32.xlu0 %v1837_v43, %s4172_s27 }
 0xa78   : > { %2052 = vrot.lane.b32.xlu0 %v1836_v51, %s4173_s24 }
 0xa7c   : > { %2160 = vrot.lane.b32.xlu0 %v1836_v51, %s4174_s6 }
 0xaeb   : > { %v1888_v56 = vpop.xlane.xlu0 %1887 }
 0xaec   : > { %v1889_v57 = vsub.f32 %v1879_v29, %v1888_v56 }
 0xaee   : > { %v1890_v58 = vmul.f32 1.442695, %v1889_v57 }
 0xaef   : > { %v1946_v1 = vpop.permute.xlu0 %1945 }
 0xaf0   : > { %3398 = vpow2.f32 %v1890_v58  ;;  %v1951_v7 = vsel %vm965_vm1, %v1946_v1, 0  ;;  %v3333_v1 = vld [vmem:[%s4138_s12 + $0x8] sm:$0xff]  }
 0xaf3   : > { %v2053_v8 = vpop.permute.xlu0 %2052 }
 0xaf7   : > { %v2161_v10 = vpop.permute.xlu0 %2160 }
 0xafa   : > { %v3399_v59 = vpop.eup %3398 }
 0xafb   : > { %v1892_v60 = vsel %vm1885_vm7, %v3399_v59, 0.0 }
 0xafc   : > { %1893 = vadd.xlane.f32.xlu1 %v1892_v60 }
 0xb0d   : > { %1942 = vrot.lane.b32.xlu1 %v1836_v51, %s4172_s27 }
 0xb11   : > { %2054 = vrot.lane.b32.xlu1 %v1837_v43, %s4173_s24 }
 0xb15   : > { %2162 = vrot.lane.b32.xlu1 %v1837_v43, %s4174_s6 }
 0xb89   : > { %v1894_v61 = vpop.xlane.xlu1 %1893 }
 0xb8a   : > { %3400 = vrcp.f32 %v1894_v61 }
 0xb8d   : > { %v1943_v62 = vpop.permute.xlu1 %1942 }
 0xb91   : > { %v2055_v63 = vpop.permute.xlu1 %2054 }
 0xb92   : > { %v2060_v0 = vsel %vm965_vm1, %v2055_v63, 0 }
 0xb93   : > { %3203 = vmatpush3.bf16.xpose.msra.mxu0 %v2060_v0  ;;  %v3332_v0 = vld [vmem:[%s4138_s12] sm:$0xff]  }
 0xb94   : > { %v3401_v3 = vpop.eup %3400  ;;  %3214 = vmatprep.subr.bf16.mxu0 %v3427_v4 }
 0xb95   : > { %v1896_v5 = vmul.f32 %v3401_v3, %v3399_v59  ;;  %v2163_v50 = vpop.permute.xlu1 %2162  ;;  %v3334_v3 = vld [vmem:[%s4138_s12 + $0x10] sm:$0xff]  }
 0xb96   : > { %v2168_v9 = vsel %vm965_vm1, %v2163_v50, 0  ;;  %v3337_v50 = vld [vmem:[%s4138_s12 + $0x28] sm:$0xff]  }
 0xb97   : > { %v1897_v6 = vpack.c.bf16 %v1896_v5, %v1896_v5  ;;  %v3336_v5 = vld [vmem:[%s4138_s12 + $0x20] sm:$0xff]  }
 0xb99   : > { %3187 = vmatmul.mubr.msk.bf16.vlgmr.msra.gmra.mrb[36].mxu1 %vm1885_vm7, %v1897_v6  ;;  %v3338_v6 = vld [vmem:[%s4138_s12 + $0x30] sm:$0xff]  }
 0xb9a   : > { %3191 = vmatpush3.bf16.xpose.msra.mxu1 %v1951_v7  ;;  %3205 = vmatmul.mubr.msk.bf16.vlgmr.msra.gmra.mrb[20].mxu0 %vm965_vm1, %v2053_v8 }
 0xb9b   : > { %3215 = vmatpush3.bf16.xpose.msra.mxu0 %v2168_v9  ;;  %3192 = vmatprep.mubr.msk.bf16.mxu1 %vm3428_vm0, %v3427_v4 }
 0xb9c   : > { %3216 = vmatprep.mubr.msk.bf16.mxu0 %vm3428_vm0, %v3427_v4  ;;  %3196 = vmatprep.subr.bf16.mxu1 %v3427_v4 }
 0xb9d   : > { %3226 = vmatprep.subr.bf16.mxu0 %v3427_v4 }
 0xba1   : > { %3193 = vmatmul.mubr.msk.bf16.vlgmr.msra.gmra.mrb[40].mxu1 %vm965_vm1, %v1943_v62 }
 0xba2   : > { %3217 = vmatmul.mubr.msk.bf16.vlgmr.msra.gmra.mrb[24].mxu0 %vm965_vm1, %v2161_v10  ;;  %3198 = vmatprep.mubr.msk.bf16.mxu1 %vm3428_vm0, %v3427_v4 }
 0xba3   : > { %3242 = vmatprep.mubr.msk.bf16.mxu0 %vm3428_vm0, %v3427_v4  ;;  %3227 = vmatpush3.bf16.msra.mxu0 %v3332_v0  ;;  %v3372_v0 = vld [vmem:[%s4144_s18 + $0x60] sm:$0xff]  }
 0xba4   : > { %3228 = vmatprep.subr.bf16.mxu0 %v3427_v4 }
 0xba7   : > { %3229 = vmatpush3.bf16.msra.mxu0 %v3333_v1  ;;  %v3373_v1 = vld [vmem:[%s4144_s18 + $0x20] sm:$0xff]  }
 0xba8   : > { %3230 = vmatprep.subr.bf16.mxu0 %v3427_v4 }
 0xbab   : > { %3231 = vmatpush3.bf16.msra.mxu0 %v3334_v3  ;;  %v3374_v3 = vld [vmem:[%s4144_s18 + $0x68] sm:$0xff]  }
 0xbac   : > { %3232 = vmatprep.subr.bf16.mxu0 %v3427_v4 }
 0xc6c   : > { %v3936_v11 = vpop.f32.mrb[36].mxu1 }
 0xc6d   : > { %v3188_v12 = vpop.f32.mrb[37].mxu1  ;;  %v2096_v13 = vpop.f32.mrb[20].mxu0 }
 0xc6e   : > { %v1938_v14 = vpop.f32.mrb[38].mxu1  ;;  %v3206_v15 = vpop.f32.mrb[21].mxu0  ;;  %v2102_v16 = vsel %vm1885_vm7, %v2096_v13, -inf  ;;  %v3339_v12 = vld [vmem:[%s4138_s12 + $0x38] sm:$0xff]  }
 0xc6f   : > { %2103 = vmax.xlane.f32.xlu0 %v2102_v16  ;;  %v3189_v17 = vpop.f32.mrb[39].mxu1  ;;  %v2099_v18 = vpop.f32.mrb[22].mxu0 }
 0xc70   : > { %v3207_v19 = vpop.f32.mrb[23].mxu0 }
 0xc74   : > { %v1987_v20 = vpop.f32.mrb[40].mxu1 }
 0xc75   : > { %v3194_v22 = vpop.f32.mrb[41].mxu1  ;;  %v2204_v24 = vpop.f32.mrb[24].mxu0  ;;  %v1993_v25 = vsel %vm1885_vm7, %v1987_v20, -inf }
 0xc76   : > { %v3218_v26 = vpop.f32.mrb[25].mxu0  ;;  %1994 = vmax.xlane.f32.xlu1 %v1993_v25  ;;  %v1990_v28 = vpop.f32.mrb[42].mxu1  ;;  %v2210_v31 = vsel %vm1885_vm7, %v2204_v24, -inf }
 0xc77   : > { %2211 = vmax.xlane.f32.xlu0 %v2210_v31  ;;  %v3195_v33 = vpop.f32.mrb[43].mxu1  ;;  %v2207_v34 = vpop.f32.mrb[26].mxu0 }
 0xc78   : > { %v3219_v35 = vpop.f32.mrb[27].mxu0  ;;  %v2931_v33 = vld [vmem:[%s4139_s13] ss:$0 sm:$0xff] }
 0xcfc   : > { %v2104_v36 = vpop.xlane.xlu0 %2103 }
 0xcfd   : > { %v2105_v37 = vsub.f32 %v2096_v13, %v2104_v36 }
 0xcff   : > { %v2106_v38 = vmul.f32 1.442695, %v2105_v37 }
 0xd01   : > { %3402 = vpow2.f32 %v2106_v38 }
 0xd03   : > { %v1995_v39 = vpop.xlane.xlu1 %1994 }
 0xd04   : > { %v1996_v40 = vsub.f32 %v1987_v20, %v1995_v39  ;;  %v2212_v41 = vpop.xlane.xlu0 %2211 }
 0xd05   : > { %v2213_v42 = vsub.f32 %v2204_v24, %v2212_v41  ;;  %v3345_v41 = vld [vmem:[%s4142_s16 + $0x14] ss:$8 sps:$4 sm:$0xff]  }
 0xd06   : > { %v1997_v43 = vmul.f32 1.442695, %v1996_v40  ;;  %v3342_v40 = vld [vmem:[%s4142_s16 + $0x4] ss:$8 sps:$4 sm:$0xff]  }
 0xd07   : > { %v2214_v45 = vmul.f32 1.442695, %v2213_v42  ;;  %v3343_v42 = vld [vmem:[%s4142_s16 + $0x10] ss:$8 sps:$4 sm:$0xff]  }
 0xd09   : > { %3404 = vpow2.f32 %v2214_v45 }
 0xd0a   : > { %3406 = vpow2.f32 %v1997_v43  ;;  %v3346_v43 = vld [vmem:[%s4142_s16 + $0x20] ss:$8 sps:$4 sm:$0xff]  }
 0xd0b   : > { %v3403_v46 = vpop.eup %3402 }
 0xd0c   : > { %v2108_v47 = vsel %vm1885_vm7, %v3403_v46, 0.0 }
 0xd0d   : > { %2109 = vadd.xlane.f32.xlu0 %v2108_v47 }
 0xd13   : > { %v3405_v48 = vpop.eup %3404 }
 0xd14   : > { %v2216_v49 = vsel %vm1885_vm7, %v3405_v48, 0.0  ;;  %v3407_v21 = vpop.eup %3406 }
 0xd15   : > { %2217 = vadd.xlane.f32.xlu1 %v2216_v49  ;;  %v1999_v51 = vsel %vm1885_vm7, %v3407_v21, 0.0  ;;  %v3351_v49 = vld [vmem:[%s4142_s16 + $0x34] ss:$8 sps:$4 sm:$0xff]  }
 0xd19   : > { %2000 = vadd.xlane.f32.xlu1 %v1999_v51  ;;  %v3354_v51 = vld [vmem:[%s4142_s16 + $0x44] ss:$8 sps:$4 sm:$0xff]  }
 0xd23   : > { %2006 = vrot.lane.b32.xlu0 %v3898_v44, %s4172_s27 }
 0xd2a   : > { %2114 = vrot.lane.b32.xlu1 %v3898_v44, %s4173_s24 }
 0xd2e   : > { %2222 = vrot.lane.b32.xlu1 %v3898_v44, %s4174_s6 }
 0xd9a   : > { %v2110_v52 = vpop.xlane.xlu0 %2109 }
 0xd9e   : > { %v2007_v29 = vpop.permute.xlu0 %2006 }
 0xd9f   : > { %3197 = vmatpush3.bf16.msra.mxu1 %v2007_v29  ;;  %v3357_v29 = vld [vmem:[%s4142_s16 + $0x54] ss:$8 sps:$4 sm:$0xff]  }
 0xda0   : > { %3208 = vmatprep.subr.bf16.mxu1 %v3427_v4 }
 0xda2   : > { %v2218_v53 = vpop.xlane.xlu1 %2217 }
 0xda6   : > { %v2001_v23 = vpop.xlane.xlu1 %2000 }
 0xda7   : > { %3408 = vrcp.f32 %v2001_v23  ;;  %v3360_v23 = vld [vmem:[%s4142_s16 + $0x64] ss:$8 sps:$4 sm:$0xff]  }
 0xda8   : > { %3410 = vrcp.f32 %v2110_v52  ;;  %v3352_v52 = vld [vmem:[%s4142_s16 + $0x40] ss:$8 sps:$4 sm:$0xff]  }
 0xda9   : > { %3412 = vrcp.f32 %v2218_v53  ;;  %v3355_v53 = vld [vmem:[%s4142_s16 + $0x50] ss:$8 sps:$4 sm:$0xff]  }
 0xdaa   : > { %v2115_v58 = vpop.permute.xlu1 %2114 }
 0xdae   : > { %v2223_v61 = vpop.permute.xlu1 %2222 }
 0xdb1   : > { %v3409_v54 = vpop.eup %3408 }
 0xdb2   : > { %v2003_v55 = vmul.f32 %v3409_v54, %v3407_v21  ;;  %v3411_v57 = vpop.eup %3410  ;;  %v3349_v21 = vld [vmem:[%s4142_s16 + $0x30] ss:$8 sps:$4 sm:$0xff]   ;;  %v3358_v54 = vld [vmem:[%s4142_s16 + $0x60] ss:$8 sps:$4 sm:$0xff]  }
 0xdb3   : > { %v2112_v44 = vmul.f32 %v3411_v57, %v3403_v46  ;;  %v3413_v60 = vpop.eup %3412  ;;  %v3364_v57 = vld [vmem:[%s4144_s18 + $0x40] sm:$0xff]  }
 0xdb4   : > { %v2004_v56 = vpack.c.bf16 %v2003_v55, %v2003_v55  ;;  %v2220_v62 = vmul.f32 %v3413_v60, %v3405_v48  ;;  %v3363_v55 = vld [vmem:[%s4142_s16 + $0x74] ss:$8 sps:$4 sm:$0xff]  }
 0xdb5   : > { %v2113_v59 = vpack.c.bf16 %v2112_v44, %v2112_v44  ;;  %v3366_v44 = vld [vmem:[%s4144_s18 + $0x48] sm:$0xff]   ;;  %v3368_v60 = vld [vmem:[%s4144_s18 + $0x50] sm:$0xff]  }
 0xdb6   : > { %3199 = vmatmul.mubr.msk.bf16.vlgmr.msra.gmra.mrb[44].mxu1 %vm1885_vm7, %v2004_v56  ;;  %v2221_v63 = vpack.c.bf16 %v2220_v62, %v2220_v62  ;;  %v3361_v56 = vld [vmem:[%s4142_s16 + $0x70] ss:$8 sps:$4 sm:$0xff]  }
 0xdb7   : > { %3209 = vmatpush3.bf16.msra.mxu1 %v2115_v58  ;;  %3210 = vmatprep.mubr.msk.bf16.mxu1 %vm3428_vm0, %v3427_v4  ;;  %v3365_v58 = vld [vmem:[%s4144_s18] sm:$0xff]   ;;  %v3370_v62 = vld [vmem:[%s4144_s18 + $0x58] sm:$0xff]  }
 0xdb8   : > { %3220 = vmatprep.subr.bf16.mxu1 %v3427_v4 }
 0xdbe   : > { %3211 = vmatmul.mubr.msk.bf16.vlgmr.msra.gmra.mrb[48].mxu1 %vm1885_vm7, %v2113_v59  ;;  %v3367_v59 = vld [vmem:[%s4144_s18 + $0x8] sm:$0xff]  }
 0xdbf   : > { %3221 = vmatpush3.bf16.msra.mxu1 %v2223_v61  ;;  %3222 = vmatprep.mubr.msk.bf16.mxu1 %vm3428_vm0, %v3427_v4  ;;  %v3369_v61 = vld [vmem:[%s4144_s18 + $0x10] sm:$0xff]  }
 0xdc0   : > { %2532 = vmatprep.subr.bf16.mxu1 %v3342_v40 }
 0xdc6   : > { %3223 = vmatmul.mubr.msk.bf16.vlgmr.msra.gmra.mrb[52].mxu1 %vm1885_vm7, %v2221_v63  ;;  %v3371_v63 = vld [vmem:[%s4144_s18 + $0x18] sm:$0xff]  }
 0xdc7   : > { %2564 = vmatprep.mubr.bf16.mxu1 %v3426_v2  ;;  %v3335_v2 = vld [vmem:[%s4138_s12 + $0x18] sm:$0xff]  }
 0xdc8   : > { %3233 = vmatpush3.bf16.msra.mxu0 %v3335_v2  ;;  %v3375_v2 = vld [vmem:[%s4144_s18 + $0x28] sm:$0xff]  }
 0xdc9   : > { %3234 = vmatprep.subr.bf16.mxu0 %v3427_v4 }
 0xdcc   : > { %3235 = vmatpush3.bf16.msra.mxu0 %v3336_v5 }
 0xdcd   : > { %3236 = vmatprep.subr.bf16.mxu0 %v3427_v4 }
 0xdd0   : > { %3237 = vmatpush3.bf16.msra.mxu0 %v3337_v50 }
 0xdd1   : > { %3238 = vmatprep.subr.bf16.mxu0 %v3427_v4 }
 0xdd4   : > { %3239 = vmatpush3.bf16.msra.mxu0 %v3338_v6 }
 0xdd5   : > { %3240 = vmatprep.subr.bf16.mxu0 %v3427_v4 }
 0xdd8   : > { %3241 = vmatpush3.bf16.msra.mxu0 %v3339_v12 }
 0xdd9   : > { %3048 = vmatprep.subr.bf16.mxu0 %v3364_v57 }
 0xe89   : > { %v2046_v7 = vpop.f32.mrb[44].mxu1 }
 0xe8a   : > { %2269 = vrot.lane.b32.xlu0 %v2046_v7, %s4174_s6  ;;  %v3200_v8 = vpop.f32.mrb[45].mxu1  ;;  %s4175_s6 = sshll.u32 %s4177_s28, 3 }
 0xe8b   : > { %v2049_v9 = vpop.f32.mrb[46].mxu1  ;;  %v2940_v8 = vld [vmem:[%s4140_s14] ss:$0 sm:$0xff]  ;;  %s698_s26 = scalar_lea.vmem %s4148_s22, %s4175_s6 }
 0xe8c   : > { %v3201_v10 = vpop.f32.mrb[47].mxu1 }
 0xe8d   : > { %v2941_v10 = vld [vmem:[%s4141_s15] ss:$0 sm:$0xff] }
 0xe91   : > { %v2154_v13 = vpop.f32.mrb[48].mxu1 }
 0xe92   : > { %2273 = vrot.lane.b32.xlu1 %v2154_v13, %s4173_s24  ;;  %v3212_v14 = vpop.f32.mrb[49].mxu1 }
 0xe93   : > { %v2157_v15 = vpop.f32.mrb[50].mxu1 }
 0xe94   : > { %v3213_v16 = vpop.f32.mrb[51].mxu1  ;;  %v3376_v15 = vld [vmem:[%s4144_s18 + $0x70] sm:$0xff]  }
 0xe95   : > { %v3377_v16 = vld [vmem:[%s4144_s18 + $0x30] sm:$0xff]  }
 0xe99   : > { %v2262_v17 = vpop.f32.mrb[52].mxu1 }
 0xe9a   : > { %2277 = vrot.lane.b32.xlu0 %v2262_v17, %s4172_s27  ;;  %v3224_v18 = vpop.f32.mrb[53].mxu1  ;;  %v3378_v17 = vld [vmem:[%s4144_s18 + $0x78] sm:$0xff]  }
 0xe9b   : > { %v2265_v19 = vpop.f32.mrb[54].mxu1  ;;  %v3379_v18 = vld [vmem:[%s4144_s18 + $0x38] sm:$0xff]  }
 0xe9c   : > { %v3225_v20 = vpop.f32.mrb[55].mxu1  ;;  %v2440_v19 = vld [vmem:[%s4143_s17] sm:$0x3] }
 0xe9d   : > { %v2445_v20 = vrot.slane %v2440_v19, %v3665_v32 }
 0xefc   : > { %v2270_v22 = vpop.permute.xlu0 %2269 }
 0xefd   : > { %v2280_v24 = vsel %vm965_vm1, %v3936_v11, %v2270_v22  ;;  %v3340_v11 = vld [vmem:[%s4142_s16] ss:$8 sps:$4 sm:$0xff]   ;;  %v2449_v22 = vrot.slane %v2440_v19, %v3659_v30 }
 0xefe   : > { %2533 = vmatpush1.bf16.msra.mxu1 %v3340_v11 }
 0xeff   : > { %2534 = vmatprep.subr.bf16.mxu1 %v3345_v41 }
 0xf02   : > { %2535 = vmatpush1.bf16.msra.mxu1 %v3343_v42 }
 0xf04   : > { %v2274_v4 = vpop.permute.xlu1 %2273 }
 0xf05   : > { %v2281_v25 = vsel %vm1427_vm5, %v2280_v24, %v2274_v4 }
 0xf0c   : > { %v2278_v26 = vpop.permute.xlu0 %2277 }
 0xf0d   : > { %v2282_v28 = vsel %vm1429_vm6, %v2281_v25, %v2278_v26 }
 0xf0e   : > { %v2283_v31 = vpack.c.bf16 %v2282_v28, %v2282_v28 }
 0xf10   : > { %3243 = vmatmul.mubr.bf16.vlgmr.msra.gmra.mrb[28].mxu0 %v2283_v31 }
 0xf11   : > { %3049 = vmatpush3.bf16.msra.mxu0 %v3365_v58 }
 0xf12   : > { %3050 = vmatprep.subr.bf16.mxu0 %v3366_v44 }
 0xf15   : > { %3051 = vmatpush3.bf16.msra.mxu0 %v3367_v59 }
 0xf16   : > { %3052 = vmatprep.subr.bf16.mxu0 %v3368_v60 }
 0xf19   : > { %3053 = vmatpush3.bf16.msra.mxu0 %v3369_v61 }
 0xf1a   : > { %3054 = vmatprep.subr.bf16.mxu0 %v3370_v62 }
 0xf1d   : > { %3055 = vmatpush3.bf16.msra.mxu0 %v3371_v63 }
 0xf1e   : > { %3056 = vmatprep.subr.bf16.mxu0 %v3372_v0 }
 0xf21   : > { %3057 = vmatpush3.bf16.msra.mxu0 %v3373_v1 }
 0xf22   : > { %3058 = vmatprep.subr.bf16.mxu0 %v3374_v3 }
 0xf25   : > { %3059 = vmatpush3.bf16.msra.mxu0 %v3375_v2 }
 0xf26   : > { %3060 = vmatprep.subr.bf16.mxu0 %v3376_v15 }
 0xf29   : > { %3061 = vmatpush3.bf16.msra.mxu0 %v3377_v16 }
 0xf2a   : > { %3062 = vmatprep.subr.bf16.mxu0 %v3378_v17 }
 0xf2d   : > { %3063 = vmatpush3.bf16.msra.mxu0 %v3379_v18 }
 0xfe3   : > { %v2389_v34 = vpop.f32.mrb[28].mxu0 }
 0xfe4   : > { %v2390_v35 = vadd.f32 %v2931_v33, %v2389_v34  ;;  %v3244_v36 = vpop.f32.mrb[29].mxu0 }
 0xfe5   : > { %v2392_v37 = vpop.f32.mrb[30].mxu0 }
 0xfe6   : > { %v3245_v38 = vpop.f32.mrb[31].mxu0  ;;  %v2395_v39 = vadd.f32 %v2390_v35, %v3887_v27  ;;  %v3348_v27 = vld [vmem:[%s4142_s16 + $0x24] ss:$8 sps:$4 sm:$0xff]  }
 0xfe7   : > { %2536 = vmatprep.subr.bf16.mxu1 %v3348_v27  ;;  %v2958_v38 = vld [vmem:[%s4145_s19] ss:$0 sm:$0xff] }
 0xfe8   : > { %2398 = vadd.xlane.f32.xlu1 %v2395_v39  ;;  %2537 = vmatpush1.bf16.msra.mxu1 %v3346_v43 }
 0xfe9   : > { %2538 = vmatprep.subr.bf16.mxu1 %v3351_v49 }
 0xfec   : > { %2539 = vmatpush1.bf16.msra.mxu1 %v3349_v21  ;;  %v2975_v21 = vld [vmem:[%s4146_s20] ss:$0 sm:$0xff] }
 0xfed   : > { %2540 = vmatprep.subr.bf16.mxu1 %v3354_v51 }
 0xff0   : > { %2541 = vmatpush1.bf16.msra.mxu1 %v3352_v52  ;;  %v2976_v52 = vld [vmem:[%s4147_s21] ss:$0 sm:$0xff] }
 0xff1   : > { %2542 = vmatprep.subr.bf16.mxu1 %v3357_v29 }
 0xff4   : > { %2543 = vmatpush1.bf16.msra.mxu1 %v3355_v53 }
 0xff5   : > { %2544 = vmatprep.subr.bf16.mxu1 %v3360_v23 }
 0xff8   : > { %2545 = vmatpush1.bf16.msra.mxu1 %v3358_v54 }
 0xff9   : > { %2546 = vmatprep.subr.bf16.mxu1 %v3363_v55 }
 0xffc   : > { %2547 = vmatpush1.bf16.msra.mxu1 %v3361_v56 }
0x1075   : > { %v2399_v45 = vpop.xlane.xlu1 %2398 }
0x1076   : > { %v2400_v46 = vmul.f32 0.0078125, %v2399_v45 }
0x1078   : > { %v2401_v47 = vsub.f32 %v2395_v39, %v2400_v46 }
0x107a   : > { %v2402_v48 = vmul.f32 %v2401_v47, %v2401_v47 }
0x107c   : > { %2403 = vadd.xlane.f32.xlu0 %v2402_v48 }
0x1109   : > { %v2404_v5 = vpop.xlane.xlu0 %2403 }
0x110a   : > { %v2405_v50 = vmul.f32 0.0078125, %v2404_v5 }
0x110c   : > { %v2406_v6 = vadd.f32 1e-05, %v2405_v50 }
0x110e   : > { %3414 = vrsqrt.f32 %v2406_v6 }
0x1118   : > { %v3415_v7 = vpop.eup %3414 }
0x1119   : > { %v2408_v9 = vmul.f32 %v3415_v7, %v2401_v47 }
0x111b   : > { %v2415_v12 = vmul.f32 %v2940_v8, %v2408_v9 }
0x111d   : > { %v2422_v13 = vadd.f32 %v2941_v10, %v2415_v12 }
0x111f   : > { %v2423_v14 = vpack.c.bf16 %v2422_v13, %v2422_v13 }
0x1121   : > { %2565 = vmatmul.mubr.bf16.vlgmr.msra.gmra.mrb[56].mxu1 %v2423_v14 }
0x11f4   : > { %v2566_v4 = vpop.f32.mrb[56].mxu1 }
0x11f5   : > { %v2567_v24 = vadd.f32 %v2566_v4, %v2445_v20  ;;  %v2568_v25 = vpop.f32.mrb[57].mxu1 }
0x11f6   : > { %v2569_v26 = vadd.f32 %v2568_v25, %v2449_v22  ;;  %v2570_v28 = vpop.f32.mrb[58].mxu1 }
0x11f7   : > { %v2573_v31 = vmax.f32 %v2567_v24, 0.0  ;;  %v2571_v33 = vpop.f32.mrb[59].mxu1 }
0x11f8   : > { %v2574_v34 = vmax.f32 %v2569_v26, 0.0 }
0x11f9   : > { %v2575_v36 = vpack.c.bf16 %v2573_v31, %v2573_v31 }
0x11fa   : > { %v2576_v35 = vpack.c.bf16 %v2574_v34, %v2574_v34 }
0x11fc   : > { %2744 = vmatprep.mubr.bf16.mxu0 %v2576_v35 }
0x11fd   : > { %2745 = vmatmul.mubr.bf16.vlgmr.msra.gmra.mrb[32].mxu0 %v2575_v36 }
0x12d0   : > { %v3064_v37 = vpop.f32.mrb[32].mxu0 }
0x12d1   : > { %v3065_v32 = vpop.f32.mrb[33].mxu0 }
0x12d2   : > { %v3066_v39 = vadd.f32 %v3065_v32, %v3064_v37  ;;  %v3067_v30 = vpop.f32.mrb[34].mxu0 }
0x12d3   : > { %v3068_v11 = vpop.f32.mrb[35].mxu0 }
0x12d4   : > { %v2747_v40 = vadd.f32 %v3066_v39, %v2958_v38 }
0x12d6   : > { %v2752_v41 = vadd.f32 %v2747_v40, %v2422_v13 }
0x12d8   : > { %2755 = vadd.xlane.f32.xlu0 %v2752_v41 }
0x1365   : > { %v2756_v42 = vpop.xlane.xlu0 %2755 }
0x1366   : > { %v2757_v27 = vmul.f32 0.0078125, %v2756_v42 }
0x1368   : > { %v2758_v43 = vsub.f32 %v2752_v41, %v2757_v27 }
0x136a   : > { %v2759_v45 = vmul.f32 %v2758_v43, %v2758_v43 }
0x136c   : > { %2760 = vadd.xlane.f32.xlu1 %v2759_v45 }
0x13f9   : > { %v2761_v46 = vpop.xlane.xlu1 %2760 }
0x13fa   : > { %v2762_v47 = vmul.f32 0.0078125, %v2761_v46 }
0x13fc   : > { %v2763_v48 = vadd.f32 1e-05, %v2762_v47 }
0x13fe   : > { %3416 = vrsqrt.f32 %v2763_v48 }
0x1408   : > { %v3417_v49 = vpop.eup %3416 }
0x1409   : > { %v2765_v51 = vmul.f32 %v3417_v49, %v2758_v43 }
0x140b   : > { %v2772_v29 = vmul.f32 %v2975_v21, %v2765_v51 }
0x140d   : > { %v2779_v53 = vadd.f32 %v2976_v52, %v2772_v29 }
0x140f   : > { %2780 = vst [vmem:[%s698_s26] sm:$0xff] %v2779_v53 }
0x1410 PF: > { %s32_s3 = sadd.s32 1, %s3424_s3  }
0x1411   : > { %p29_p4 = scmp.ge.s32.totalorder %s32_s3, 4  }
0x1413   :  { %31 = sbr.rel (!%p29_p4) target bundleno = 8 (0x8), region = 141 }

</bundles_post_ra>
